<compile_context>
chip_gen: v7x
topology: tpu7x:2x2x1
jax: 0.10.0
libtpu: 0.0.40
codegen_flags: <defaults>
</compile_context>

<pallas_src>
import math
from functools import partial

import jax
import jax.numpy as jnp
from jax.experimental import pallas as pl
from jax.experimental.pallas import tpu as pltpu


# ---------------------------------------------------------------------------
# In-kernel helpers (values, channel-major (C, L), f32 math)
# ---------------------------------------------------------------------------

def _gn_silu(x, gamma, beta, *, groups, eps):
    """GroupNorm (two-pass biased variance, per-channel affine) fused with SiLU.

    x: (C, L) f32, gamma/beta: (C, 1) f32.
    """
    C, L = x.shape
    cg = C // groups
    inv_n = 1.0 / (cg * L)

    def group_combine(v):
        """(C, 1) per-channel sums -> within-group sums broadcast back to channels."""
        if cg == 1:
            return v
        if cg == 2:
            # partner channel = c ^ 1: two sublane rolls + even/odd select (XLU+VPU, no MXU)
            ch = jax.lax.broadcasted_iota(jnp.int32, v.shape, 0)
            prev = pltpu.roll(v, 1, axis=0)          # v[c - 1]
            nxt = pltpu.roll(v, C - 1, axis=0)       # v[c + 1]
            return v + jnp.where(ch % 2 == 0, nxt, prev)
        # general cg: single (C, C) same-group mask matmul (one MXU push instead of two)
        r = jax.lax.broadcasted_iota(jnp.int32, (C, C), 0)
        c = jax.lax.broadcasted_iota(jnp.int32, (C, C), 1)
        mask = (r // cg == c // cg).astype(jnp.float32)
        return jnp.dot(mask, v, preferred_element_type=jnp.float32)

    mean = group_combine(jnp.sum(x, axis=1, keepdims=True)) * inv_n      # (C, 1)
    d = x - mean
    var = group_combine(jnp.sum(d * d, axis=1, keepdims=True)) * inv_n   # (C, 1), >= 0
    y = d * (jax.lax.rsqrt(var + eps) * gamma) + beta
    return y * jax.nn.sigmoid(y)                                         # SiLU (EUP)


def _conv3_taps(h, not_first, not_last):
    """3 shifted taps of a zero-padded conv1d (k=3, pad=1).  h: (C, L) f32."""
    L = h.shape[1]
    left = pltpu.roll(h, 1, axis=1) * not_first       # h[:, l-1], zero at l == 0
    right = pltpu.roll(h, L - 1, axis=1) * not_last   # h[:, l+1], zero at l == L-1
    return left, h, right


# ---------------------------------------------------------------------------
# Fused ResnetBlock kernel (one grid step per batch tile of `bt` samples)
# ---------------------------------------------------------------------------

def _resnet_block_kernel(x_ref, g1_ref, be1_ref, w1_ref, b1_ref,
                         g2_ref, be2_ref, w2_ref, b2_ref,
                         o_ref, taps1_ref, rhs2_ref,
                         *, groups, eps, skip_scale, has_shortcut, bt):
    C_in, L = x_ref.shape[1], x_ref.shape[2]
    C_out = o_ref.shape[1]
    mm_dtype = taps1_ref.dtype

    # lane-boundary masks for the zero-padded k=3 conv, shared by both convs / all samples
    lane = jax.lax.broadcasted_iota(jnp.int32, (1, L), 1)
    not_first = (lane > 0).astype(jnp.float32)
    not_last = (lane < L - 1).astype(jnp.float32)

    g1, be1 = g1_ref[...], be1_ref[...]
    g2, be2 = g2_ref[...], be2_ref[...]

    # ---- stage 1: per-sample GN1 + SiLU, write conv1 taps (and shortcut rows) to scratch
    for b in range(bt):
        x_b = x_ref[b].astype(jnp.float32)                                 # (C_in, L)
        h = _gn_silu(x_b, g1, be1, groups=groups, eps=eps)
        left, mid, right = _conv3_taps(h, not_first, not_last)
        c0, c1 = b * L, (b + 1) * L
        taps1_ref[0:C_in, c0:c1] = left.astype(mm_dtype)
        taps1_ref[C_in:2 * C_in, c0:c1] = mid.astype(mm_dtype)
        taps1_ref[2 * C_in:3 * C_in, c0:c1] = right.astype(mm_dtype)
        if has_shortcut:                                                   # 1x1-conv shortcut rows
            rhs2_ref[3 * C_out:3 * C_out + C_in, c0:c1] = x_b.astype(mm_dtype)

    # ---- conv1: one lane-dense MXU matmul over the whole batch tile (N = bt*L)
    h1 = jnp.dot(w1_ref[...], taps1_ref[...],
                 preferred_element_type=jnp.float32) + b1_ref[...]         # (C_out, bt*L) f32

    # ---- stage 2: per-sample GN2 + SiLU, write conv2 taps to scratch
    for b in range(bt):
        c0, c1 = b * L, (b + 1) * L
        h_b = _gn_silu(h1[:, c0:c1], g2, be2, groups=groups, eps=eps)
        left, mid, right = _conv3_taps(h_b, not_first, not_last)
        rhs2_ref[0:C_out, c0:c1] = left.astype(mm_dtype)
        rhs2_ref[C_out:2 * C_out, c0:c1] = mid.astype(mm_dtype)
        rhs2_ref[2 * C_out:3 * C_out, c0:c1] = right.astype(mm_dtype)

    # ---- conv2 fused with the 1x1 shortcut: ONE matmul (shortcut bias pre-folded into b2)
    h2 = jnp.dot(w2_ref[...], rhs2_ref[...],
                 preferred_element_type=jnp.float32) + b2_ref[...]         # (C_out, bt*L) f32

    # ---- epilogue: identity residual (no-shortcut case) + skip_scale, lane-dense stores
    for b in range(bt):
        out_b = h2[:, b * L:(b + 1) * L]
        if not has_shortcut:
            out_b = out_b + x_ref[b].astype(jnp.float32)
        o_ref[b] = (out_b * skip_scale).astype(o_ref.dtype)


# ---------------------------------------------------------------------------
# One-time parameter packing (PyTorch layout -> kernel layout)
# ---------------------------------------------------------------------------

def pack_resnet_block_params(params, *, matmul_dtype=jnp.bfloat16):
    """Pack PyTorch-layout ResnetBlock params once at init.

    Conv weights are flattened k-major to (C_out, 3*C); the 1x1 shortcut (if present) is
    hstacked onto the conv2 weight and its bias folded into the conv2 bias; matmul
    operands are cast to `matmul_dtype` (bf16 by default for MXU throughput).
    """
    f32 = jnp.float32
    C_out, C_in, _ = params['conv1_w'].shape
    w1 = jnp.transpose(params['conv1_w'], (0, 2, 1)).reshape(C_out, 3 * C_in)
    w2 = jnp.transpose(params['conv2_w'], (0, 2, 1)).reshape(C_out, 3 * C_out)
    b2 = params['conv2_b'].reshape(C_out, 1).astype(f32)
    if 'short_w' in params:
        w2 = jnp.concatenate([w2, params['short_w'].reshape(C_out, C_in)], axis=1)
        b2 = b2 + params['short_b'].reshape(C_out, 1).astype(f32)
    return {
        'norm1_g': params['norm1_g'].reshape(C_in, 1).astype(f32),
        'norm1_b': params['norm1_b'].reshape(C_in, 1).astype(f32),
        'w1': w1.astype(matmul_dtype),
        'b1': params['conv1_b'].reshape(C_out, 1).astype(f32),
        'norm2_g': params['norm2_g'].reshape(C_out, 1).astype(f32),
        'norm2_b': params['norm2_b'].reshape(C_out, 1).astype(f32),
        'w2': w2.astype(matmul_dtype),
        'b2': b2,
    }


# ---------------------------------------------------------------------------
# Wrapper: one pallas_call for the whole block
# ---------------------------------------------------------------------------

def resnet_block_1d(x, packed, *, groups=32, eps=1e-5, skip_scale=1.0,
                    resample='default', batch_tile=8):
    """x: (B, C_in, L) f32, packed = pack_resnet_block_params(...).  Returns (B, C_out, L)."""
    if resample != 'default':
        # TODO(synk): 'up'/'down' resample paths not implemented in the fused kernel.
        raise NotImplementedError("only resample='default' is implemented")

    B, C_in, L = x.shape
    C_out, k1 = packed['w1'].shape
    assert k1 == 3 * C_in, (k1, C_in)
    assert C_in % groups == 0 and C_out % groups == 0
    has_shortcut = packed['w2'].shape[1] > 3 * C_out
    mm_dtype = packed['w1'].dtype

    # batch tile: largest divisor of B that is <= batch_tile (amortizes MXU weight pushes
    # and the per-grid-step overhead across N = bt*L lanes).
    bt = 1
    for d in range(1, min(B, batch_tile) + 1):
        if B % d == 0:
            bt = d

    k2 = 3 * C_out + (C_in if has_shortcut else 0)

    inputs = [x, packed['norm1_g'], packed['norm1_b'], packed['w1'], packed['b1'],
              packed['norm2_g'], packed['norm2_b'], packed['w2'], packed['b2']]

    def _const_spec(a):
        return pl.BlockSpec(a.shape, lambda i, nd=a.ndim: (0,) * nd)

    in_specs = [pl.BlockSpec((bt, C_in, L), lambda i: (i, 0, 0))]
    in_specs += [_const_spec(a) for a in inputs[1:]]

    kernel = partial(_resnet_block_kernel, groups=groups, eps=eps,
                     skip_scale=skip_scale, has_shortcut=has_shortcut, bt=bt)

    return pl.pallas_call(
        kernel,
        out_shape=jax.ShapeDtypeStruct((B, C_out, L), x.dtype),
        grid=(B // bt,),
        in_specs=in_specs,
        out_specs=pl.BlockSpec((bt, C_out, L), lambda i: (i, 0, 0)),
        scratch_shapes=[pltpu.VMEM((3 * C_in, bt * L), mm_dtype),   # conv1 taps
                        pltpu.VMEM((k2, bt * L), mm_dtype)],        # conv2 taps (+ shortcut x)
        compiler_params=pltpu.CompilerParams(dimension_semantics=("parallel",)),
    )(*inputs)


# ---------------------------------------------------------------------------
# Pure-JAX reference (PyTorch semantics) for correctness check
# ---------------------------------------------------------------------------

def resnet_block_1d_reference(x, params, *, groups=32, eps=1e-5, skip_scale=1.0):
    HI = jax.lax.Precision.HIGHEST

    def gn(h, gamma, beta):
        B, C, L = h.shape
        hg = h.reshape(B, groups, C // groups, L)
        m = jnp.mean(hg, axis=(2, 3), keepdims=True)
        v = jnp.mean((hg - m) ** 2, axis=(2, 3), keepdims=True)
        hn = ((hg - m) / jnp.sqrt(v + eps)).reshape(B, C, L)
        return hn * gamma[None, :, None] + beta[None, :, None]

    def silu(h):
        return h * jax.nn.sigmoid(h)

    def conv1d_k3(h, w, b):                       # w: (Cout, Cin, 3), padding=1
        B, C, L = h.shape
        hp = jnp.pad(h, ((0, 0), (0, 0), (1, 1)))
        taps = jnp.stack([hp[:, :, k:k + L] for k in range(3)], axis=-1)   # (B,Cin,L,3)
        return jnp.einsum('bclk,ock->bol', taps, w, precision=HI) + b[None, :, None]

    h = silu(gn(x, params['norm1_g'], params['norm1_b']))
    h = conv1d_k3(h, params['conv1_w'], params['conv1_b'])
    h = silu(gn(h, params['norm2_g'], params['norm2_b']))
    h = conv1d_k3(h, params['conv2_w'], params['conv2_b'])
    if 'short_w' in params:
        res = jnp.einsum('oc,bcl->bol', params['short_w'][:, :, 0], x,
                         precision=HI) + params['short_b'][None, :, None]
    else:
        res = x
    return (h + res) * skip_scale


# ---------------------------------------------------------------------------
if __name__ == "__main__":
    B, C_IN, C_OUT, L = 4, 32, 64, 256
    GROUPS, EPS, SKIP = 32, 1e-5, 1.0            # module defaults

    keys = iter(jax.random.split(jax.random.PRNGKey(0), 12))
    f32 = jnp.float32
    params = {
        'norm1_g': 1.0 + 0.1 * jax.random.normal(next(keys), (C_IN,), f32),
        'norm1_b': 0.1 * jax.random.normal(next(keys), (C_IN,), f32),
        'conv1_w': jax.random.normal(next(keys), (C_OUT, C_IN, 3), f32) / math.sqrt(3 * C_IN),
        'conv1_b': 0.05 * jax.random.normal(next(keys), (C_OUT,), f32),
        'norm2_g': 1.0 + 0.1 * jax.random.normal(next(keys), (C_OUT,), f32),
        'norm2_b': 0.1 * jax.random.normal(next(keys), (C_OUT,), f32),
        'conv2_w': jax.random.normal(next(keys), (C_OUT, C_OUT, 3), f32) / math.sqrt(3 * C_OUT),
        'conv2_b': 0.05 * jax.random.normal(next(keys), (C_OUT,), f32),
        'short_w': jax.random.normal(next(keys), (C_OUT, C_IN, 1), f32) / math.sqrt(C_IN),
        'short_b': 0.05 * jax.random.normal(next(keys), (C_OUT,), f32),
    }
    x = jax.random.normal(next(keys), (B, C_IN, L), f32)

    ref = resnet_block_1d_reference(x, params, groups=GROUPS, eps=EPS, skip_scale=SKIP)

    fwd = partial(resnet_block_1d, groups=GROUPS, eps=EPS, skip_scale=SKIP, batch_tile=2)

    # strict-parity path: f32 matmul operands
    packed_f32 = pack_resnet_block_params(params, matmul_dtype=jnp.float32)
    out_f32 = jax.jit(fwd)(x, packed_f32)
    jax.block_until_ready(out_f32)

    # production path: bf16 matmul operands, f32 accumulation / GN / SiLU / epilogue
    packed_bf16 = pack_resnet_block_params(params, matmul_dtype=jnp.bfloat16)
    out_bf16 = jax.jit(fwd)(x, packed_bf16)
    jax.block_until_ready(out_bf16)

    assert out_f32.shape == (B, C_OUT, L), out_f32.shape
    assert bool(jnp.all(jnp.isfinite(out_f32))) and bool(jnp.all(jnp.isfinite(out_bf16)))
    assert bool(jnp.allclose(out_f32, ref, atol=2e-3, rtol=2e-3)), \
        float(jnp.max(jnp.abs(out_f32 - ref)))
    # bf16 matmul operands -> looser tolerance (f32 accumulation, ~0.5-1% worst case)
    assert bool(jnp.allclose(out_bf16, ref, atol=3e-2, rtol=3e-2)), \
        float(jnp.max(jnp.abs(out_bf16 - ref)))
    print("KERNEL_OK")
</pallas_src>

<mosaic_0001>
module attributes {stable_mosaic.version = 11 : i64} {
  func.func @_resnet_block_kernel(%arg0: i32, %arg1: memref<2x32x256xf32, #tpu.memory_space<vmem>>, %arg2: memref<32x1xf32, #tpu.memory_space<vmem>>, %arg3: memref<32x1xf32, #tpu.memory_space<vmem>>, %arg4: memref<64x96xf32, #tpu.memory_space<vmem>>, %arg5: memref<64x1xf32, #tpu.memory_space<vmem>>, %arg6: memref<64x1xf32, #tpu.memory_space<vmem>>, %arg7: memref<64x1xf32, #tpu.memory_space<vmem>>, %arg8: memref<64x224xf32, #tpu.memory_space<vmem>>, %arg9: memref<64x1xf32, #tpu.memory_space<vmem>>, %arg10: memref<2x64x256xf32, #tpu.memory_space<vmem>>, %arg11: memref<96x512xf32, #tpu.memory_space<vmem>>, %arg12: memref<224x512xf32, #tpu.memory_space<vmem>>) attributes {dimension_semantics = [#tpu.dimension_semantics<parallel>], iteration_bounds = array<i64: 2>, scalar_prefetch = 0 : i64, scratch_operands = 2 : i64, tpu.core_type = #tpu.core_type<tc>, window_params = [{transform_indices = @transform_0, window_bounds = array<i64: 2, 32, 256>}, {pipeline_mode = #tpu.pipeline_mode<synchronous>, transform_indices = @transform_1, window_bounds = array<i64: 32, 1>}, {pipeline_mode = #tpu.pipeline_mode<synchronous>, transform_indices = @transform_2, window_bounds = array<i64: 32, 1>}, {pipeline_mode = #tpu.pipeline_mode<synchronous>, transform_indices = @transform_3, window_bounds = array<i64: 64, 96>}, {pipeline_mode = #tpu.pipeline_mode<synchronous>, transform_indices = @transform_4, window_bounds = array<i64: 64, 1>}, {pipeline_mode = #tpu.pipeline_mode<synchronous>, transform_indices = @transform_5, window_bounds = array<i64: 64, 1>}, {pipeline_mode = #tpu.pipeline_mode<synchronous>, transform_indices = @transform_6, window_bounds = array<i64: 64, 1>}, {pipeline_mode = #tpu.pipeline_mode<synchronous>, transform_indices = @transform_7, window_bounds = array<i64: 64, 224>}, {pipeline_mode = #tpu.pipeline_mode<synchronous>, transform_indices = @transform_8, window_bounds = array<i64: 64, 1>}, {transform_indices = @transform_9, window_bounds = array<i64: 2, 64, 256>}]} {
    %0 = tpu.iota {dimensions = array<i32: 1>} : vector<1x256xi32>
    %c0_i32 = arith.constant 0 : i32
    %1 = vector.broadcast %c0_i32 : i32 to vector<1x256xi32>
    %2 = arith.cmpi sgt, %0, %1 : vector<1x256xi32>
    %3 = arith.extui %2 : vector<1x256xi1> to vector<1x256xi32>
    %4 = arith.sitofp %3 : vector<1x256xi32> to vector<1x256xf32>
    %c255_i32 = arith.constant 255 : i32
    %5 = vector.broadcast %c255_i32 : i32 to vector<1x256xi32>
    %6 = arith.cmpi slt, %0, %5 : vector<1x256xi32>
    %7 = arith.extui %6 : vector<1x256xi1> to vector<1x256xi32>
    %8 = arith.sitofp %7 : vector<1x256xi32> to vector<1x256xf32>
    %c0 = arith.constant 0 : index
    %c0_0 = arith.constant 0 : index
    %9 = vector.load %arg2[%c0, %c0_0] : memref<32x1xf32, #tpu.memory_space<vmem>>, vector<32x1xf32>
    %c0_1 = arith.constant 0 : index
    %c0_2 = arith.constant 0 : index
    %10 = vector.load %arg3[%c0_1, %c0_2] : memref<32x1xf32, #tpu.memory_space<vmem>>, vector<32x1xf32>
    %c0_3 = arith.constant 0 : index
    %c0_4 = arith.constant 0 : index
    %11 = vector.load %arg6[%c0_3, %c0_4] : memref<64x1xf32, #tpu.memory_space<vmem>>, vector<64x1xf32>
    %c0_5 = arith.constant 0 : index
    %c0_6 = arith.constant 0 : index
    %12 = vector.load %arg7[%c0_5, %c0_6] : memref<64x1xf32, #tpu.memory_space<vmem>>, vector<64x1xf32>
    %c0_7 = arith.constant 0 : index
    %c0_8 = arith.constant 0 : index
    %c0_9 = arith.constant 0 : index
    %13 = vector.load %arg1[%c0_7, %c0_8, %c0_9] : memref<2x32x256xf32, #tpu.memory_space<vmem>>, vector<1x32x256xf32>
    %14 = vector.shape_cast %13 : vector<1x32x256xf32> to vector<32x256xf32>
    %cst = arith.constant dense<0.000000e+00> : vector<32xf32>
    %15 = vector.multi_reduction <add>, %14, %cst [1] : vector<32x256xf32> to vector<32xf32>
    %16 = vector.shape_cast %15 : vector<32xf32> to vector<32x1xf32>
    %cst_10 = arith.constant 3.906250e-03 : f32
    %17 = vector.broadcast %cst_10 : f32 to vector<32x1xf32>
    %18 = arith.mulf %16, %17 : vector<32x1xf32>
    %19 = vector.broadcast %18 : vector<32x1xf32> to vector<32x256xf32>
    %20 = arith.subf %14, %19 : vector<32x256xf32>
    %21 = arith.mulf %20, %20 : vector<32x256xf32>
    %cst_11 = arith.constant dense<0.000000e+00> : vector<32xf32>
    %22 = vector.multi_reduction <add>, %21, %cst_11 [1] : vector<32x256xf32> to vector<32xf32>
    %23 = vector.shape_cast %22 : vector<32xf32> to vector<32x1xf32>
    %cst_12 = arith.constant 3.906250e-03 : f32
    %24 = vector.broadcast %cst_12 : f32 to vector<32x1xf32>
    %25 = arith.mulf %23, %24 : vector<32x1xf32>
    %cst_13 = arith.constant 9.99999974E-6 : f32
    %26 = vector.broadcast %cst_13 : f32 to vector<32x1xf32>
    %27 = arith.addf %25, %26 : vector<32x1xf32>
    %28 = math.rsqrt %27 : vector<32x1xf32>
    %29 = arith.mulf %28, %9 : vector<32x1xf32>
    %30 = vector.broadcast %29 : vector<32x1xf32> to vector<32x256xf32>
    %31 = arith.mulf %20, %30 : vector<32x256xf32>
    %32 = vector.broadcast %10 : vector<32x1xf32> to vector<32x256xf32>
    %33 = arith.addf %31, %32 : vector<32x256xf32>
    %34 = arith.negf %33 : vector<32x256xf32>
    %35 = math.exp %34 : vector<32x256xf32>
    %cst_14 = arith.constant 1.000000e+00 : f32
    %36 = vector.broadcast %cst_14 : f32 to vector<32x256xf32>
    %37 = arith.addf %36, %35 : vector<32x256xf32>
    %38 = arith.divf %36, %37 : vector<32x256xf32>
    %39 = arith.mulf %33, %38 : vector<32x256xf32>
    %c1_i32 = arith.constant 1 : i32
    %40 = tpu.dynamic_rotate %39 by %c1_i32 dim 1 : vector<32x256xf32>, i32 -> vector<32x256xf32>
    %41 = vector.broadcast %4 : vector<1x256xf32> to vector<32x256xf32>
    %42 = arith.mulf %40, %41 : vector<32x256xf32>
    %c255_i32_15 = arith.constant 255 : i32
    %43 = tpu.dynamic_rotate %39 by %c255_i32_15 dim 1 : vector<32x256xf32>, i32 -> vector<32x256xf32>
    %44 = vector.broadcast %8 : vector<1x256xf32> to vector<32x256xf32>
    %45 = arith.mulf %43, %44 : vector<32x256xf32>
    %c0_16 = arith.constant 0 : index
    %c0_17 = arith.constant 0 : index
    %46 = vector.load %arg11[%c0_16, %c0_17] : memref<96x512xf32, #tpu.memory_space<vmem>>, vector<32x256xf32>
    tpu.vector_store %arg11[%c0_16, %c0_17], %42 {strides = array<i32>} : memref<96x512xf32, #tpu.memory_space<vmem>>, vector<32x256xf32>,
    %c32 = arith.constant 32 : index
    %c0_18 = arith.constant 0 : index
    %47 = vector.load %arg11[%c32, %c0_18] : memref<96x512xf32, #tpu.memory_space<vmem>>, vector<32x256xf32>
    tpu.vector_store %arg11[%c32, %c0_18], %39 {strides = array<i32>} : memref<96x512xf32, #tpu.memory_space<vmem>>, vector<32x256xf32>,
    %c64 = arith.constant 64 : index
    %c0_19 = arith.constant 0 : index
    %48 = vector.load %arg11[%c64, %c0_19] : memref<96x512xf32, #tpu.memory_space<vmem>>, vector<32x256xf32>
    tpu.vector_store %arg11[%c64, %c0_19], %45 {strides = array<i32>} : memref<96x512xf32, #tpu.memory_space<vmem>>, vector<32x256xf32>,
    %c192 = arith.constant 192 : index
    %c0_20 = arith.constant 0 : index
    %49 = vector.load %arg12[%c192, %c0_20] : memref<224x512xf32, #tpu.memory_space<vmem>>, vector<32x256xf32>
    tpu.vector_store %arg12[%c192, %c0_20], %14 {strides = array<i32>} : memref<224x512xf32, #tpu.memory_space<vmem>>, vector<32x256xf32>,
    %c1 = arith.constant 1 : index
    %c0_21 = arith.constant 0 : index
    %c0_22 = arith.constant 0 : index
    %50 = vector.load %arg1[%c1, %c0_21, %c0_22] : memref<2x32x256xf32, #tpu.memory_space<vmem>>, vector<1x32x256xf32>
    %51 = vector.shape_cast %50 : vector<1x32x256xf32> to vector<32x256xf32>
    %cst_23 = arith.constant dense<0.000000e+00> : vector<32xf32>
    %52 = vector.multi_reduction <add>, %51, %cst_23 [1] : vector<32x256xf32> to vector<32xf32>
    %53 = vector.shape_cast %52 : vector<32xf32> to vector<32x1xf32>
    %cst_24 = arith.constant 3.906250e-03 : f32
    %54 = vector.broadcast %cst_24 : f32 to vector<32x1xf32>
    %55 = arith.mulf %53, %54 : vector<32x1xf32>
    %56 = vector.broadcast %55 : vector<32x1xf32> to vector<32x256xf32>
    %57 = arith.subf %51, %56 : vector<32x256xf32>
    %58 = arith.mulf %57, %57 : vector<32x256xf32>
    %cst_25 = arith.constant dense<0.000000e+00> : vector<32xf32>
    %59 = vector.multi_reduction <add>, %58, %cst_25 [1] : vector<32x256xf32> to vector<32xf32>
    %60 = vector.shape_cast %59 : vector<32xf32> to vector<32x1xf32>
    %cst_26 = arith.constant 3.906250e-03 : f32
    %61 = vector.broadcast %cst_26 : f32 to vector<32x1xf32>
    %62 = arith.mulf %60, %61 : vector<32x1xf32>
    %cst_27 = arith.constant 9.99999974E-6 : f32
    %63 = vector.broadcast %cst_27 : f32 to vector<32x1xf32>
    %64 = arith.addf %62, %63 : vector<32x1xf32>
    %65 = math.rsqrt %64 : vector<32x1xf32>
    %66 = arith.mulf %65, %9 : vector<32x1xf32>
    %67 = vector.broadcast %66 : vector<32x1xf32> to vector<32x256xf32>
    %68 = arith.mulf %57, %67 : vector<32x256xf32>
    %69 = vector.broadcast %10 : vector<32x1xf32> to vector<32x256xf32>
    %70 = arith.addf %68, %69 : vector<32x256xf32>
    %71 = arith.negf %70 : vector<32x256xf32>
    %72 = math.exp %71 : vector<32x256xf32>
    %cst_28 = arith.constant 1.000000e+00 : f32
    %73 = vector.broadcast %cst_28 : f32 to vector<32x256xf32>
    %74 = arith.addf %73, %72 : vector<32x256xf32>
    %75 = arith.divf %73, %74 : vector<32x256xf32>
    %76 = arith.mulf %70, %75 : vector<32x256xf32>
    %c1_i32_29 = arith.constant 1 : i32
    %77 = tpu.dynamic_rotate %76 by %c1_i32_29 dim 1 : vector<32x256xf32>, i32 -> vector<32x256xf32>
    %78 = vector.broadcast %4 : vector<1x256xf32> to vector<32x256xf32>
    %79 = arith.mulf %77, %78 : vector<32x256xf32>
    %c255_i32_30 = arith.constant 255 : i32
    %80 = tpu.dynamic_rotate %76 by %c255_i32_30 dim 1 : vector<32x256xf32>, i32 -> vector<32x256xf32>
    %81 = vector.broadcast %8 : vector<1x256xf32> to vector<32x256xf32>
    %82 = arith.mulf %80, %81 : vector<32x256xf32>
    %c0_31 = arith.constant 0 : index
    %c256 = arith.constant 256 : index
    %83 = vector.load %arg11[%c0_31, %c256] : memref<96x512xf32, #tpu.memory_space<vmem>>, vector<32x256xf32>
    tpu.vector_store %arg11[%c0_31, %c256], %79 {strides = array<i32>} : memref<96x512xf32, #tpu.memory_space<vmem>>, vector<32x256xf32>,
    %c32_32 = arith.constant 32 : index
    %c256_33 = arith.constant 256 : index
    %84 = vector.load %arg11[%c32_32, %c256_33] : memref<96x512xf32, #tpu.memory_space<vmem>>, vector<32x256xf32>
    tpu.vector_store %arg11[%c32_32, %c256_33], %76 {strides = array<i32>} : memref<96x512xf32, #tpu.memory_space<vmem>>, vector<32x256xf32>,
    %c64_34 = arith.constant 64 : index
    %c256_35 = arith.constant 256 : index
    %85 = vector.load %arg11[%c64_34, %c256_35] : memref<96x512xf32, #tpu.memory_space<vmem>>, vector<32x256xf32>
    tpu.vector_store %arg11[%c64_34, %c256_35], %82 {strides = array<i32>} : memref<96x512xf32, #tpu.memory_space<vmem>>, vector<32x256xf32>,
    %c192_36 = arith.constant 192 : index
    %c256_37 = arith.constant 256 : index
    %86 = vector.load %arg12[%c192_36, %c256_37] : memref<224x512xf32, #tpu.memory_space<vmem>>, vector<32x256xf32>
    tpu.vector_store %arg12[%c192_36, %c256_37], %51 {strides = array<i32>} : memref<224x512xf32, #tpu.memory_space<vmem>>, vector<32x256xf32>,
    %c0_38 = arith.constant 0 : index
    %c0_39 = arith.constant 0 : index
    %87 = vector.load %arg4[%c0_38, %c0_39] : memref<64x96xf32, #tpu.memory_space<vmem>>, vector<64x96xf32>
    %c0_40 = arith.constant 0 : index
    %c0_41 = arith.constant 0 : index
    %88 = vector.load %arg11[%c0_40, %c0_41] : memref<96x512xf32, #tpu.memory_space<vmem>>, vector<96x512xf32>
    %cst_42 = arith.constant dense<0.000000e+00> : vector<64x512xf32>
    %89 = tpu.matmul %87, %88, %cst_42 {dimension_numbers = #tpu.dot_dimension_numbers<[1], [0], [0], [1], [0, 0, 1, 1], [], []>} : vector<64x96xf32>, vector<96x512xf32>, vector<64x512xf32> -> vector<64x512xf32>
    %c0_43 = arith.constant 0 : index
    %c0_44 = arith.constant 0 : index
    %90 = vector.load %arg5[%c0_43, %c0_44] : memref<64x1xf32, #tpu.memory_space<vmem>>, vector<64x1xf32>
    %91 = vector.broadcast %90 : vector<64x1xf32> to vector<64x512xf32>
    %92 = arith.addf %89, %91 : vector<64x512xf32>
    %93 = vector.extract_strided_slice %92 {offsets = [0, 0], sizes = [64, 256], strides = [1, 1]} : vector<64x512xf32> to vector<64x256xf32>
    %cst_45 = arith.constant dense<0.000000e+00> : vector<64xf32>
    %94 = vector.multi_reduction <add>, %93, %cst_45 [1] : vector<64x256xf32> to vector<64xf32>
    %95 = vector.shape_cast %94 : vector<64xf32> to vector<64x1xf32>
    %96 = tpu.iota {dimensions = array<i32: 0>} : vector<64x1xi32>
    %c1_i32_46 = arith.constant 1 : i32
    %97 = tpu.dynamic_rotate %95 by %c1_i32_46 dim 0 : vector<64x1xf32>, i32 -> vector<64x1xf32>
    %c63_i32 = arith.constant 63 : i32
    %98 = tpu.dynamic_rotate %95 by %c63_i32 dim 0 : vector<64x1xf32>, i32 -> vector<64x1xf32>
    %c2_i32 = arith.constant 2 : i32
    %c0_i32_47 = arith.constant 0 : i32
    %99 = arith.cmpi eq, %c2_i32, %c0_i32_47 : i32
    %c1_i32_48 = arith.constant 1 : i32
    %100 = arith.select %99, %c1_i32_48, %c2_i32 : i32
    %101 = vector.broadcast %100 : i32 to vector<64x1xi32>
    %102 = arith.remsi %96, %101 : vector<64x1xi32>
    %c0_i32_49 = arith.constant 0 : i32
    %103 = vector.broadcast %c0_i32_49 : i32 to vector<64x1xi32>
    %104 = arith.cmpi ne, %102, %103 : vector<64x1xi32>
    %c0_i32_50 = arith.constant 0 : i32
    %105 = vector.broadcast %c0_i32_50 : i32 to vector<64x1xi32>
    %106 = arith.cmpi slt, %102, %105 : vector<64x1xi32>
    %c0_i32_51 = arith.constant 0 : i32
    %107 = arith.cmpi slt, %100, %c0_i32_51 : i32
    %108 = vector.broadcast %107 : i1 to vector<64x1xi1>
    %109 = vector.broadcast %108 : vector<64x1xi1> to vector<64x1xi1>
    %110 = arith.xori %106, %109 : vector<64x1xi1>
    %111 = arith.andi %110, %104 : vector<64x1xi1>
    %112 = vector.broadcast %100 : i32 to vector<64x1xi32>
    %113 = arith.addi %102, %112 : vector<64x1xi32>
    %114 = arith.select %111, %113, %102 : vector<64x1xi1>, vector<64x1xi32>
    %c0_i32_52 = arith.constant 0 : i32
    %115 = vector.broadcast %c0_i32_52 : i32 to vector<64x1xi32>
    %116 = arith.cmpi eq, %114, %115 : vector<64x1xi32>
    %117 = arith.select %116, %98, %97 : vector<64x1xi1>, vector<64x1xf32>
    %118 = arith.addf %95, %117 : vector<64x1xf32>
    %cst_53 = arith.constant 0.001953125 : f32
    %119 = vector.broadcast %cst_53 : f32 to vector<64x1xf32>
    %120 = arith.mulf %118, %119 : vector<64x1xf32>
    %121 = vector.broadcast %120 : vector<64x1xf32> to vector<64x256xf32>
    %122 = arith.subf %93, %121 : vector<64x256xf32>
    %123 = arith.mulf %122, %122 : vector<64x256xf32>
    %cst_54 = arith.constant dense<0.000000e+00> : vector<64xf32>
    %124 = vector.multi_reduction <add>, %123, %cst_54 [1] : vector<64x256xf32> to vector<64xf32>
    %125 = vector.shape_cast %124 : vector<64xf32> to vector<64x1xf32>
    %126 = tpu.iota {dimensions = array<i32: 0>} : vector<64x1xi32>
    %c1_i32_55 = arith.constant 1 : i32
    %127 = tpu.dynamic_rotate %125 by %c1_i32_55 dim 0 : vector<64x1xf32>, i32 -> vector<64x1xf32>
    %c63_i32_56 = arith.constant 63 : i32
    %128 = tpu.dynamic_rotate %125 by %c63_i32_56 dim 0 : vector<64x1xf32>, i32 -> vector<64x1xf32>
    %c2_i32_57 = arith.constant 2 : i32
    %c0_i32_58 = arith.constant 0 : i32
    %129 = arith.cmpi eq, %c2_i32_57, %c0_i32_58 : i32
    %c1_i32_59 = arith.constant 1 : i32
    %130 = arith.select %129, %c1_i32_59, %c2_i32_57 : i32
    %131 = vector.broadcast %130 : i32 to vector<64x1xi32>
    %132 = arith.remsi %126, %131 : vector<64x1xi32>
    %c0_i32_60 = arith.constant 0 : i32
    %133 = vector.broadcast %c0_i32_60 : i32 to vector<64x1xi32>
    %134 = arith.cmpi ne, %132, %133 : vector<64x1xi32>
    %c0_i32_61 = arith.constant 0 : i32
    %135 = vector.broadcast %c0_i32_61 : i32 to vector<64x1xi32>
    %136 = arith.cmpi slt, %132, %135 : vector<64x1xi32>
    %c0_i32_62 = arith.constant 0 : i32
    %137 = arith.cmpi slt, %130, %c0_i32_62 : i32
    %138 = vector.broadcast %137 : i1 to vector<64x1xi1>
    %139 = vector.broadcast %138 : vector<64x1xi1> to vector<64x1xi1>
    %140 = arith.xori %136, %139 : vector<64x1xi1>
    %141 = arith.andi %140, %134 : vector<64x1xi1>
    %142 = vector.broadcast %130 : i32 to vector<64x1xi32>
    %143 = arith.addi %132, %142 : vector<64x1xi32>
    %144 = arith.select %141, %143, %132 : vector<64x1xi1>, vector<64x1xi32>
    %c0_i32_63 = arith.constant 0 : i32
    %145 = vector.broadcast %c0_i32_63 : i32 to vector<64x1xi32>
    %146 = arith.cmpi eq, %144, %145 : vector<64x1xi32>
    %147 = arith.select %146, %128, %127 : vector<64x1xi1>, vector<64x1xf32>
    %148 = arith.addf %125, %147 : vector<64x1xf32>
    %cst_64 = arith.constant 0.001953125 : f32
    %149 = vector.broadcast %cst_64 : f32 to vector<64x1xf32>
    %150 = arith.mulf %148, %149 : vector<64x1xf32>
    %cst_65 = arith.constant 9.99999974E-6 : f32
    %151 = vector.broadcast %cst_65 : f32 to vector<64x1xf32>
    %152 = arith.addf %150, %151 : vector<64x1xf32>
    %153 = math.rsqrt %152 : vector<64x1xf32>
    %154 = arith.mulf %153, %11 : vector<64x1xf32>
    %155 = vector.broadcast %154 : vector<64x1xf32> to vector<64x256xf32>
    %156 = arith.mulf %122, %155 : vector<64x256xf32>
    %157 = vector.broadcast %12 : vector<64x1xf32> to vector<64x256xf32>
    %158 = arith.addf %156, %157 : vector<64x256xf32>
    %159 = arith.negf %158 : vector<64x256xf32>
    %160 = math.exp %159 : vector<64x256xf32>
    %cst_66 = arith.constant 1.000000e+00 : f32
    %161 = vector.broadcast %cst_66 : f32 to vector<64x256xf32>
    %162 = arith.addf %161, %160 : vector<64x256xf32>
    %163 = arith.divf %161, %162 : vector<64x256xf32>
    %164 = arith.mulf %158, %163 : vector<64x256xf32>
    %c1_i32_67 = arith.constant 1 : i32
    %165 = tpu.dynamic_rotate %164 by %c1_i32_67 dim 1 : vector<64x256xf32>, i32 -> vector<64x256xf32>
    %166 = vector.broadcast %4 : vector<1x256xf32> to vector<64x256xf32>
    %167 = arith.mulf %165, %166 : vector<64x256xf32>
    %c255_i32_68 = arith.constant 255 : i32
    %168 = tpu.dynamic_rotate %164 by %c255_i32_68 dim 1 : vector<64x256xf32>, i32 -> vector<64x256xf32>
    %169 = vector.broadcast %8 : vector<1x256xf32> to vector<64x256xf32>
    %170 = arith.mulf %168, %169 : vector<64x256xf32>
    %c0_69 = arith.constant 0 : index
    %c0_70 = arith.constant 0 : index
    %171 = vector.load %arg12[%c0_69, %c0_70] : memref<224x512xf32, #tpu.memory_space<vmem>>, vector<64x256xf32>
    tpu.vector_store %arg12[%c0_69, %c0_70], %167 {strides = array<i32>} : memref<224x512xf32, #tpu.memory_space<vmem>>, vector<64x256xf32>,
    %c64_71 = arith.constant 64 : index
    %c0_72 = arith.constant 0 : index
    %172 = vector.load %arg12[%c64_71, %c0_72] : memref<224x512xf32, #tpu.memory_space<vmem>>, vector<64x256xf32>
    tpu.vector_store %arg12[%c64_71, %c0_72], %164 {strides = array<i32>} : memref<224x512xf32, #tpu.memory_space<vmem>>, vector<64x256xf32>,
    %c128 = arith.constant 128 : index
    %c0_73 = arith.constant 0 : index
    %173 = vector.load %arg12[%c128, %c0_73] : memref<224x512xf32, #tpu.memory_space<vmem>>, vector<64x256xf32>
    tpu.vector_store %arg12[%c128, %c0_73], %170 {strides = array<i32>} : memref<224x512xf32, #tpu.memory_space<vmem>>, vector<64x256xf32>,
    %174 = vector.extract_strided_slice %92 {offsets = [0, 256], sizes = [64, 256], strides = [1, 1]} : vector<64x512xf32> to vector<64x256xf32>
    %cst_74 = arith.constant dense<0.000000e+00> : vector<64xf32>
    %175 = vector.multi_reduction <add>, %174, %cst_74 [1] : vector<64x256xf32> to vector<64xf32>
    %176 = vector.shape_cast %175 : vector<64xf32> to vector<64x1xf32>
    %177 = tpu.iota {dimensions = array<i32: 0>} : vector<64x1xi32>
    %c1_i32_75 = arith.constant 1 : i32
    %178 = tpu.dynamic_rotate %176 by %c1_i32_75 dim 0 : vector<64x1xf32>, i32 -> vector<64x1xf32>
    %c63_i32_76 = arith.constant 63 : i32
    %179 = tpu.dynamic_rotate %176 by %c63_i32_76 dim 0 : vector<64x1xf32>, i32 -> vector<64x1xf32>
    %c2_i32_77 = arith.constant 2 : i32
    %c0_i32_78 = arith.constant 0 : i32
    %180 = arith.cmpi eq, %c2_i32_77, %c0_i32_78 : i32
    %c1_i32_79 = arith.constant 1 : i32
    %181 = arith.select %180, %c1_i32_79, %c2_i32_77 : i32
    %182 = vector.broadcast %181 : i32 to vector<64x1xi32>
    %183 = arith.remsi %177, %182 : vector<64x1xi32>
    %c0_i32_80 = arith.constant 0 : i32
    %184 = vector.broadcast %c0_i32_80 : i32 to vector<64x1xi32>
    %185 = arith.cmpi ne, %183, %184 : vector<64x1xi32>
    %c0_i32_81 = arith.constant 0 : i32
    %186 = vector.broadcast %c0_i32_81 : i32 to vector<64x1xi32>
    %187 = arith.cmpi slt, %183, %186 : vector<64x1xi32>
    %c0_i32_82 = arith.constant 0 : i32
    %188 = arith.cmpi slt, %181, %c0_i32_82 : i32
    %189 = vector.broadcast %188 : i1 to vector<64x1xi1>
    %190 = vector.broadcast %189 : vector<64x1xi1> to vector<64x1xi1>
    %191 = arith.xori %187, %190 : vector<64x1xi1>
    %192 = arith.andi %191, %185 : vector<64x1xi1>
    %193 = vector.broadcast %181 : i32 to vector<64x1xi32>
    %194 = arith.addi %183, %193 : vector<64x1xi32>
    %195 = arith.select %192, %194, %183 : vector<64x1xi1>, vector<64x1xi32>
    %c0_i32_83 = arith.constant 0 : i32
    %196 = vector.broadcast %c0_i32_83 : i32 to vector<64x1xi32>
    %197 = arith.cmpi eq, %195, %196 : vector<64x1xi32>
    %198 = arith.select %197, %179, %178 : vector<64x1xi1>, vector<64x1xf32>
    %199 = arith.addf %176, %198 : vector<64x1xf32>
    %cst_84 = arith.constant 0.001953125 : f32
    %200 = vector.broadcast %cst_84 : f32 to vector<64x1xf32>
    %201 = arith.mulf %199, %200 : vector<64x1xf32>
    %202 = vector.broadcast %201 : vector<64x1xf32> to vector<64x256xf32>
    %203 = arith.subf %174, %202 : vector<64x256xf32>
    %204 = arith.mulf %203, %203 : vector<64x256xf32>
    %cst_85 = arith.constant dense<0.000000e+00> : vector<64xf32>
    %205 = vector.multi_reduction <add>, %204, %cst_85 [1] : vector<64x256xf32> to vector<64xf32>
    %206 = vector.shape_cast %205 : vector<64xf32> to vector<64x1xf32>
    %207 = tpu.iota {dimensions = array<i32: 0>} : vector<64x1xi32>
    %c1_i32_86 = arith.constant 1 : i32
    %208 = tpu.dynamic_rotate %206 by %c1_i32_86 dim 0 : vector<64x1xf32>, i32 -> vector<64x1xf32>
    %c63_i32_87 = arith.constant 63 : i32
    %209 = tpu.dynamic_rotate %206 by %c63_i32_87 dim 0 : vector<64x1xf32>, i32 -> vector<64x1xf32>
    %c2_i32_88 = arith.constant 2 : i32
    %c0_i32_89 = arith.constant 0 : i32
    %210 = arith.cmpi eq, %c2_i32_88, %c0_i32_89 : i32
    %c1_i32_90 = arith.constant 1 : i32
    %211 = arith.select %210, %c1_i32_90, %c2_i32_88 : i32
    %212 = vector.broadcast %211 : i32 to vector<64x1xi32>
    %213 = arith.remsi %207, %212 : vector<64x1xi32>
    %c0_i32_91 = arith.constant 0 : i32
    %214 = vector.broadcast %c0_i32_91 : i32 to vector<64x1xi32>
    %215 = arith.cmpi ne, %213, %214 : vector<64x1xi32>
    %c0_i32_92 = arith.constant 0 : i32
    %216 = vector.broadcast %c0_i32_92 : i32 to vector<64x1xi32>
    %217 = arith.cmpi slt, %213, %216 : vector<64x1xi32>
    %c0_i32_93 = arith.constant 0 : i32
    %218 = arith.cmpi slt, %211, %c0_i32_93 : i32
    %219 = vector.broadcast %218 : i1 to vector<64x1xi1>
    %220 = vector.broadcast %219 : vector<64x1xi1> to vector<64x1xi1>
    %221 = arith.xori %217, %220 : vector<64x1xi1>
    %222 = arith.andi %221, %215 : vector<64x1xi1>
    %223 = vector.broadcast %211 : i32 to vector<64x1xi32>
    %224 = arith.addi %213, %223 : vector<64x1xi32>
    %225 = arith.select %222, %224, %213 : vector<64x1xi1>, vector<64x1xi32>
    %c0_i32_94 = arith.constant 0 : i32
    %226 = vector.broadcast %c0_i32_94 : i32 to vector<64x1xi32>
    %227 = arith.cmpi eq, %225, %226 : vector<64x1xi32>
    %228 = arith.select %227, %209, %208 : vector<64x1xi1>, vector<64x1xf32>
    %229 = arith.addf %206, %228 : vector<64x1xf32>
    %cst_95 = arith.constant 0.001953125 : f32
    %230 = vector.broadcast %cst_95 : f32 to vector<64x1xf32>
    %231 = arith.mulf %229, %230 : vector<64x1xf32>
    %cst_96 = arith.constant 9.99999974E-6 : f32
    %232 = vector.broadcast %cst_96 : f32 to vector<64x1xf32>
    %233 = arith.addf %231, %232 : vector<64x1xf32>
    %234 = math.rsqrt %233 : vector<64x1xf32>
    %235 = arith.mulf %234, %11 : vector<64x1xf32>
    %236 = vector.broadcast %235 : vector<64x1xf32> to vector<64x256xf32>
    %237 = arith.mulf %203, %236 : vector<64x256xf32>
    %238 = vector.broadcast %12 : vector<64x1xf32> to vector<64x256xf32>
    %239 = arith.addf %237, %238 : vector<64x256xf32>
    %240 = arith.negf %239 : vector<64x256xf32>
    %241 = math.exp %240 : vector<64x256xf32>
    %cst_97 = arith.constant 1.000000e+00 : f32
    %242 = vector.broadcast %cst_97 : f32 to vector<64x256xf32>
    %243 = arith.addf %242, %241 : vector<64x256xf32>
    %244 = arith.divf %242, %243 : vector<64x256xf32>
    %245 = arith.mulf %239, %244 : vector<64x256xf32>
    %c1_i32_98 = arith.constant 1 : i32
    %246 = tpu.dynamic_rotate %245 by %c1_i32_98 dim 1 : vector<64x256xf32>, i32 -> vector<64x256xf32>
    %247 = vector.broadcast %4 : vector<1x256xf32> to vector<64x256xf32>
    %248 = arith.mulf %246, %247 : vector<64x256xf32>
    %c255_i32_99 = arith.constant 255 : i32
    %249 = tpu.dynamic_rotate %245 by %c255_i32_99 dim 1 : vector<64x256xf32>, i32 -> vector<64x256xf32>
    %250 = vector.broadcast %8 : vector<1x256xf32> to vector<64x256xf32>
    %251 = arith.mulf %249, %250 : vector<64x256xf32>
    %c0_100 = arith.constant 0 : index
    %c256_101 = arith.constant 256 : index
    %252 = vector.load %arg12[%c0_100, %c256_101] : memref<224x512xf32, #tpu.memory_space<vmem>>, vector<64x256xf32>
    tpu.vector_store %arg12[%c0_100, %c256_101], %248 {strides = array<i32>} : memref<224x512xf32, #tpu.memory_space<vmem>>, vector<64x256xf32>,
    %c64_102 = arith.constant 64 : index
    %c256_103 = arith.constant 256 : index
    %253 = vector.load %arg12[%c64_102, %c256_103] : memref<224x512xf32, #tpu.memory_space<vmem>>, vector<64x256xf32>
    tpu.vector_store %arg12[%c64_102, %c256_103], %245 {strides = array<i32>} : memref<224x512xf32, #tpu.memory_space<vmem>>, vector<64x256xf32>,
    %c128_104 = arith.constant 128 : index
    %c256_105 = arith.constant 256 : index
    %254 = vector.load %arg12[%c128_104, %c256_105] : memref<224x512xf32, #tpu.memory_space<vmem>>, vector<64x256xf32>
    tpu.vector_store %arg12[%c128_104, %c256_105], %251 {strides = array<i32>} : memref<224x512xf32, #tpu.memory_space<vmem>>, vector<64x256xf32>,
    %c0_106 = arith.constant 0 : index
    %c0_107 = arith.constant 0 : index
    %255 = vector.load %arg8[%c0_106, %c0_107] : memref<64x224xf32, #tpu.memory_space<vmem>>, vector<64x224xf32>
    %c0_108 = arith.constant 0 : index
    %c0_109 = arith.constant 0 : index
    %256 = vector.load %arg12[%c0_108, %c0_109] : memref<224x512xf32, #tpu.memory_space<vmem>>, vector<224x512xf32>
    %cst_110 = arith.constant dense<0.000000e+00> : vector<64x512xf32>
    %257 = tpu.matmul %255, %256, %cst_110 {dimension_numbers = #tpu.dot_dimension_numbers<[1], [0], [0], [1], [0, 0, 1, 1], [], []>} : vector<64x224xf32>, vector<224x512xf32>, vector<64x512xf32> -> vector<64x512xf32>
    %c0_111 = arith.constant 0 : index
    %c0_112 = arith.constant 0 : index
    %258 = vector.load %arg9[%c0_111, %c0_112] : memref<64x1xf32, #tpu.memory_space<vmem>>, vector<64x1xf32>
    %259 = vector.broadcast %258 : vector<64x1xf32> to vector<64x512xf32>
    %260 = arith.addf %257, %259 : vector<64x512xf32>
    %261 = vector.extract_strided_slice %260 {offsets = [0, 0], sizes = [64, 256], strides = [1, 1]} : vector<64x512xf32> to vector<64x256xf32>
    %cst_113 = arith.constant 1.000000e+00 : f32
    %262 = vector.broadcast %cst_113 : f32 to vector<64x256xf32>
    %263 = arith.mulf %261, %262 : vector<64x256xf32>
    %c0_114 = arith.constant 0 : index
    %c0_115 = arith.constant 0 : index
    %c0_116 = arith.constant 0 : index
    %264 = vector.load %arg10[%c0_114, %c0_115, %c0_116] : memref<2x64x256xf32, #tpu.memory_space<vmem>>, vector<1x64x256xf32>
    %265 = vector.shape_cast %264 : vector<1x64x256xf32> to vector<64x256xf32>
    %266 = vector.shape_cast %263 : vector<64x256xf32> to vector<1x64x256xf32>
    tpu.vector_store %arg10[%c0_114, %c0_115, %c0_116], %266 {strides = array<i32>} : memref<2x64x256xf32, #tpu.memory_space<vmem>>, vector<1x64x256xf32>,
    %267 = vector.extract_strided_slice %260 {offsets = [0, 256], sizes = [64, 256], strides = [1, 1]} : vector<64x512xf32> to vector<64x256xf32>
    %cst_117 = arith.constant 1.000000e+00 : f32
    %268 = vector.broadcast %cst_117 : f32 to vector<64x256xf32>
    %269 = arith.mulf %267, %268 : vector<64x256xf32>
    %c1_118 = arith.constant 1 : index
    %c0_119 = arith.constant 0 : index
    %c0_120 = arith.constant 0 : index
    %270 = vector.load %arg10[%c1_118, %c0_119, %c0_120] : memref<2x64x256xf32, #tpu.memory_space<vmem>>, vector<1x64x256xf32>
    %271 = vector.shape_cast %270 : vector<1x64x256xf32> to vector<64x256xf32>
    %272 = vector.shape_cast %269 : vector<64x256xf32> to vector<1x64x256xf32>
    tpu.vector_store %arg10[%c1_118, %c0_119, %c0_120], %272 {strides = array<i32>} : memref<2x64x256xf32, #tpu.memory_space<vmem>>, vector<1x64x256xf32>,
    return
  }
  func.func @transform_0(%arg0: i32) -> (i32, i32, i32) {
    %c0_i32 = arith.constant 0 : i32
    %c0_i32_0 = arith.constant 0 : i32
    %c0_i32_1 = arith.constant 0 : i32
    return %arg0, %c0_i32, %c0_i32_0 : i32, i32, i32
  }
  func.func @transform_1(%arg0: i32) -> (i32, i32) {
    %c0_i32 = arith.constant 0 : i32
    %c0_i32_0 = arith.constant 0 : i32
    %c0_i32_1 = arith.constant 0 : i32
    return %c0_i32, %c0_i32_0 : i32, i32
  }
  func.func @transform_2(%arg0: i32) -> (i32, i32) {
    %c0_i32 = arith.constant 0 : i32
    %c0_i32_0 = arith.constant 0 : i32
    %c0_i32_1 = arith.constant 0 : i32
    return %c0_i32, %c0_i32_0 : i32, i32
  }
  func.func @transform_3(%arg0: i32) -> (i32, i32) {
    %c0_i32 = arith.constant 0 : i32
    %c0_i32_0 = arith.constant 0 : i32
    %c0_i32_1 = arith.constant 0 : i32
    return %c0_i32, %c0_i32_0 : i32, i32
  }
  func.func @transform_4(%arg0: i32) -> (i32, i32) {
    %c0_i32 = arith.constant 0 : i32
    %c0_i32_0 = arith.constant 0 : i32
    %c0_i32_1 = arith.constant 0 : i32
    return %c0_i32, %c0_i32_0 : i32, i32
  }
  func.func @transform_5(%arg0: i32) -> (i32, i32) {
    %c0_i32 = arith.constant 0 : i32
    %c0_i32_0 = arith.constant 0 : i32
    %c0_i32_1 = arith.constant 0 : i32
    return %c0_i32, %c0_i32_0 : i32, i32
  }
  func.func @transform_6(%arg0: i32) -> (i32, i32) {
    %c0_i32 = arith.constant 0 : i32
    %c0_i32_0 = arith.constant 0 : i32
    %c0_i32_1 = arith.constant 0 : i32
    return %c0_i32, %c0_i32_0 : i32, i32
  }
  func.func @transform_7(%arg0: i32) -> (i32, i32) {
    %c0_i32 = arith.constant 0 : i32
    %c0_i32_0 = arith.constant 0 : i32
    %c0_i32_1 = arith.constant 0 : i32
    return %c0_i32, %c0_i32_0 : i32, i32
  }
  func.func @transform_8(%arg0: i32) -> (i32, i32) {
    %c0_i32 = arith.constant 0 : i32
    %c0_i32_0 = arith.constant 0 : i32
    %c0_i32_1 = arith.constant 0 : i32
    return %c0_i32, %c0_i32_0 : i32, i32
  }
  func.func @transform_9(%arg0: i32) -> (i32, i32, i32) {
    %c0_i32 = arith.constant 0 : i32
    %c0_i32_0 = arith.constant 0 : i32
    %c0_i32_1 = arith.constant 0 : i32
    return %arg0, %c0_i32, %c0_i32_0 : i32, i32, i32
  }
}

</mosaic_0001>

<bundles_post_ra>
// kernel: resnet_block_1d.1
= control target key start
LH: loop header
LB: loop body
LE: loop exit
PB: predicated region body
PF: predicated region fallthrough
CT: control target
= control target key end

     0   :  { %14 = vsyncpa [#allocation5], 0  ;;  %s6123_s0 = inlined_call_operand.vmem [shape: f32[4,32,256], index: 0, kind: input, shape index: {}]   ;;  %s6124_s1 = inlined_call_operand.vmem [shape: f32[32,1], index: 1, kind: input, shape index: {}]   ;;  %s6125_s2 = inlined_call_operand.vmem [shape: f32[32,1], index: 2, kind: input, shape index: {}]   ;;  %s6126_s3 = inlined_call_operand.vmem [shape: f32[64,96], index: 3, kind: input, shape index: {}]   ;;  %s6127_s4 = inlined_call_operand.vmem [shape: f32[64,1], index: 4, kind: input, shape index: {}]   ;;  %s6128_s5 = inlined_call_operand.vmem [shape: f32[64,1], index: 5, kind: input, shape index: {}]   ;;  %s6129_s6 = inlined_call_operand.vmem [shape: f32[64,1], index: 6, kind: input, shape index: {}]   ;;  %s6130_s7 = inlined_call_operand.hbm [shape: f32[64,224], index: 7, kind: input, shape index: {}]   ;;  %s6131_s8 = inlined_call_operand.vmem [shape: f32[64,1], index: 8, kind: input, shape index: {}]   ;;  %s6132_s9 = inlined_call_operand.hbm [shape: f32[4,64,256], index: 9, kind: output, shape index: {}]  }
   0x1   :  { %15 = vsyncpa [#allocation6], 0 }
   0x2   :  { %17 = vsyncpa [#allocation6 + $0x1], 0  ;;  %s3973_s30 = smov 0   ;;  %s3975_s10 = smov 0  }
   0x3   :  { %s3977_s11 = smov 0   ;;  %s3979_s12 = smov 0  }
   0x4 LB: > { %s3994_s13 = sadd.s32 4294967295, %s3911_s12   ;;  %s3216_s14 = sadd.s32 4294967294, %s3911_s12   ;;  %s3911_s12 = sphi %s3979_s12, %s6338_s12   ;;  %s3907_s11 = sphi %s3977_s11, %s6337_s11   ;;  %s3903_s10 = sphi %s3975_s10, %s6336_s10   ;;  %s3899_s30 = sphi %s3973_s30, %s6335_s30  }
   0x5   : > { %s3998_s15 = sadd.s32 1, %s3911_s12   ;;  %s224_s16 = sadd.s32 1, %s3907_s11 }
   0x6   : > { %s221_s17 = ssub.s32 %s3911_s12, %s3998_s15  ;;  %p234_p0 = scmp.ne.s32.totalorder %s3907_s11, %s3903_s10 }
   0x7   : > { %p222_p1 = scmp.eq.s32.totalorder %s221_s17, 0  ;;  %p235_p2 = scmp.eq.s32.totalorder %s3994_s13, 1 }
   0x8   : > { %p240_p3 = scmp.ne.s32.totalorder %s3903_s10, %s3899_s30  ;;  %p241_p4 = scmp.eq.s32.totalorder %s3216_s14, 1 }
   0x9   : > { %s4009_s18 = scalar_select %p222_p1, %s3907_s11, %s224_s16  }
   0xa   : > { %p4011_p5 = por %p235_p2, %p234_p0  ;;  %p4015_p6 = por %p241_p4, %p240_p3 }
   0xb   : > { %p3217_p7 = scmp.ge.s32.totalorder %s3911_s12, 1  ;;  %p248_p8 = scmp.lt.s32.totalorder %s3911_s12, 3 }
   0xc   : > { %s6194_s19 = scalar_select %p4011_p5, 1, 0 }
   0xd   : > { %s6195_s20 = scalar_select %p4015_p6, 1, 0 }
   0xe   : > { %p6133_p9 = scmp.eq.s32.totalorder %s3994_s13, 0  ;;  %p4022_p10 = pnand %p3217_p7, %p248_p8 }
   0xf   : > { %s3913_s22 = smov [#allocation4]   ;;  %s3817_s27 = scalar_lea.hbm %s6130_s7, 2048 }
  0x10   : > { %s6196_s21 = scalar_select %p4022_p10, 1, 0 }
  0x11   : > { %s278_s23 = sshll.u32 %s3913_s22, 4  ;;  %p3507_p11 = pneg %p4022_p10  ;;  %s279_s23 = int_to_ptr.vmem [resolvable:$true] %s278_s23 }
  0x12   : > { %p3818_p13 = scmp.ne.s32.totalorder %s6130_s7, %s3817_s27  ;;  %p3824_p3 = scmp.lt.u32.totalorder %s3817_s27, %s6130_s7 }
  0x13   : > { %p4030_p12 = pnand %p6133_p9, %p3507_p11 }
  0x15   : > { %p3819_p0 = pneg %p4030_p12 }
  0x17   : > { %p3820_p1 = pnand %p3819_p0, %p3818_p13 }
  0x19   : > { %p3821_p2 = pneg %p3820_p1 }
  0x1b   : > { %p3826_p4 = pnand %p3824_p3, %p3821_p2 }
  0x1d   : > { %3829 = shalt.err (!%p3826_p4)
}
  0x1e   : > { %s3830_s17 = scalar_lea.vmem %s279_s23, 2048  ;;  %p3838_p9 = scmp.lt.s32.totalorder %s279_s23, %s279_s23 }
  0x1f   : > { %p3831_p7 = scmp.ne.s32.totalorder %s279_s23, %s3830_s17  ;;  %p3839_p6 = scmp.lt.s32.totalorder %s3830_s17, %s3830_s17 }
  0x21   : > { %p3833_p8 = pnand %p3831_p7, %p3819_p0  ;;  %p3840_p5 = por %p3839_p6, %p3838_p9 }
  0x23   : > { %p3834_p11 = pneg %p3833_p8 }
  0x25   : > { %p3841_p10 = pnand %p3840_p5, %p3834_p11 }
  0x27   : > { %3844 = shalt.err (!%p3841_p10)
}
  0x28   : > { %s3914_s22 = smov 256   ;;  %s3915_s25 = smov 16  }
  0x29   : > { %3510 = dma.hbm_to_vmem [thread:$0]  (!%p4030_p12), %s6130_s7, 2048, %s279_s23, [#allocation5], %s3914_s22, %s3914_s22, %s3915_s25  }
  0x2a   : > { %p6198_p13 = scmp.ne.s32.totalorder %s6196_s21, 0 }
  0x2c   : > { %307 = sbr.rel (%p6198_p13) target bundleno = 2093 (0x82d), region = 56 }
  0x33   : > { %p6199_p1 = scmp.eq.s32.totalorder %s3994_s13, 0 }
  0x35   : > { %3890 = dma.done.wait (%p6199_p1), [#allocation5], 2048   ;;  %p6200_p0 = pmov %p6199_p1 }
  0x36   : > { %s3223_s27 = sshll.u32 %s3994_s13, 1  ;;  %s3917_s26 = smov 1   ;;  %vm1030_vm4 = vcmask 785408  }
  0x37   : > { %3892 = vsyncadd (%p6200_p0), [#allocation5], 4294965248  ;;  %p345_p5 = scmp.lt.s32.totalorder %s3223_s27, 3  ;;  %s6136_s28 = smov 127  }
  0x38   : > { %s6269_s21 = smov 127   ;;  %p6333_p9 = scmp.ne.s32.totalorder %s6194_s19, 0 }
  0x39   : > { %s6340_s27 = smov (!%p345_p5, %s3223_s27), 3 }
  0x3a   : > { %s3338_s29 = sshll.u32 %s6340_s27, 6 }
  0x3b   : > { %s4060_s16 = scalar_lea.vmem %s6123_s0, %s3338_s29  ;;  %s3340_s29 = sshll.u32 %s3994_s13, 12 }
  0x3c   : > { %v391_v0 = vld [vmem:[%s4060_s16] sm:$0xff]  ;;  %v392_v1 = vld [vmem:[%s4060_s16 + $0x8] sm:$0xff]  ;;  %v393_v5 = vld [vmem:[%s4060_s16 + $0x10] sm:$0xff] }
  0x3d   : > { %v3236_v2 = vld [vmem:[%s4060_s16 + $0x40] sm:$0xff]  ;;  %v399_v3 = vadd.f32 %v392_v1, %v391_v0  ;;  %v3237_v4 = vld [vmem:[%s4060_s16 + $0x48] sm:$0xff]  ;;  %v394_v6 = vld [vmem:[%s4060_s16 + $0x18] sm:$0xff] }
  0x3e   : > { %v678_v7 = vadd.f32 %v3237_v4, %v3236_v2  ;;  %v3238_v8 = vld [vmem:[%s4060_s16 + $0x50] sm:$0xff]  ;;  %v3239_v9 = vld [vmem:[%s4060_s16 + $0x58] sm:$0xff]  ;;  %v402_v10 = vadd.f32 %v394_v6, %v393_v5  ;;  %v395_v12 = vld [vmem:[%s4060_s16 + $0x20] sm:$0xff] }
  0x3f   : > { %400 = vadd.xlane.f32.xlu0 %v399_v3  ;;  %v681_v11 = vadd.f32 %v3239_v9, %v3238_v8  ;;  %v396_v13 = vld [vmem:[%s4060_s16 + $0x28] sm:$0xff]  ;;  %v397_v14 = vld [vmem:[%s4060_s16 + $0x30] sm:$0xff]  ;;  %v398_v15 = vld [vmem:[%s4060_s16 + $0x38] sm:$0xff] }
  0x40   : > { %679 = vadd.xlane.f32.xlu1 %v678_v7  ;;  %v405_v16 = vadd.f32 %v396_v13, %v395_v12  ;;  %v408_v17 = vadd.f32 %v398_v15, %v397_v14  ;;  %v3240_v18 = vld [vmem:[%s4060_s16 + $0x60] sm:$0xff]  ;;  %v3241_v19 = vld [vmem:[%s4060_s16 + $0x68] sm:$0xff]  ;;  %v3242_v20 = vld [vmem:[%s4060_s16 + $0x70] sm:$0xff] }
  0x41   : > { %v3243_v21 = vld [vmem:[%s4060_s16 + $0x78] sm:$0xff]  ;;  %v684_v22 = vadd.f32 %v3241_v19, %v3240_v18 }
  0x42   : > { %v687_v23 = vadd.f32 %v3243_v21, %v3242_v20 }
  0x43   : > { %403 = vadd.xlane.f32.xlu0 %v402_v10 }
  0x44   : > { %682 = vadd.xlane.f32.xlu1 %v681_v11 }
  0x47   : > { %406 = vadd.xlane.f32.xlu0 %v405_v16  ;;  %v3916_v16 = vmov 0  }
  0x48   : > { %409 = vadd.xlane.f32.xlu1 %v408_v17  ;;  %3560 = vset.pattern.permute.xlu0 %v3916_v16  ;;  %v371_v17 = vld [vmem:[%s6125_s2] sm:$0xff] }
  0x49   : > { %3559 = vset.pattern.permute.xlu1 %v3916_v16  ;;  %v373_v16 = vld [vmem:[%s6125_s2 + $0x10] sm:$0xff] }
  0x4b   : > { %685 = vadd.xlane.f32.xlu0 %v684_v22 }
  0x4c   : > { %688 = vadd.xlane.f32.xlu1 %v687_v23 }
  0xcc   : > { %v401_v24 = vpop.xlane.xlu0 %400 }
  0xcd   : > { %v411_v25 = vmul.f32 0.00390625, %v401_v24  ;;  %v680_v26 = vpop.xlane.xlu1 %679 }
  0xce   : > { %v690_v27 = vmul.f32 0.00390625, %v680_v26 }
  0xcf   : > { %v4078_v28 = vsub.f32 %v391_v0, %v411_v25  ;;  %v4080_v29 = vsub.f32 %v392_v1, %v411_v25 }
  0xd0   : > { %v4082_v30 = vsub.f32 %v3236_v2, %v690_v27  ;;  %v4084_v31 = vsub.f32 %v3237_v4, %v690_v27  ;;  %v404_v32 = vpop.xlane.xlu0 %403 }
  0xd1   : > { %v412_v33 = vmul.f32 0.00390625, %v404_v32  ;;  %v683_v34 = vpop.xlane.xlu1 %682  ;;  %v423_v35 = vmul.f32 %v4078_v28, %v4078_v28  ;;  %v424_v36 = vmul.f32 %v4080_v29, %v4080_v29 }
  0xd2   : > { %v691_v37 = vmul.f32 0.00390625, %v683_v34  ;;  %v702_v38 = vmul.f32 %v4082_v30, %v4082_v30  ;;  %v703_v39 = vmul.f32 %v4084_v31, %v4084_v31 }
  0xd3   : > { %v4094_v40 = vsub.f32 %v393_v5, %v412_v33  ;;  %v4096_v41 = vsub.f32 %v394_v6, %v412_v33  ;;  %v431_v42 = vadd.f32 %v424_v36, %v423_v35 }
  0xd4   : > { %v4098_v43 = vsub.f32 %v3238_v8, %v691_v37  ;;  %v4100_v44 = vsub.f32 %v3239_v9, %v691_v37  ;;  %v407_v45 = vpop.xlane.xlu0 %406  ;;  %v710_v50 = vadd.f32 %v703_v39, %v702_v38 }
  0xd5   : > { %432 = vadd.xlane.f32.xlu0 %v431_v42  ;;  %v410_v46 = vpop.xlane.xlu1 %409  ;;  %v425_v47 = vmul.f32 %v4094_v40, %v4094_v40  ;;  %v426_v48 = vmul.f32 %v4096_v41, %v4096_v41  ;;  %v413_v49 = vmul.f32 0.00390625, %v407_v45  ;;  %v367_v42 = vld [vmem:[%s6124_s1] sm:$0xff] }
  0xd6   : > { %v414_v51 = vmul.f32 0.00390625, %v410_v46  ;;  %v704_v52 = vmul.f32 %v4098_v43, %v4098_v43  ;;  %v705_v53 = vmul.f32 %v4100_v44, %v4100_v44 }
  0xd7   : > { %v434_v54 = vadd.f32 %v426_v48, %v425_v47  ;;  %v4110_v55 = vsub.f32 %v395_v12, %v413_v49  ;;  %v4112_v56 = vsub.f32 %v396_v13, %v413_v49 }
  0xd8   : > { %v4114_v57 = vsub.f32 %v397_v14, %v414_v51  ;;  %v4116_v58 = vsub.f32 %v398_v15, %v414_v51  ;;  %v686_v59 = vpop.xlane.xlu0 %685  ;;  %v713_v61 = vadd.f32 %v705_v53, %v704_v52  ;;  %v368_v51 = vld [vmem:[%s6124_s1 + $0x8] sm:$0xff] }
  0xd9   : > { %435 = vadd.xlane.f32.xlu1 %v434_v54  ;;  %v689_v60 = vpop.xlane.xlu1 %688  ;;  %711 = vadd.xlane.f32.xlu0 %v710_v50  ;;  %v692_v62 = vmul.f32 0.00390625, %v686_v59  ;;  %v427_v63 = vmul.f32 %v4110_v55, %v4110_v55  ;;  %v428_v0 = vmul.f32 %v4112_v56, %v4112_v56 }
  0xda   : > { %v693_v1 = vmul.f32 0.00390625, %v689_v60  ;;  %v429_v2 = vmul.f32 %v4114_v57, %v4114_v57  ;;  %v430_v3 = vmul.f32 %v4116_v58, %v4116_v58 }
  0xdb   : > { %v4126_v4 = vsub.f32 %v3240_v18, %v692_v62  ;;  %v4128_v5 = vsub.f32 %v3241_v19, %v692_v62  ;;  %v437_v6 = vadd.f32 %v428_v0, %v427_v63  ;;  %v372_v18 = vld [vmem:[%s6125_s2 + $0x8] sm:$0xff] }
  0xdc   : > { %v4130_v7 = vsub.f32 %v3242_v20, %v693_v1  ;;  %v4132_v8 = vsub.f32 %v3243_v21, %v693_v1  ;;  %v440_v9 = vadd.f32 %v430_v3, %v429_v2  ;;  %v369_v2 = vld [vmem:[%s6124_s1 + $0x10] sm:$0xff]  ;;  %v370_v3 = vld [vmem:[%s6124_s1 + $0x18] sm:$0xff] }
  0xdd   : > { %714 = vadd.xlane.f32.xlu1 %v713_v61  ;;  %438 = vadd.xlane.f32.xlu0 %v437_v6  ;;  %v706_v10 = vmul.f32 %v4126_v4, %v4126_v4  ;;  %v707_v11 = vmul.f32 %v4128_v5, %v4128_v5 }
  0xde   : > { %v708_v12 = vmul.f32 %v4130_v7, %v4130_v7  ;;  %v709_v13 = vmul.f32 %v4132_v8, %v4132_v8 }
  0xdf   : > { %v716_v14 = vadd.f32 %v707_v11, %v706_v10 }
  0xe0   : > { %v719_v15 = vadd.f32 %v709_v13, %v708_v12 }
  0xe1   : > { %441 = vadd.xlane.f32.xlu1 %v440_v9  ;;  %717 = vadd.xlane.f32.xlu0 %v716_v14  ;;  %v374_v14 = vld [vmem:[%s6125_s2 + $0x18] sm:$0xff] }
  0xe5   : > { %720 = vadd.xlane.f32.xlu1 %v719_v15 }
  0xf6   : > { %489 = vperm.xlu1 %3559, %v371_v17  }
  0xfa   : > { %494 = vperm.xlu1 %3559, %v372_v18  }
 0x162   : > { %v433_v19 = vpop.xlane.xlu0 %432 }
 0x163   : > { %v443_v20 = vmul.f32 0.00390625, %v433_v19 }
 0x165   : > { %v447_v21 = vadd.f32 1e-05, %v443_v20 }
 0x166   : > { %v436_v22 = vpop.xlane.xlu1 %435  ;;  %v712_v23 = vpop.xlane.xlu0 %711 }
 0x167   : > { %3561 = vrsqrt.f32 %v447_v21  ;;  %v444_v24 = vmul.f32 0.00390625, %v436_v22  ;;  %v722_v25 = vmul.f32 0.00390625, %v712_v23 }
 0x169   : > { %v448_v26 = vadd.f32 1e-05, %v444_v24  ;;  %v726_v27 = vadd.f32 1e-05, %v722_v25 }
 0x16a   : > { %v715_v32 = vpop.xlane.xlu1 %714  ;;  %v439_v33 = vpop.xlane.xlu0 %438 }
 0x16b   : > { %3563 = vrsqrt.f32 %v448_v26  ;;  %v723_v34 = vmul.f32 0.00390625, %v715_v32  ;;  %v445_v35 = vmul.f32 0.00390625, %v439_v33 }
 0x16c   : > { %3565 = vrsqrt.f32 %v726_v27 }
 0x16d   : > { %v727_v36 = vadd.f32 1e-05, %v723_v34  ;;  %v449_v39 = vadd.f32 1e-05, %v445_v35 }
 0x16e   : > { %v442_v37 = vpop.xlane.xlu1 %441  ;;  %v718_v45 = vpop.xlane.xlu0 %717 }
 0x16f   : > { %3567 = vrsqrt.f32 %v727_v36  ;;  %v446_v38 = vmul.f32 0.00390625, %v442_v37  ;;  %v724_v52 = vmul.f32 0.00390625, %v718_v45 }
 0x170   : > { %3569 = vrsqrt.f32 %v449_v39 }
 0x171   : > { %v3562_v46 = vpop.eup %3561  ;;  %v450_v47 = vadd.f32 1e-05, %v446_v38  ;;  %v728_v61 = vadd.f32 1e-05, %v724_v52 }
 0x172   : > { %v721_v48 = vpop.xlane.xlu1 %720  ;;  %v455_v49 = vmul.f32 %v3562_v46, %v367_v42 }
 0x173   : > { %v725_v50 = vmul.f32 0.00390625, %v721_v48  ;;  %3571 = vrsqrt.f32 %v450_v47 }
 0x174   : > { %461 = vperm.xlu0 %3560, %v455_v49  }
 0x175   : > { %v3564_v53 = vpop.eup %3563  ;;  %v729_v54 = vadd.f32 1e-05, %v725_v50 }
 0x176   : > { %v3566_v59 = vpop.eup %3565  ;;  %v456_v60 = vmul.f32 %v3564_v53, %v368_v51  ;;  %v490_v17 = vpop.permute.xlu1 %489 }
 0x177   : > { %3573 = vrsqrt.f32 %v729_v54  ;;  %v734_v62 = vmul.f32 %v3566_v59, %v367_v42 }
 0x178   : > { %466 = vperm.xlu1 %3559, %v456_v60   ;;  %3575 = vrsqrt.f32 %v728_v61 }
 0x179   : > { %v3568_v63 = vpop.eup %3567 }
 0x17a   : > { %v735_v0 = vmul.f32 %v3568_v63, %v368_v51  ;;  %v3570_v1 = vpop.eup %3569  ;;  %v495_v18 = vpop.permute.xlu1 %494 }
 0x17b   : > { %v457_v9 = vmul.f32 %v3570_v1, %v369_v2 }
 0x17c   : > { %740 = vperm.xlu1 %3559, %v734_v62  }
 0x17d   : > { %v3572_v6 = vpop.eup %3571 }
 0x17e   : > { %v458_v12 = vmul.f32 %v3572_v6, %v370_v3 }
 0x180   : > { %745 = vperm.xlu1 %3559, %v735_v0  }
 0x181   : > { %v3574_v10 = vpop.eup %3573 }
 0x182   : > { %v737_v11 = vmul.f32 %v3574_v10, %v370_v3  ;;  %v3576_v13 = vpop.eup %3575 }
 0x183   : > { %v736_v15 = vmul.f32 %v3576_v13, %v369_v2 }
 0x184   : > { %471 = vperm.xlu1 %3559, %v457_v9   ;;  %755 = vperm.xlu0 %3560, %v737_v11  }
 0x188   : > { %476 = vperm.xlu1 %3559, %v458_v12   ;;  %504 = vperm.xlu0 %3560, %v374_v14  }
 0x18c   : > { %750 = vperm.xlu1 %3559, %v736_v15  }
 0x190   : > { %499 = vperm.xlu1 %3559, %v373_v16  }
 0x1f3   : > { %v462_v19 = vpop.permute.xlu0 %461 }
 0x1f4   : > { %v479_v20 = vmul.f32 %v462_v19, %v4078_v28  ;;  %v480_v21 = vmul.f32 %v462_v19, %v4080_v29 }
 0x1f6   : > { %v4168_v22 = vadd.f32 %v490_v17, %v479_v20  ;;  %v4170_v23 = vadd.f32 %v490_v17, %v480_v21 }
 0x1f7   : > { %v467_v24 = vpop.permute.xlu1 %466 }
 0x1f8   : > { %v3228_v25 = vmul.f32 -1.442695, %v4168_v22  ;;  %v3229_v26 = vmul.f32 -1.442695, %v4170_v23  ;;  %v481_v27 = vmul.f32 %v467_v24, %v4094_v40  ;;  %v482_v32 = vmul.f32 %v467_v24, %v4096_v41 }
 0x1fa   : > { %3577 = vpow2.f32 %v3228_v25  ;;  %v4176_v33 = vadd.f32 %v495_v18, %v481_v27  ;;  %v4178_v34 = vadd.f32 %v495_v18, %v482_v32 }
 0x1fb   : > { %3579 = vpow2.f32 %v3229_v26  ;;  %v741_v28 = vpop.permute.xlu1 %740 }
 0x1fc   : > { %v3230_v29 = vmul.f32 -1.442695, %v4176_v33  ;;  %v3231_v35 = vmul.f32 -1.442695, %v4178_v34  ;;  %v758_v36 = vmul.f32 %v741_v28, %v4082_v30  ;;  %v759_v37 = vmul.f32 %v741_v28, %v4084_v31 }
 0x1fe   : > { %3581 = vpow2.f32 %v3230_v29  ;;  %v4184_v38 = vadd.f32 %v758_v36, %v490_v17  ;;  %v4186_v40 = vadd.f32 %v759_v37, %v490_v17 }
 0x1ff   : > { %3583 = vpow2.f32 %v3231_v35  ;;  %v746_v41 = vpop.permute.xlu1 %745 }
 0x200   : > { %v3244_v39 = vmul.f32 -1.442695, %v4184_v38  ;;  %v3245_v42 = vmul.f32 -1.442695, %v4186_v40  ;;  %v760_v45 = vmul.f32 %v746_v41, %v4098_v43  ;;  %v761_v46 = vmul.f32 %v746_v41, %v4100_v44 }
 0x202   : > { %3585 = vpow2.f32 %v3244_v39  ;;  %v4192_v47 = vadd.f32 %v760_v45, %v495_v18  ;;  %v4194_v30 = vadd.f32 %v761_v46, %v495_v18 }
 0x203   : > { %3587 = vpow2.f32 %v3245_v42  ;;  %v472_v31 = vpop.permute.xlu1 %471  ;;  %v756_v48 = vpop.permute.xlu0 %755 }
 0x204   : > { %v3578_v49 = vpop.eup %3577  ;;  %v3246_v50 = vmul.f32 -1.442695, %v4192_v47  ;;  %v3247_v53 = vmul.f32 -1.442695, %v4194_v30  ;;  %v764_v43 = vmul.f32 %v756_v48, %v4130_v7  ;;  %v765_v44 = vmul.f32 %v756_v48, %v4132_v8 }
 0x205   : > { %v3580_v51 = vpop.eup %3579  ;;  %v539_v52 = vadd.f32 1.0, %v3578_v49  ;;  %v484_v14 = vmul.f32 %v472_v31, %v4112_v56 }
 0x206   : > { %v540_v54 = vadd.f32 1.0, %v3580_v51  ;;  %3589 = vpow2.f32 %v3246_v50 }
 0x207   : > { %3591 = vrcp.f32 %v539_v52  ;;  %v477_v59 = vpop.permute.xlu1 %476  ;;  %v505_v60 = vpop.permute.xlu0 %504 }
 0x208   : > { %v3582_v61 = vpop.eup %3581  ;;  %3593 = vrcp.f32 %v540_v54  ;;  %v485_v62 = vmul.f32 %v477_v59, %v4114_v57  ;;  %v486_v63 = vmul.f32 %v477_v59, %v4116_v58  ;;  %v4202_v0 = vadd.f32 %v764_v43, %v505_v60 }
 0x209   : > { %v3584_v1 = vpop.eup %3583  ;;  %v541_v2 = vadd.f32 1.0, %v3582_v61  ;;  %3595 = vpow2.f32 %v3247_v53  ;;  %v4204_v3 = vadd.f32 %v765_v44, %v505_v60  ;;  %v483_v57 = vmul.f32 %v472_v31, %v4110_v55 }
 0x20a   : > { %v542_v6 = vadd.f32 1.0, %v3584_v1  ;;  %v4206_v7 = vadd.f32 %v505_v60, %v485_v62  ;;  %v4208_v9 = vadd.f32 %v505_v60, %v486_v63  ;;  %v3250_v8 = vmul.f32 -1.442695, %v4202_v0 }
 0x20b   : > { %3597 = vrcp.f32 %v541_v2  ;;  %v751_v10 = vpop.permute.xlu1 %750  ;;  %v3251_v18 = vmul.f32 -1.442695, %v4204_v3 }
 0x20c   : > { %v3586_v11 = vpop.eup %3585  ;;  %3599 = vrcp.f32 %v542_v6  ;;  %v3234_v58 = vmul.f32 -1.442695, %v4206_v7  ;;  %v3235_v15 = vmul.f32 -1.442695, %v4208_v9  ;;  %v762_v17 = vmul.f32 %v751_v10, %v4126_v4 }
 0x20d   : > { %v3588_v12 = vpop.eup %3587  ;;  %v798_v13 = vadd.f32 1.0, %v3586_v11  ;;  %3601 = vpow2.f32 %v3250_v8  ;;  %v763_v19 = vmul.f32 %v751_v10, %v4128_v5 }
 0x20e   : > { %v799_v16 = vadd.f32 1.0, %v3588_v12  ;;  %3603 = vpow2.f32 %v3234_v58 }
 0x20f   : > { %3605 = vrcp.f32 %v798_v13  ;;  %v500_v20 = vpop.permute.xlu1 %499 }
 0x210   : > { %v3590_v55 = vpop.eup %3589  ;;  %3607 = vrcp.f32 %v799_v16  ;;  %v4218_v21 = vadd.f32 %v500_v20, %v483_v57  ;;  %v4220_v24 = vadd.f32 %v500_v20, %v484_v14  ;;  %v4222_v56 = vadd.f32 %v762_v17, %v500_v20 }
 0x211   : > { %v3592_v25 = vpop.eup %3591  ;;  %v800_v26 = vadd.f32 1.0, %v3590_v55  ;;  %3609 = vpow2.f32 %v3235_v15  ;;  %v4224_v27 = vadd.f32 %v763_v19, %v500_v20 }
 0x212   : > { %v3594_v4 = vpop.eup %3593  ;;  %v4227_v32 = vmul.f32 %v3592_v25, %v4168_v22  ;;  %v3232_v5 = vmul.f32 -1.442695, %v4218_v21  ;;  %v3233_v28 = vmul.f32 -1.442695, %v4220_v24  ;;  %3611 = vpow2.f32 %v3251_v18 }
 0x213   : > { %v3596_v29 = vpop.eup %3595  ;;  %3613 = vrcp.f32 %v800_v26  ;;  %v3248_v35 = vmul.f32 -1.442695, %v4222_v56  ;;  %v3249_v37 = vmul.f32 -1.442695, %v4224_v27  ;;  %v3918_v22 = vmov 0.0  }
 0x214   : > { %v801_v36 = vadd.f32 1.0, %v3596_v29  ;;  %571 = vrot.lane.b32.xlu1 %v4227_v32, %s3917_s26  ;;  %3615 = vpow2.f32 %v3232_v5  ;;  %1119 = vmatprep.mubr.f32.mxu0 %v3918_v22  ;;  %v4241_v45 = vmul.f32 %v3594_v4, %v4170_v23  ;;  %v982_v4 = vld [vmem:[%s6127_s4] sm:$0xff]  ;;  %v989_v5 = vld [vmem:[%s6127_s4 + $0x38] sm:$0xff]  ;;  %v987_v29 = vld [vmem:[%s6127_s4 + $0x28] sm:$0xff] }
 0x215   : > { %v3598_v41 = vpop.eup %3597  ;;  %3617 = vpow2.f32 %v3233_v28  ;;  %1232 = vmatprep.mubr.f32.mxu1 %v3918_v22  ;;  %v984_v28 = vld [vmem:[%s6127_s4 + $0x10] sm:$0xff] }
 0x216   : > { %v3600_v39 = vpop.eup %3599  ;;  %3619 = vrcp.f32 %v801_v36  ;;  %v4238_v42 = vmul.f32 %v3598_v41, %v4176_v33  ;;  %v986_v36 = vld [vmem:[%s6127_s4 + $0x20] sm:$0xff] }
 0x217   : > { %v3602_v46 = vpop.eup %3601  ;;  %v4244_v31 = vmul.f32 %v3600_v39, %v4178_v34  ;;  %3621 = vpow2.f32 %v3248_v35  ;;  %v988_v35 = vld [vmem:[%s6127_s4 + $0x30] sm:$0xff] }
 0x218   : > { %v3604_v48 = vpop.eup %3603  ;;  %573 = vrot.lane.b32.xlu0 %v4238_v42, %s3917_s26  ;;  %579 = vrot.lane.b32.xlu1 %v4241_v45, %s3917_s26  ;;  %3623 = vpow2.f32 %v3249_v37  ;;  %v3351_v33 = vpack.c.bf16 %v4238_v42, %v4227_v32  ;;  %v804_v43 = vadd.f32 1.0, %v3602_v46  ;;  %v352_v37 = vlaneseq }
 0x219   : > { %v3606_v49 = vpop.eup %3605  ;;  %v545_v50 = vadd.f32 1.0, %v3604_v48  ;;  %v3349_v23 = vpack.c.bf16 %v4244_v31, %v4241_v45 }
 0x21a   : > { %v3608_v51 = vpop.eup %3607  ;;  %v4255_v34 = vmul.f32 %v3606_v49, %v4184_v38  ;;  %v4385_v39 = vand.u32 127, %v352_v37 }
 0x21b   : > { %v3610_v52 = vpop.eup %3609  ;;  %3625 = vrcp.f32 %v545_v50  ;;  %v4265_v61 = vmul.f32 %v3608_v51, %v4186_v40 }
 0x21c   : > { %v3612_v53 = vpop.eup %3611  ;;  %581 = vrot.lane.b32.xlu0 %v4244_v31, %s3917_s26  ;;  %830 = vrot.lane.b32.xlu1 %v4255_v34, %s3917_s26  ;;  %v546_v54 = vadd.f32 1.0, %v3610_v52  ;;  %6201 = vst [vmem:[#allocation10_spill] sm:$0xff] %v4385_v39  ;;  %vm587_vm0 = vcmp.lt.s32.totalorder %v4385_v39, 1  ;;  %vm355_vm1 = vcmp.gt.s32.totalorder %v4385_v39, 0  ;;  %vm620_vm3 = vcmp.lt.s32.totalorder %v4385_v39, 127 }
 0x21d   : > { %v3614_v44 = vpop.eup %3613  ;;  %v805_v63 = vadd.f32 1.0, %v3612_v53  ;;  %v4392_v50 = vsel %vm355_vm1, 1.0, %v3918_v22 }
 0x21e   : > { %v3616_v59 = vpop.eup %3615  ;;  %v4262_v60 = vmul.f32 %v3614_v44, %v4192_v47  ;;  %3627 = vrcp.f32 %v546_v54  ;;  %6202 = vst [vmem:[#allocation11_spill] sm:$0xff] %v4392_v50 }
 0x21f   : > { %v3618_v38 = vpop.eup %3617  ;;  %v543_v62 = vadd.f32 1.0, %v3616_v59  ;;  %3629 = vrcp.f32 %v804_v43 }
 0x220   : > { %v3620_v1 = vpop.eup %3619  ;;  %832 = vrot.lane.b32.xlu0 %v4262_v60, %s3917_s26  ;;  %838 = vrot.lane.b32.xlu1 %v4265_v61, %s3917_s26  ;;  %v544_v2 = vadd.f32 1.0, %v3618_v38  ;;  %v3375_v47 = vpack.c.bf16 %v4262_v60, %v4255_v34 }
 0x221   : > { %v3622_v6 = vpop.eup %3621  ;;  %v4274_v40 = vmul.f32 %v3620_v1, %v4194_v30  ;;  %3631 = vrcp.f32 %v543_v62 }
 0x222   : > { %v3624_v8 = vpop.eup %3623  ;;  %3633 = vrcp.f32 %v544_v2  ;;  %v802_v10 = vadd.f32 1.0, %v3622_v6 }
 0x223   : > { %3635 = vrcp.f32 %v805_v63  ;;  %v803_v11 = vadd.f32 1.0, %v3624_v8  ;;  %v3373_v57 = vpack.c.bf16 %v4274_v40, %v4265_v61 }
 0x224   : > { %840 = vrot.lane.b32.xlu0 %v4274_v40, %s3917_s26  ;;  %3637 = vrcp.f32 %v802_v10 }
 0x225   : > { %v3626_v58 = vpop.eup %3625  ;;  %3639 = vrcp.f32 %v803_v11 }
 0x226   : > { %v4281_v12 = vmul.f32 %v3626_v58, %v4206_v7 }
 0x228   : > { %v3628_v30 = vpop.eup %3627  ;;  %577 = vrot.lane.b32.xlu0 %v4281_v12, %s3917_s26 }
 0x229   : > { %v3630_v13 = vpop.eup %3629  ;;  %v4286_v14 = vmul.f32 %v3628_v30, %v4208_v9 }
 0x22a   : > { %v4299_v20 = vmul.f32 %v3630_v13, %v4202_v0 }
 0x22b   : > { %v3632_v15 = vpop.eup %3631 }
 0x22c   : > { %v3634_v16 = vpop.eup %3633  ;;  %585 = vrot.lane.b32.xlu0 %v4286_v14, %s3917_s26  ;;  %v4291_v17 = vmul.f32 %v3632_v15, %v4218_v21 }
 0x22d   : > { %v3636_v18 = vpop.eup %3635  ;;  %v4294_v7 = vmul.f32 %v3634_v16, %v4220_v24 }
 0x22e   : > { %v3638_v19 = vpop.eup %3637  ;;  %575 = vrot.lane.b32.xlu1 %v4291_v17, %s3917_s26  ;;  %v3355_v9 = vpack.c.bf16 %v4281_v12, %v4291_v17  ;;  %v4311_v24 = vmul.f32 %v3636_v18, %v4204_v3  ;;  %v983_v3 = vld [vmem:[%s6127_s4 + $0x8] sm:$0xff] }
 0x22f   : > { %v3640_v55 = vpop.eup %3639  ;;  %v4304_v25 = vmul.f32 %v3638_v19, %v4222_v56  ;;  %v3353_v21 = vpack.c.bf16 %v4286_v14, %v4294_v7 }
 0x230   : > { %836 = vrot.lane.b32.xlu0 %v4299_v20, %s3917_s26  ;;  %v4314_v26 = vmul.f32 %v3640_v55, %v4224_v27  ;;  %v985_v27 = vld [vmem:[%s6127_s4 + $0x18] sm:$0xff] }
 0x231   : > { %v3379_v0 = vpack.c.bf16 %v4299_v20, %v4304_v25 }
 0x232   : > { %583 = vrot.lane.b32.xlu1 %v4294_v7, %s3917_s26  ;;  %v3377_v56 = vpack.c.bf16 %v4311_v24, %v4314_v26 }
 0x234   : > { %844 = vrot.lane.b32.xlu0 %v4311_v24, %s3917_s26 }
 0x236   : > { %834 = vrot.lane.b32.xlu1 %v4304_v25, %s3917_s26 }
 0x238   : > { %606 = vrot.lane.b32.xlu0 %v4238_v42, %s6136_s28 }
 0x23a   : > { %842 = vrot.lane.b32.xlu1 %v4314_v26, %s3917_s26 }
 0x23c   : > { %614 = vrot.lane.b32.xlu0 %v4244_v31, %s6136_s28 }
 0x23e   : > { %604 = vrot.lane.b32.xlu1 %v4227_v32, %s6136_s28 }
 0x240   : > { %864 = vrot.lane.b32.xlu0 %v4262_v60, %s6136_s28 }
 0x242   : > { %612 = vrot.lane.b32.xlu1 %v4241_v45, %s6136_s28 }
 0x244   : > { %872 = vrot.lane.b32.xlu0 %v4274_v40, %s6136_s28 }
 0x246   : > { %862 = vrot.lane.b32.xlu1 %v4255_v34, %s6136_s28 }
 0x248   : > { %610 = vrot.lane.b32.xlu0 %v4281_v12, %s6136_s28 }
 0x24a   : > { %870 = vrot.lane.b32.xlu1 %v4265_v61, %s6136_s28 }
 0x24c   : > { %618 = vrot.lane.b32.xlu0 %v4286_v14, %s6136_s28 }
 0x24e   : > { %608 = vrot.lane.b32.xlu1 %v4291_v17, %s6136_s28 }
 0x250   : > { %868 = vrot.lane.b32.xlu0 %v4299_v20, %s6136_s28 }
 0x252   : > { %616 = vrot.lane.b32.xlu1 %v4294_v7, %s6136_s28 }
 0x254   : > { %876 = vrot.lane.b32.xlu0 %v4311_v24, %s6136_s28 }
 0x256   : > { %866 = vrot.lane.b32.xlu1 %v4304_v25, %s6136_s28 }
 0x258   : > { %997 = vperm.xlu0 %3560, %v983_v3  }
 0x25a   : > { %874 = vrot.lane.b32.xlu1 %v4314_v26, %s6136_s28  ;;  %s3920_s28 = smov [#allocation7]  }
 0x25b   : > { %s3849_s17 = sshll.u32 %s3920_s28, 4  ;;  %s3850_s17 = int_to_ptr.vmem [resolvable:$false] %s3849_s17 }
 0x25c   : > { %1007 = vperm.xlu0 %3560, %v985_v27   ;;  %s3851_s22 = scalar_lea.vmem %s3850_s17, 8192 }
 0x25e   : > { %992 = vperm.xlu1 %3559, %v982_v4  }
 0x260   : > { %1027 = vperm.xlu0 %3560, %v989_v5  }
 0x262   : > { %1002 = vperm.xlu1 %3559, %v984_v28  }
 0x264   : > { %1017 = vperm.xlu0 %3560, %v987_v29  }
 0x266   : > { %1022 = vperm.xlu1 %3559, %v988_v35  }
 0x26a   : > { %1012 = vperm.xlu1 %3559, %v986_v36  }
 0x286   : > { %v572_v41 = vpop.permute.xlu1 %571 }
 0x28a   : > { %v580_v46 = vpop.permute.xlu1 %579  ;;  %v574_v48 = vpop.permute.xlu0 %573 }
 0x28b   : > { %v592_v49 = vsel %vm587_vm0, %v580_v46, %v572_v41  ;;  %v588_v54 = vsel %vm587_vm0, %v572_v41, %v580_v46 }
 0x28c   : > { %v596_v59 = vmul.f32 %v4392_v50, %v592_v49 }
 0x28e   : > { %v831_v51 = vpop.permute.xlu1 %830  ;;  %v582_v52 = vpop.permute.xlu0 %581 }
 0x28f   : > { %v593_v53 = vsel %vm587_vm0, %v582_v52, %v574_v48  ;;  %v589_v43 = vsel %vm587_vm0, %v574_v48, %v582_v52 }
 0x290   : > { %v3341_v44 = vpack.c.bf16 %v589_v43, %v588_v54  ;;  %v598_v38 = vmul.f32 %v4392_v50, %v593_v53  ;;  %v354_v53 = vadd.s32 128, %v4385_v39 }
 0x292   : > { %v839_v62 = vpop.permute.xlu1 %838  ;;  %3342 = vmatprep.subr.bf16.mxu0 %v3341_v44  ;;  %v833_v63 = vpop.permute.xlu0 %832  ;;  %v3343_v1 = vpack.c.bf16 %v598_v38, %v596_v59  ;;  %vm362_vm2 = vcmp.lt.s32.totalorder %v354_v53, 255  ;;  %v930_v53 = vld [vmem:[%s6126_s3 + $0x20] sm:$0xff] }
 0x293   : > { %v850_v2 = vsel %vm587_vm0, %v839_v62, %v831_v51  ;;  %v846_v10 = vsel %vm587_vm0, %v831_v51, %v839_v62  ;;  %v4447_v32 = vsel %vm362_vm2, 1.0, %v3918_v22 }
 0x294   : > { %3344 = vmatpush1.bf16.msra.mxu0 %v3343_v1  ;;  %v854_v30 = vmul.f32 %v4392_v50, %v850_v2  ;;  %6203 = vst [vmem:[#allocation12_spill] sm:$0xff] %v4447_v32 }
 0x296   : > { %v841_v6 = vpop.permute.xlu0 %840 }
 0x297   : > { %v851_v8 = vsel %vm587_vm0, %v841_v6, %v833_v63  ;;  %v847_v11 = vsel %vm587_vm0, %v833_v63, %v841_v6 }
 0x298   : > { %v3365_v58 = vpack.c.bf16 %v847_v11, %v846_v10  ;;  %v856_v13 = vmul.f32 %v4392_v50, %v851_v8 }
 0x29a   : > { %3366 = vmatprep.subr.bf16.mxu1 %v3365_v58  ;;  %v578_v15 = vpop.permute.xlu0 %577  ;;  %v3367_v16 = vpack.c.bf16 %v856_v13, %v854_v30 }
 0x29c   : > { %3368 = vmatpush1.bf16.msra.mxu1 %v3367_v16 }
 0x29e   : > { %v586_v18 = vpop.permute.xlu0 %585 }
 0x29f   : > { %v595_v3 = vsel %vm587_vm0, %v586_v18, %v578_v15  ;;  %v591_v4 = vsel %vm587_vm0, %v578_v15, %v586_v18 }
 0x2a0   : > { %v576_v19 = vpop.permute.xlu1 %575  ;;  %v602_v29 = vmul.f32 %v4392_v50, %v595_v3 }
 0x2a2   : > { %v837_v55 = vpop.permute.xlu0 %836 }
 0x2a4   : > { %v584_v27 = vpop.permute.xlu1 %583 }
 0x2a5   : > { %v590_v5 = vsel %vm587_vm0, %v576_v19, %v584_v27  ;;  %v594_v28 = vsel %vm587_vm0, %v584_v27, %v576_v19 }
 0x2a6   : > { %v600_v35 = vmul.f32 %v4392_v50, %v594_v28  ;;  %v845_v36 = vpop.permute.xlu0 %844  ;;  %v3345_v41 = vpack.c.bf16 %v591_v4, %v590_v5  ;;  %v926_v4 = vld [vmem:[%s6126_s3] sm:$0xff] }
 0x2a7   : > { %v853_v51 = vsel %vm587_vm0, %v845_v36, %v837_v55  ;;  %v849_v54 = vsel %vm587_vm0, %v837_v55, %v845_v36 }
 0x2a8   : > { %v835_v46 = vpop.permute.xlu1 %834  ;;  %3346 = vmatprep.subr.bf16.mxu0 %v3345_v41  ;;  %v3347_v48 = vpack.c.bf16 %v602_v29, %v600_v35  ;;  %v860_v59 = vmul.f32 %v4392_v50, %v853_v51  ;;  %v927_v41 = vld [vmem:[%s6126_s3 + $0x8] sm:$0xff]  ;;  %v928_v51 = vld [vmem:[%s6126_s3 + $0x10] sm:$0xff] }
 0x2aa   : > { %3348 = vmatpush1.bf16.msra.mxu0 %v3347_v48  ;;  %v607_v49 = vpop.permute.xlu0 %606 }
 0x2ab   : > { %3350 = vmatprep.subr.bf16.mxu0 %v3349_v23 }
 0x2ac   : > { %v843_v52 = vpop.permute.xlu1 %842 }
 0x2ad   : > { %v848_v43 = vsel %vm587_vm0, %v835_v46, %v843_v52  ;;  %v852_v44 = vsel %vm587_vm0, %v843_v52, %v835_v46  ;;  %v929_v52 = vld [vmem:[%s6126_s3 + $0x18] sm:$0xff] }
 0x2ae   : > { %v858_v38 = vmul.f32 %v4392_v50, %v852_v44  ;;  %3352 = vmatpush1.bf16.msra.mxu0 %v3351_v33  ;;  %v615_v45 = vpop.permute.xlu0 %614  ;;  %v3369_v31 = vpack.c.bf16 %v849_v54, %v848_v43  ;;  %v931_v54 = vld [vmem:[%s6126_s3 + $0x28] sm:$0xff]  ;;  %v932_v43 = vld [vmem:[%s6126_s3 + $0x30] sm:$0xff]  ;;  %v933_v44 = vld [vmem:[%s6126_s3 + $0x38] sm:$0xff] }
 0x2af   : > { %3354 = vmatprep.subr.bf16.mxu0 %v3353_v21  ;;  %v626_v42 = vsel %vm620_vm3, %v615_v45, %v607_v49  ;;  %v622_v61 = vsel %vm620_vm3, %v607_v49, %v615_v45 }
 0x2b0   : > { %v605_v23 = vpop.permute.xlu1 %604  ;;  %3370 = vmatprep.subr.bf16.mxu1 %v3369_v31  ;;  %v3371_v62 = vpack.c.bf16 %v860_v59, %v858_v38  ;;  %v632_v7 = vmul.f32 %v4447_v32, %v626_v42 }
 0x2b2   : > { %3356 = vmatpush1.bf16.msra.mxu0 %v3355_v9  ;;  %3372 = vmatpush1.bf16.msra.mxu1 %v3371_v62  ;;  %v865_v63 = vpop.permute.xlu0 %864 }
 0x2b3   : > { %3374 = vmatprep.subr.bf16.mxu1 %v3373_v57 }
 0x2b4   : > { %v613_v33 = vpop.permute.xlu1 %612 }
 0x2b5   : > { %v625_v14 = vsel %vm620_vm3, %v613_v33, %v605_v23  ;;  %v621_v12 = vsel %vm620_vm3, %v605_v23, %v613_v33 }
 0x2b6   : > { %v630_v17 = vmul.f32 %v4447_v32, %v625_v14  ;;  %3376 = vmatpush1.bf16.msra.mxu1 %v3375_v47  ;;  %v873_v9 = vpop.permute.xlu0 %872  ;;  %v3359_v21 = vpack.c.bf16 %v622_v61, %v621_v12 }
 0x2b7   : > { %3378 = vmatprep.subr.bf16.mxu1 %v3377_v56  ;;  %v883_v34 = vsel %vm620_vm3, %v873_v9, %v865_v63  ;;  %v879_v20 = vsel %vm620_vm3, %v865_v63, %v873_v9 }
 0x2b8   : > { %v863_v40 = vpop.permute.xlu1 %862  ;;  %v3357_v57 = vpack.c.bf16 %v632_v7, %v630_v17  ;;  %v889_v24 = vmul.f32 %v4447_v32, %v883_v34 }
 0x2ba   : > { %3358 = vmatprep.subr.bf16.mxu0 %v3357_v57  ;;  %3380 = vmatpush1.bf16.msra.mxu1 %v3379_v0  ;;  %v611_v1 = vpop.permute.xlu0 %610 }
 0x2bb   : > { %3360 = vmatpush1.bf16.msra.mxu0 %v3359_v21 }
 0x2bc   : > { %v871_v60 = vpop.permute.xlu1 %870 }
 0x2bd   : > { %v882_v47 = vsel %vm620_vm3, %v871_v60, %v863_v40  ;;  %v878_v26 = vsel %vm620_vm3, %v863_v40, %v871_v60 }
 0x2be   : > { %v887_v56 = vmul.f32 %v4447_v32, %v882_v47  ;;  %v619_v2 = vpop.permute.xlu0 %618  ;;  %v3383_v6 = vpack.c.bf16 %v879_v20, %v878_v26 }
 0x2bf   : > { %v628_v10 = vsel %vm620_vm3, %v619_v2, %v611_v1  ;;  %v624_v16 = vsel %vm620_vm3, %v611_v1, %v619_v2 }
 0x2c0   : > { %v609_v25 = vpop.permute.xlu1 %608  ;;  %v3381_v0 = vpack.c.bf16 %v889_v24, %v887_v56  ;;  %v636_v30 = vmul.f32 %v4447_v32, %v628_v10 }
 0x2c2   : > { %3382 = vmatprep.subr.bf16.mxu1 %v3381_v0  ;;  %v869_v8 = vpop.permute.xlu0 %868 }
 0x2c3   : > { %3384 = vmatpush1.bf16.msra.mxu1 %v3383_v6 }
 0x2c4   : > { %v617_v11 = vpop.permute.xlu1 %616 }
 0x2c5   : > { %v627_v58 = vsel %vm620_vm3, %v617_v11, %v609_v25  ;;  %v623_v13 = vsel %vm620_vm3, %v609_v25, %v617_v11 }
 0x2c6   : > { %v634_v15 = vmul.f32 %v4447_v32, %v627_v58  ;;  %v877_v18 = vpop.permute.xlu0 %876  ;;  %v3363_v3 = vpack.c.bf16 %v624_v16, %v623_v13 }
 0x2c7   : > { %v885_v27 = vsel %vm620_vm3, %v877_v18, %v869_v8  ;;  %v881_v46 = vsel %vm620_vm3, %v869_v8, %v877_v18 }
 0x2c8   : > { %v867_v19 = vpop.permute.xlu1 %866  ;;  %v3361_v55 = vpack.c.bf16 %v636_v30, %v634_v15  ;;  %v893_v29 = vmul.f32 %v4447_v32, %v885_v27 }
 0x2ca   : > { %3362 = vmatprep.subr.bf16.mxu0 %v3361_v55 }
 0x2cb   : > { %3364 = vmatpush1.bf16.msra.mxu0 %v3363_v3 }
 0x2cc   : > { %v875_v5 = vpop.permute.xlu1 %874 }
 0x2cd   : > { %v884_v28 = vsel %vm620_vm3, %v875_v5, %v867_v19  ;;  %v880_v35 = vsel %vm620_vm3, %v867_v19, %v875_v5 }
 0x2ce   : > { %v891_v36 = vmul.f32 %v4447_v32, %v884_v28  ;;  %3252 = vmatmul.mubr.msk.f32.vlgmr.msra.gmra.mrb[0].mxu0 %vm1030_vm4, %v926_v4  ;;  %v3387_v49 = vpack.c.bf16 %v881_v46, %v880_v35 }
 0x2cf   : > { %1125 = vmatprep.mubr.f32.mxu0 %v3918_v22 }
 0x2d0   : > { %v3385_v48 = vpack.c.bf16 %v893_v29, %v891_v36 }
 0x2d2   : > { %3253 = vmatmul.mubr.msk.f32.gmra.mrb[2].mxu0 %vm1030_vm4, %v927_v41  ;;  %3386 = vmatprep.subr.bf16.mxu1 %v3385_v48 }
 0x2d3   : > { %3388 = vmatpush1.bf16.msra.mxu1 %v3387_v49  ;;  %1131 = vmatprep.mubr.f32.mxu0 %v3918_v22 }
 0x2d6   : > { %3254 = vmatmul.mubr.msk.f32.gmra.mrb[4].mxu0 %vm1030_vm4, %v928_v51  ;;  %3260 = vmatmul.mubr.msk.f32.vlgmr.msra.gmra.mrb[0].mxu1 %vm1030_vm4, %v926_v4 }
 0x2d7   : > { %1137 = vmatprep.mubr.f32.mxu0 %v3918_v22  ;;  %1238 = vmatprep.mubr.f32.mxu1 %v3918_v22  ;;  %v998_v45 = vpop.permute.xlu0 %997 }
 0x2da   : > { %3255 = vmatmul.mubr.msk.f32.gmra.mrb[6].mxu0 %vm1030_vm4, %v929_v52  ;;  %3261 = vmatmul.mubr.msk.f32.gmra.mrb[2].mxu1 %vm1030_vm4, %v927_v41 }
 0x2db   : > { %1143 = vmatprep.mubr.f32.mxu0 %v3918_v22  ;;  %1244 = vmatprep.mubr.f32.mxu1 %v3918_v22  ;;  %v1008_v14 = vpop.permute.xlu0 %1007 }
 0x2dd   : > { %v993_v59 = vpop.permute.xlu1 %992 }
 0x2de   : > { %3256 = vmatmul.mubr.msk.f32.gmra.mrb[8].mxu0 %vm1030_vm4, %v930_v53  ;;  %3262 = vmatmul.mubr.msk.f32.gmra.mrb[4].mxu1 %vm1030_vm4, %v928_v51 }
 0x2df   : > { %1149 = vmatprep.mubr.f32.mxu0 %v3918_v22  ;;  %1250 = vmatprep.mubr.f32.mxu1 %v3918_v22  ;;  %v4575_v2 = vpop.permute.xlu0 %1027 }
 0x2e1   : > { %v1003_v7 = vpop.permute.xlu1 %1002 }
 0x2e2   : > { %3257 = vmatmul.mubr.msk.f32.gmra.mrb[10].mxu0 %vm1030_vm4, %v931_v54  ;;  %3263 = vmatmul.mubr.msk.f32.gmra.mrb[6].mxu1 %vm1030_vm4, %v929_v52 }
 0x2e3   : > { %1155 = vmatprep.mubr.f32.mxu0 %v3918_v22  ;;  %1256 = vmatprep.mubr.f32.mxu1 %v3918_v22  ;;  %v1018_v36 = vpop.permute.xlu0 %1017 }
 0x2e5   : > { %v1023_v20 = vpop.permute.xlu1 %1022 }
 0x2e6   : > { %3258 = vmatmul.mubr.msk.f32.gmra.mrb[12].mxu0 %vm1030_vm4, %v932_v43  ;;  %3264 = vmatmul.mubr.msk.f32.gmra.mrb[8].mxu1 %vm1030_vm4, %v930_v53 }
 0x2e7   : > { %1161 = vmatprep.mubr.f32.mxu0 %v3918_v22  ;;  %1262 = vmatprep.mubr.f32.mxu1 %v3918_v22 }
 0x2e9   : > { %v1013_v29 = vpop.permute.xlu1 %1012 }
 0x2ea   : > { %3259 = vmatmul.mubr.msk.f32.gmra.mrb[14].mxu0 %vm1030_vm4, %v933_v44  ;;  %3265 = vmatmul.mubr.msk.f32.gmra.mrb[10].mxu1 %vm1030_vm4, %v931_v54 }
 0x2eb   : > { %1268 = vmatprep.mubr.f32.mxu1 %v3918_v22 }
 0x2ee   : > { %3266 = vmatmul.mubr.msk.f32.gmra.mrb[12].mxu1 %vm1030_vm4, %v932_v43 }
 0x2ef   : > { %1274 = vmatprep.mubr.f32.mxu1 %v3918_v22 }
 0x2f2   : > { %3267 = vmatmul.mubr.msk.f32.gmra.mrb[14].mxu1 %vm1030_vm4, %v933_v44 }
 0x3a1   : > { %v1121_v38 = vpop.f32.mrb[0].mxu0 }
 0x3a2   : > { %v4555_v31 = vadd.f32 %v1121_v38, %v993_v59  ;;  %v1123_v23 = vpop.f32.mrb[1].mxu0 }
 0x3a3   : > { %v4557_v62 = vadd.f32 %v1123_v23, %v993_v59 }
 0x3a5   : > { %v1127_v63 = vpop.f32.mrb[2].mxu0  ;;  %v1281_v42 = vadd.f32 %v4557_v62, %v4555_v31 }
 0x3a6   : > { %v1129_v33 = vpop.f32.mrb[3].mxu0  ;;  %v4565_v57 = vadd.f32 %v1127_v63, %v998_v45 }
 0x3a7   : > { %1282 = vadd.xlane.f32.xlu1 %v1281_v42  ;;  %v4567_v21 = vadd.f32 %v1129_v33, %v998_v45 }
 0x3a9   : > { %v1133_v12 = vpop.f32.mrb[4].mxu0  ;;  %v1234_v22 = vpop.f32.mrb[0].mxu1  ;;  %v1284_v0 = vadd.f32 %v4567_v21, %v4565_v57 }
 0x3aa   : > { %v4561_v17 = vadd.f32 %v1234_v22, %v993_v59  ;;  %v1135_v9 = vpop.f32.mrb[5].mxu0  ;;  %v1236_v61 = vpop.f32.mrb[1].mxu1  ;;  %v4577_v25 = vadd.f32 %v1133_v12, %v1003_v7 }
 0x3ab   : > { %v4563_v40 = vadd.f32 %v1236_v61, %v993_v59  ;;  %v4581_v6 = vadd.f32 %v1135_v9, %v1003_v7 }
 0x3ad   : > { %v1139_v1 = vpop.f32.mrb[6].mxu0  ;;  %v1240_v34 = vpop.f32.mrb[2].mxu1  ;;  %v2052_v60 = vadd.f32 %v4563_v40, %v4561_v17  ;;  %v1287_v3 = vadd.f32 %v4581_v6, %v4577_v25 }
 0x3ae   : > { %v4571_v47 = vadd.f32 %v1240_v34, %v998_v45  ;;  %v1141_v24 = vpop.f32.mrb[7].mxu0  ;;  %v1242_v26 = vpop.f32.mrb[3].mxu1  ;;  %v4583_v8 = vadd.f32 %v1139_v1, %v1008_v14 }
 0x3af   : > { %v4573_v56 = vadd.f32 %v1242_v26, %v998_v45  ;;  %2053 = vadd.xlane.f32.xlu0 %v2052_v60  ;;  %v4585_v10 = vadd.f32 %v1141_v24, %v1008_v14 }
 0x3b1   : > { %v1145_v11 = vpop.f32.mrb[8].mxu0  ;;  %v1246_v58 = vpop.f32.mrb[4].mxu1  ;;  %v2055_v30 = vadd.f32 %v4573_v56, %v4571_v47  ;;  %v1290_v27 = vadd.f32 %v4585_v10, %v4583_v8 }
 0x3b2   : > { %v1147_v13 = vpop.f32.mrb[9].mxu0  ;;  %v1248_v15 = vpop.f32.mrb[5].mxu1  ;;  %v4589_v16 = vadd.f32 %v1246_v58, %v1003_v7  ;;  %v4601_v41 = vadd.f32 %v1145_v11, %v1013_v29 }
 0x3b3   : > { %2056 = vadd.xlane.f32.xlu1 %v2055_v30  ;;  %1285 = vadd.xlane.f32.xlu0 %v1284_v0  ;;  %v4591_v18 = vadd.f32 %v1248_v15, %v1003_v7  ;;  %v4603_v46 = vadd.f32 %v1147_v13, %v1013_v29 }
 0x3b5   : > { %v1151_v19 = vpop.f32.mrb[10].mxu0  ;;  %v1252_v55 = vpop.f32.mrb[6].mxu1  ;;  %v2058_v53 = vadd.f32 %v4591_v18, %v4589_v16  ;;  %v1293_v63 = vadd.f32 %v4603_v46, %v4601_v41 }
 0x3b6   : > { %v4597_v4 = vadd.f32 %v1252_v55, %v1008_v14  ;;  %v1153_v5 = vpop.f32.mrb[11].mxu0  ;;  %v1254_v28 = vpop.f32.mrb[7].mxu1  ;;  %v4605_v48 = vadd.f32 %v1151_v19, %v1018_v36 }
 0x3b7   : > { %v4599_v35 = vadd.f32 %v1254_v28, %v1008_v14  ;;  %1288 = vadd.xlane.f32.xlu0 %v1287_v3  ;;  %1291 = vadd.xlane.f32.xlu1 %v1290_v27  ;;  %v4607_v49 = vadd.f32 %v1153_v5, %v1018_v36 }
 0x3b9   : > { %v1157_v51 = vpop.f32.mrb[12].mxu0  ;;  %v1258_v52 = vpop.f32.mrb[8].mxu1  ;;  %v2061_v54 = vadd.f32 %v4599_v35, %v4597_v4  ;;  %v1296_v42 = vadd.f32 %v4607_v49, %v4605_v48 }
 0x3ba   : > { %v1159_v43 = vpop.f32.mrb[13].mxu0  ;;  %v1260_v44 = vpop.f32.mrb[9].mxu1  ;;  %v4613_v59 = vadd.f32 %v1157_v51, %v1023_v20  ;;  %v4635_v24 = vadd.f32 %v1258_v52, %v1013_v29 }
 0x3bb   : > { %2059 = vadd.xlane.f32.xlu0 %v2058_v53  ;;  %2062 = vadd.xlane.f32.xlu1 %v2061_v54  ;;  %v4615_v38 = vadd.f32 %v1159_v43, %v1023_v20  ;;  %v4637_v26 = vadd.f32 %v1260_v44, %v1013_v29 }
 0x3bc   : > { %6204 = vst [vmem:[#allocation13_spill] sm:$0xff] %v4613_v59 }
 0x3bd   : > { %6205 = vst [vmem:[#allocation14_spill] sm:$0xff] %v4615_v38  ;;  %v1163_v45 = vpop.f32.mrb[14].mxu0  ;;  %v1264_v23 = vpop.f32.mrb[10].mxu1  ;;  %v1299_v9 = vadd.f32 %v4615_v38, %v4613_v59  ;;  %v2064_v19 = vadd.f32 %v4637_v26, %v4635_v24 }
 0x3be   : > { %v4622_v33 = vadd.f32 %v1163_v45, %v4575_v2  ;;  %v1165_v14 = vpop.f32.mrb[15].mxu0  ;;  %v1266_v7 = vpop.f32.mrb[11].mxu1  ;;  %v6214_v45 = vmov 0 }
 0x3bf   : > { %v4625_v12 = vadd.f32 %v1165_v14, %v4575_v2  ;;  %1294 = vadd.xlane.f32.xlu0 %v1293_v63  ;;  %1297 = vadd.xlane.f32.xlu1 %v1296_v42  ;;  %v4649_v15 = vadd.f32 %v1266_v7, %v1018_v36 }
 0x3c0   : > { %6206 = vst [vmem:[#allocation15_spill] sm:$0xff] %v4622_v33 }
 0x3c1   : > { %6207 = vst [vmem:[#allocation16_spill] sm:$0xff] %v4625_v12  ;;  %v1270_v22 = vpop.f32.mrb[12].mxu1  ;;  %v1302_v61 = vadd.f32 %v4625_v12, %v4622_v33  ;;  %6213 = vst [vmem:[#allocation22_spill] sm:$0xff] %v4649_v15 }
 0x3c2   : > { %v4631_v1 = vadd.f32 %v1270_v22, %v1023_v20  ;;  %v1272_v34 = vpop.f32.mrb[13].mxu1 }
 0x3c3   : > { %v4633_v60 = vadd.f32 %v1272_v34, %v1023_v20  ;;  %1300 = vadd.xlane.f32.xlu0 %v1299_v9  ;;  %1303 = vadd.xlane.f32.xlu1 %v1302_v61  ;;  %v4647_v20 = vadd.f32 %v1264_v23, %v1018_v36  ;;  %v6217_v9 = vmov 0 }
 0x3c4   : > { %6208 = vst [vmem:[#allocation17_spill] sm:$0xff] %v4631_v1 }
 0x3c5   : > { %6209 = vst [vmem:[#allocation18_spill] sm:$0xff] %v4633_v60  ;;  %v1276_v0 = vpop.f32.mrb[14].mxu1  ;;  %v2070_v11 = vadd.f32 %v4633_v60, %v4631_v1  ;;  %6212 = vst [vmem:[#allocation21_spill] sm:$0xff] %v4647_v20  ;;  %v2067_v3 = vadd.f32 %v4649_v15, %v4647_v20 }
 0x3c6   : > { %v4642_v58 = vadd.f32 %v1276_v0, %v4575_v2  ;;  %v1278_v30 = vpop.f32.mrb[15].mxu1 }
 0x3c7   : > { %v4645_v13 = vadd.f32 %v1278_v30, %v4575_v2  ;;  %2071 = vadd.xlane.f32.xlu0 %v2070_v11  ;;  %v4658_v2 = vshrl.u32 %v352_v37, 7 }
 0x3c8   : > { %6210 = vst [vmem:[#allocation19_spill] sm:$0xff] %v4642_v58 }
 0x3c9   : > { %6211 = vst [vmem:[#allocation20_spill] sm:$0xff] %v4645_v13  ;;  %v2073_v55 = vadd.f32 %v4645_v13, %v4642_v58  ;;  %v1307_v28 = vadd.s32 8, %v4658_v2  ;;  %v1308_v29 = vadd.s32 16, %v4658_v2  ;;  %vm1322_vm5 = vcmp.lt.s32.totalorder %v4658_v2, 1 }
 0x3ca   : > { %v1310_v23 = vadd.s32 32, %v4658_v2  ;;  %vm1339_vm7 = vcmp.lt.s32.totalorder %v4658_v2, 7  ;;  %v1309_v61 = vadd.s32 24, %v4658_v2 }
 0x3cb   : > { %2065 = vadd.xlane.f32.xlu0 %v2064_v19  ;;  %2074 = vadd.xlane.f32.xlu1 %v2073_v55  ;;  %v1359_v52 = vand.u32 1, %v1307_v28  ;;  %v1366_v53 = vand.u32 1, %v1308_v29 }
 0x3cc   : > { %v1373_v32 = vand.u32 1, %v1309_v61 }
 0x3cd   : > { %vm4675_vm6 = vcmp.eq.s32.totalorder %v1359_v52, 0  ;;  %vm4684_vm8 = vcmp.eq.s32.totalorder %v1366_v53, 0  ;;  %v1380_v52 = vand.u32 1, %v1310_v23 }
 0x3ce   : > { %v6215_v45 = vsel %vm4675_vm6, 4294967295, %v6214_v45  ;;  %v6218_v9 = vsel %vm4684_vm8, 4294967295, %v6217_v9  ;;  %vm4748_vm10 = vcmp.eq.s32.totalorder %v1373_v32, 0 }
 0x3cf   : > { %2068 = vadd.xlane.f32.xlu1 %v2067_v3  ;;  %6216 = vst [vmem:[#allocation23_spill] sm:$0xff] %v6215_v45  ;;  %6219 = vst [vmem:[#allocation24_spill] sm:$0xff] %v6218_v9  ;;  %vm4738_vm9 = vcmp.eq.s32.totalorder %v1380_v52, 0 }
 0x434   : > { %v4660_v27 = vpop.xlane.xlu1 %1282 }
 0x435   : > { %v6139_v43 = vrot.slane %v4660_v27, 7  ;;  %v1331_v33 = vrot.slane %v4660_v27, 1 }
 0x43c   : > { %v4662_v5 = vpop.xlane.xlu0 %2053 }
 0x43d   : > { %v6142_v19 = vrot.slane %v4662_v5, 7 }
 0x440   : > { %v4666_v36 = vpop.xlane.xlu1 %2056  ;;  %v4668_v51 = vpop.xlane.xlu0 %1285 }
 0x441   : > { %v1315_v54 = vrot.slane %v4668_v51, 7  ;;  %v6138_v63 = vrot.slane %v4668_v51, 1  ;;  %v2077_v22 = vrot.slane %v4666_v36, 7  ;;  %v6220_v23 = vrot.slane %v4666_v36, 1 }
 0x443   : > { %v1329_v34 = vsel %vm1322_vm5, %v6139_v43, %v1315_v54  ;;  %v2090_v55 = vsel %vm1322_vm5, %v6142_v19, %v2077_v22 }
 0x444   : > { %v4672_v37 = vpop.xlane.xlu1 %1291  ;;  %v1289_v44 = vpop.xlane.xlu0 %1288 }
 0x445   : > { %v1334_v42 = vrot.slane %v4672_v37, 1  ;;  %v1316_v14 = vrot.slane %v1289_v44, 7  ;;  %v1333_v7 = vrot.slane %v1289_v44, 1 }
 0x447   : > { %v1345_v0 = vsel %vm1339_vm7, %v6138_v63, %v1333_v7  ;;  %v1328_v11 = vsel %vm1322_vm5, %v1315_v54, %v1316_v14  ;;  %v1344_v30 = vsel %vm1339_vm7, %v1333_v7, %v1334_v42 }
 0x448   : > { %v4703_v3 = vpop.xlane.xlu1 %2062  ;;  %v4705_v28 = vpop.xlane.xlu0 %2059  ;;  %v1453_v29 = vsel %vm4675_vm6, %v1345_v0, %v1329_v34  ;;  %v1454_v7 = vsel %vm4684_vm8, %v1344_v30, %v1328_v11  ;;  %v1317_v34 = vrot.slane %v4672_v37, 7 }
 0x449   : > { %v6150_v53 = vrot.slane %v4703_v3, 1  ;;  %v6147_v63 = vrot.slane %v4705_v28, 7  ;;  %v2094_v54 = vrot.slane %v4705_v28, 1  ;;  %v1461_v43 = vadd.f32 %v1453_v29, %v4668_v51 }
 0x44a   : > { %v1462_v50 = vadd.f32 %v1454_v7, %v1289_v44  ;;  %v6223_v44 = vmov 0  ;;  %v1327_v7 = vsel %vm1322_vm5, %v1316_v14, %v1317_v34  ;;  %v1311_v14 = vadd.s32 40, %v4658_v2 }
 0x44b   : > { %v2105_v0 = vsel %vm1339_vm7, %v6220_v23, %v2094_v54  ;;  %v2089_v11 = vsel %vm1322_vm5, %v2077_v22, %v6147_v63  ;;  %v2104_v30 = vsel %vm1339_vm7, %v2094_v54, %v6150_v53  ;;  %v1469_v19 = vmul.f32 0.001953125, %v1461_v43 }
 0x44c   : > { %v4732_v29 = vpop.xlane.xlu1 %1297  ;;  %v4734_v61 = vpop.xlane.xlu0 %1294  ;;  %v2109_v39 = vsel %vm4675_vm6, %v2105_v0, %v2090_v55  ;;  %v2110_v54 = vsel %vm4684_vm8, %v2104_v30, %v2089_v11  ;;  %v6224_v44 = vsel %vm4748_vm10, 4294967295, %v6223_v44 }
 0x44d   : > { %v1336_v22 = vrot.slane %v4732_v29, 1  ;;  %v6149_v63 = vrot.slane %v4734_v61, 7  ;;  %v1335_v60 = vrot.slane %v4734_v61, 1  ;;  %1483 = vperm.xlu1 %3559, %v1469_v19   ;;  %v2117_v43 = vadd.f32 %v2109_v39, %v4666_v36  ;;  %6225 = vst [vmem:[#allocation25_spill] sm:$0xff] %v6224_v44 }
 0x44e   : > { %v1470_v39 = vmul.f32 0.001953125, %v1462_v50  ;;  %v2118_v11 = vadd.f32 %v2110_v54, %v4705_v28 }
 0x44f   : > { %v1326_v55 = vsel %vm1322_vm5, %v1317_v34, %v6149_v63  ;;  %v1342_v52 = vsel %vm1339_vm7, %v1335_v60, %v1336_v22  ;;  %v1343_v19 = vsel %vm1339_vm7, %v1334_v42, %v1335_v60  ;;  %v2125_v32 = vmul.f32 0.001953125, %v2117_v43 }
 0x450   : > { %v4762_v0 = vpop.xlane.xlu0 %1300  ;;  %v1456_v30 = vsel %vm4738_vm9, %v1342_v52, %v1326_v55  ;;  %v1455_v63 = vsel %vm4748_vm10, %v1343_v19, %v1327_v7  ;;  %v4771_v34 = vpop.xlane.xlu1 %1303  ;;  %v2126_v50 = vmul.f32 0.001953125, %v2118_v11  ;;  %v1313_v43 = vadd.s32 56, %v4658_v2 }
 0x451   : > { %1488 = vperm.xlu1 %3559, %v1470_v39   ;;  %2139 = vperm.xlu0 %3560, %v2125_v32   ;;  %v1464_v53 = vadd.f32 %v1456_v30, %v4734_v61  ;;  %v1463_v54 = vadd.f32 %v1455_v63, %v4672_v37  ;;  %v1387_v55 = vand.u32 1, %v1311_v14  ;;  %v1352_v52 = vand.u32 1, %v4658_v2 }
 0x452   : > { %v2079_v7 = vrot.slane %v4703_v3, 7  ;;  %v2092_v19 = vrot.slane %v4662_v5, 1  ;;  %v1401_v45 = vand.u32 1, %v1313_v43  ;;  %v1312_v11 = vadd.s32 48, %v4658_v2  ;;  %v375_v2 = vld [vmem:[%s6128_s5] sm:$0xff] }
 0x453   : > { %v1472_v42 = vmul.f32 0.001953125, %v1464_v53  ;;  %v1471_v30 = vmul.f32 0.001953125, %v1463_v54  ;;  %v6226_v14 = vrot.slane %v4666_v36, 1  ;;  %vm4790_vm11 = vcmp.eq.s32.totalorder %v1387_v55, 0 }
 0x454   : > { %v4773_v60 = vpop.xlane.xlu0 %2071  ;;  %vm4794_vm12 = vcmp.eq.s32.totalorder %v1352_v52, 0  ;;  %v6231_v43 = vrot.slane %v4705_v28, 7  ;;  %v1319_v36 = vrot.slane %v4732_v29, 7  ;;  %v6233_v55 = vrot.slane %v4703_v3, 1 }
 0x455   : > { %2144 = vperm.xlu1 %3559, %v2126_v50   ;;  %1498 = vperm.xlu0 %3560, %v1472_v42   ;;  %v2106_v50 = vsel %vm1339_vm7, %v2092_v19, %v6226_v14  ;;  %v1321_v42 = vrot.slane %v4771_v34, 7  ;;  %v6232_v14 = vrot.slane %v4662_v5, 7  ;;  %vm4815_vm13 = vcmp.eq.s32.totalorder %v1401_v45, 0 }
 0x456   : > { %v2088_v53 = vsel %vm1322_vm5, %v6231_v43, %v2079_v7  ;;  %v6236_v13 = vrot.slane %v4762_v0, 1  ;;  %v6237_v45 = vrot.slane %v4660_v27, 7 }
 0x458   : > { %v4780_v39 = vpop.xlane.xlu1 %2074  ;;  %v2066_v32 = vpop.xlane.xlu0 %2065 }
 0x459   : > { %v2083_v37 = vrot.slane %v4780_v39, 7  ;;  %v2096_v63 = vrot.slane %v2066_v32, 1  ;;  %1493 = vperm.xlu1 %3559, %v1471_v30   ;;  %v2080_v1 = vrot.slane %v2066_v32, 7 }
 0x45b   : > { %v2091_v30 = vsel %vm1322_vm5, %v2083_v37, %v6232_v14  ;;  %v2103_v52 = vsel %vm1339_vm7, %v6233_v55, %v2096_v63  ;;  %v1341_v14 = vsel %vm1339_vm7, %v1336_v22, %v6236_v13  ;;  %v2098_v22 = vrot.slane %v4773_v60, 1 }
 0x45c   : > { %v2069_v38 = vpop.xlane.xlu1 %2068  ;;  %v2111_v28 = vsel %vm4748_vm10, %v2103_v52, %v2088_v53  ;;  %v2108_v43 = vsel %vm4794_vm12, %v2106_v50, %v2091_v30  ;;  %v1338_v53 = vrot.slane %v4771_v34, 1  ;;  %v1320_v52 = vrot.slane %v4762_v0, 7 }
 0x45d   : > { %v2081_v58 = vrot.slane %v2069_v38, 7  ;;  %v2097_v12 = vrot.slane %v2069_v38, 1  ;;  %v2119_v55 = vadd.f32 %v2111_v28, %v4703_v3  ;;  %v1330_v50 = vsel %vm1322_vm5, %v1321_v42, %v6237_v45 }
 0x45e   : > { %v6238_v30 = vrot.slane %v4734_v61, 7  ;;  %v2116_v3 = vadd.f32 %v2108_v43, %v4662_v5  ;;  %v2087_v28 = vsel %vm1322_vm5, %v2079_v7, %v2080_v1  ;;  %v6239_v45 = vrot.slane %v4668_v51, 1 }
 0x45f   : > { %v2127_v44 = vmul.f32 0.001953125, %v2119_v55  ;;  %v2102_v15 = vsel %vm1339_vm7, %v2096_v63, %v2097_v12  ;;  %v2101_v5 = vsel %vm1339_vm7, %v2097_v12, %v2098_v22  ;;  %v2099_v43 = vrot.slane %v4780_v39, 1 }
 0x460   : > { %v1325_v13 = vsel %vm1322_vm5, %v6238_v30, %v1319_v36  ;;  %v1346_v61 = vsel %vm1339_vm7, %v1331_v33, %v6239_v45  ;;  %v2086_v30 = vsel %vm1322_vm5, %v2080_v1, %v2081_v58  ;;  %v2112_v7 = vsel %vm4738_vm9, %v2102_v15, %v2087_v28 }
 0x461   : > { %v1457_v20 = vsel %vm4790_vm11, %v1341_v14, %v1325_v13  ;;  %2149 = vperm.xlu1 %3559, %v2127_v44   ;;  %v1452_v63 = vsel %vm4794_vm12, %v1346_v61, %v1330_v50  ;;  %v2120_v14 = vadd.f32 %v2112_v7, %v2066_v32  ;;  %v1323_v51 = vsel %vm1322_vm5, %v1320_v52, %v1321_v42 }
 0x462   : > { %v1347_v55 = vsel %vm1339_vm7, %v1338_v53, %v1331_v33  ;;  %v2124_v1 = vmul.f32 0.001953125, %v2116_v3  ;;  %v1465_v13 = vadd.f32 %v1457_v20, %v4732_v29  ;;  %v2082_v12 = vrot.slane %v4773_v60, 7 }
 0x463   : > { %v2113_v15 = vsel %vm4790_vm11, %v2101_v5, %v2086_v30  ;;  %v2128_v44 = vmul.f32 0.001953125, %v2120_v14  ;;  %v1460_v50 = vadd.f32 %v1452_v63, %v4660_v27  ;;  %v1459_v32 = vsel %vm4815_vm13, %v1347_v55, %v1323_v51 }
 0x464   : > { %v2084_v42 = vsel %vm1322_vm5, %v2082_v12, %v2083_v37  ;;  %v2107_v33 = vsel %vm1339_vm7, %v2099_v43, %v2092_v19  ;;  %v1394_v20 = vand.u32 1, %v1312_v11  ;;  %v2121_v29 = vadd.f32 %v2113_v15, %v2069_v38 }
 0x465   : > { %2134 = vperm.xlu1 %3559, %v2124_v1   ;;  %2154 = vperm.xlu0 %3560, %v2128_v44   ;;  %v1473_v3 = vmul.f32 0.001953125, %v1465_v13  ;;  %v1468_v28 = vmul.f32 0.001953125, %v1460_v50  ;;  %v1467_v45 = vadd.f32 %v1459_v32, %v4771_v34  ;;  %v2115_v27 = vsel %vm4815_vm13, %v2107_v33, %v2084_v42 }
 0x466   : > { %v1324_v61 = vsel %vm1322_vm5, %v1319_v36, %v1320_v52  ;;  %v6240_v30 = vrot.slane %v4762_v0, 1  ;;  %vm4880_vm14 = vcmp.eq.s32.totalorder %v1394_v20, 0  ;;  %v2129_v38 = vmul.f32 0.001953125, %v2121_v29 }
 0x467   : > { %v1475_v11 = vmul.f32 0.001953125, %v1467_v45  ;;  %v2123_v34 = vadd.f32 %v2115_v27, %v4780_v39  ;;  %v2085_v36 = vsel %vm1322_vm5, %v2081_v58, %v2082_v12 }
 0x468   : > { %v1340_v37 = vsel %vm1339_vm7, %v6240_v30, %v1338_v53  ;;  %v2100_v53 = vsel %vm1339_vm7, %v2098_v22, %v2099_v43 }
 0x469   : > { %1503 = vperm.xlu1 %3559, %v1473_v3   ;;  %1478 = vperm.xlu0 %3560, %v1468_v28   ;;  %v1458_v5 = vsel %vm4880_vm14, %v1340_v37, %v1324_v61  ;;  %v2131_v52 = vmul.f32 0.001953125, %v2123_v34  ;;  %v2114_v63 = vsel %vm4880_vm14, %v2100_v53, %v2085_v36 }
 0x46a   : > { %v1466_v7 = vadd.f32 %v1458_v5, %v4762_v0  ;;  %v2122_v39 = vadd.f32 %v2114_v63, %v4773_v60 }
 0x46c   : > { %v1474_v14 = vmul.f32 0.001953125, %v1466_v7  ;;  %v2130_v51 = vmul.f32 0.001953125, %v2122_v39 }
 0x46d   : > { %2159 = vperm.xlu1 %3559, %v2129_v38   ;;  %1513 = vperm.xlu0 %3560, %v1475_v11  }
 0x471   : > { %2169 = vperm.xlu0 %3560, %v2131_v52  }
 0x475   : > { %1508 = vperm.xlu0 %3560, %v1474_v14  }
 0x479   : > { %2164 = vperm.xlu0 %3560, %v2130_v51  }
 0x4cc   : > { %v1484_v55 = vpop.permute.xlu1 %1483 }
 0x4cd   : > { %v4896_v1 = vsub.f32 %v4565_v57, %v1484_v55  ;;  %v4899_v58 = vsub.f32 %v4567_v21, %v1484_v55 }
 0x4cf   : > { %v1534_v0 = vmul.f32 %v4896_v1, %v4896_v1  ;;  %v1535_v22 = vmul.f32 %v4899_v58, %v4899_v58 }
 0x4d0   : > { %v1489_v43 = vpop.permute.xlu1 %1488  ;;  %v2140_v13 = vpop.permute.xlu0 %2139 }
 0x4d1   : > { %v4906_v60 = vsub.f32 %v4577_v25, %v1489_v43  ;;  %v4909_v12 = vsub.f32 %v4581_v6, %v1489_v43  ;;  %v4912_v57 = vsub.f32 %v4571_v47, %v2140_v13  ;;  %v4915_v21 = vsub.f32 %v4573_v56, %v2140_v13 }
 0x4d2   : > { %v1551_v15 = vadd.f32 %v1535_v22, %v1534_v0 }
 0x4d3   : > { %v2190_v44 = vmul.f32 %v4912_v57, %v4912_v57  ;;  %v2191_v50 = vmul.f32 %v4915_v21, %v4915_v21  ;;  %v1536_v25 = vmul.f32 %v4906_v60, %v4906_v60  ;;  %v1537_v6 = vmul.f32 %v4909_v12, %v4909_v12 }
 0x4d4   : > { %1552 = vadd.xlane.f32.xlu0 %v1551_v15  ;;  %v2145_v32 = vpop.permute.xlu1 %2144  ;;  %v1499_v47 = vpop.permute.xlu0 %1498 }
 0x4d5   : > { %v4926_v42 = vsub.f32 %v4589_v16, %v2145_v32  ;;  %v4929_v56 = vsub.f32 %v4591_v18, %v2145_v32  ;;  %v4932_v33 = vsub.f32 %v4601_v41, %v1499_v47  ;;  %v4935_v20 = vsub.f32 %v4603_v46, %v1499_v47 }
 0x4d6   : > { %v1554_v29 = vadd.f32 %v1537_v6, %v1536_v25  ;;  %v2207_v3 = vadd.f32 %v2191_v50, %v2190_v44  ;;  %v6247_v25 = vld [vmem:[#allocation21_spill] sm:$0xff] }
 0x4d7   : > { %v2192_v28 = vmul.f32 %v4926_v42, %v4926_v42  ;;  %v2193_v45 = vmul.f32 %v4929_v56, %v4929_v56  ;;  %v1540_v16 = vmul.f32 %v4932_v33, %v4932_v33  ;;  %v1541_v18 = vmul.f32 %v4935_v20, %v4935_v20 }
 0x4d8   : > { %1555 = vadd.xlane.f32.xlu0 %v1554_v29  ;;  %2208 = vadd.xlane.f32.xlu1 %v2207_v3  ;;  %v1494_v41 = vpop.permute.xlu1 %1493  ;;  %v6249_v3 = vld [vmem:[#allocation15_spill] sm:$0xff] }
 0x4d9   : > { %v4946_v46 = vsub.f32 %v4583_v8, %v1494_v41  ;;  %v4949_v27 = vsub.f32 %v4585_v10, %v1494_v41  ;;  %v2210_v61 = vadd.f32 %v2193_v45, %v2192_v28  ;;  %v1560_v30 = vadd.f32 %v1541_v18, %v1540_v16  ;;  %v6250_v45 = vld [vmem:[#allocation16_spill] sm:$0xff] }
 0x4db   : > { %v1538_v37 = vmul.f32 %v4946_v46, %v4946_v46  ;;  %v1539_v38 = vmul.f32 %v4949_v27, %v4949_v27 }
 0x4dc   : > { %2211 = vadd.xlane.f32.xlu0 %v2210_v61  ;;  %1561 = vadd.xlane.f32.xlu1 %v1560_v30 }
 0x4dd   : > { %v1557_v11 = vadd.f32 %v1539_v38, %v1538_v37 }
 0x4e0   : > { %v2150_v34 = vpop.permute.xlu1 %2149  ;;  %1558 = vadd.xlane.f32.xlu0 %v1557_v11 }
 0x4e1   : > { %v4956_v5 = vsub.f32 %v4597_v4, %v2150_v34  ;;  %v4959_v8 = vsub.f32 %v4599_v35, %v2150_v34  ;;  %v6251_v34 = vld [vmem:[#allocation19_spill] sm:$0xff] }
 0x4e3   : > { %v2194_v10 = vmul.f32 %v4956_v5, %v4956_v5  ;;  %v2195_v36 = vmul.f32 %v4959_v8, %v4959_v8 }
 0x4e4   : > { %v2135_v52 = vpop.permute.xlu1 %2134  ;;  %v2155_v63 = vpop.permute.xlu0 %2154 }
 0x4e5   : > { %v4966_v7 = vsub.f32 %v4561_v17, %v2135_v52  ;;  %v4969_v53 = vsub.f32 %v4563_v40, %v2135_v52  ;;  %v2213_v14 = vadd.f32 %v2195_v36, %v2194_v10  ;;  %v4972_v4 = vsub.f32 %v4635_v24, %v2155_v63  ;;  %v6253_v36 = vld [vmem:[#allocation20_spill] sm:$0xff] }
 0x4e6   : > { %v4975_v35 = vsub.f32 %v4637_v26, %v2155_v63 }
 0x4e7   : > { %6243 = vst [vmem:[#allocation26_spill] sm:$0xff] %v4966_v7  ;;  %6244 = vst [vmem:[#allocation27_spill] sm:$0xff] %v4969_v53  ;;  %v2188_v39 = vmul.f32 %v4966_v7, %v4966_v7  ;;  %v2189_v51 = vmul.f32 %v4969_v53, %v4969_v53  ;;  %2214 = vadd.xlane.f32.xlu0 %v2213_v14  ;;  %v2196_v17 = vmul.f32 %v4972_v4, %v4972_v4 }
 0x4e8   : > { %v2197_v40 = vmul.f32 %v4975_v35, %v4975_v35  ;;  %v1504_v55 = vpop.permute.xlu1 %1503  ;;  %v1479_v0 = vpop.permute.xlu0 %1478 }
 0x4e9   : > { %v4986_v24 = vsub.f32 %v4605_v48, %v1504_v55  ;;  %v4989_v26 = vsub.f32 %v4607_v49, %v1504_v55  ;;  %v2204_v22 = vadd.f32 %v2189_v51, %v2188_v39  ;;  %v4992_v43 = vsub.f32 %v4555_v31, %v1479_v0  ;;  %v6256_v55 = vld [vmem:[#allocation14_spill] sm:$0xff] }
 0x4ea   : > { %v4995_v13 = vsub.f32 %v4557_v62, %v1479_v0  ;;  %v2216_v15 = vadd.f32 %v2197_v40, %v2196_v17  ;;  %v6248_v62 = vld [vmem:[#allocation22_spill] sm:$0xff]  ;;  %v6255_v17 = vld [vmem:[#allocation13_spill] sm:$0xff] }
 0x4eb   : > { %6245 = vst [vmem:[#allocation28_spill] sm:$0xff] %v4992_v43  ;;  %v1542_v44 = vmul.f32 %v4986_v24, %v4986_v24  ;;  %v1543_v50 = vmul.f32 %v4989_v26, %v4989_v26  ;;  %2205 = vadd.xlane.f32.xlu0 %v2204_v22  ;;  %v1532_v48 = vmul.f32 %v4992_v43, %v4992_v43 }
 0x4ec   : > { %6246 = vst [vmem:[#allocation29_spill] sm:$0xff] %v4995_v13  ;;  %v1533_v49 = vmul.f32 %v4995_v13, %v4995_v13  ;;  %2217 = vadd.xlane.f32.xlu1 %v2216_v15  ;;  %v2160_v31 = vpop.permute.xlu1 %2159  ;;  %v1514_v47 = vpop.permute.xlu0 %1513 }
 0x4ed   : > { %v5006_v6 = vsub.f32 %v6247_v25, %v2160_v31  ;;  %v5009_v32 = vsub.f32 %v6248_v62, %v2160_v31  ;;  %v1563_v29 = vadd.f32 %v1543_v50, %v1542_v44  ;;  %v5012_v28 = vsub.f32 %v6249_v3, %v1514_v47  ;;  %v6259_v31 = vld [vmem:[#allocation18_spill] sm:$0xff] }
 0x4ee   : > { %v5015_v16 = vsub.f32 %v6250_v45, %v1514_v47  ;;  %v1548_v18 = vadd.f32 %v1533_v49, %v1532_v48  ;;  %v6257_v48 = vld [vmem:[#allocation17_spill] sm:$0xff]  ;;  %v384_v45 = vld [vmem:[%s6129_s6 + $0x8] sm:$0xff] }
 0x4ef   : > { %v2198_v41 = vmul.f32 %v5006_v6, %v5006_v6  ;;  %v2199_v61 = vmul.f32 %v5009_v32, %v5009_v32  ;;  %1564 = vadd.xlane.f32.xlu0 %v1563_v29  ;;  %v1546_v30 = vmul.f32 %v5012_v28, %v5012_v28 }
 0x4f0   : > { %v1547_v37 = vmul.f32 %v5015_v16, %v5015_v16  ;;  %1549 = vadd.xlane.f32.xlu1 %v1548_v18  ;;  %v2170_v38 = vpop.permute.xlu0 %2169  ;;  %v386_v18 = vld [vmem:[%s6129_s6 + $0x18] sm:$0xff] }
 0x4f1   : > { %v2219_v11 = vadd.f32 %v2199_v61, %v2198_v41  ;;  %v5026_v10 = vsub.f32 %v6251_v34, %v2170_v38  ;;  %v5029_v52 = vsub.f32 %v6253_v36, %v2170_v38  ;;  %v383_v41 = vld [vmem:[%s6129_s6] sm:$0xff]  ;;  %v388_v61 = vld [vmem:[%s6129_s6 + $0x28] sm:$0xff] }
 0x4f2   : > { %v1569_v63 = vadd.f32 %v1547_v37, %v1546_v30  ;;  %v385_v30 = vld [vmem:[%s6129_s6 + $0x10] sm:$0xff]  ;;  %v387_v37 = vld [vmem:[%s6129_s6 + $0x20] sm:$0xff] }
 0x4f3   : > { %6252 = vst [vmem:[#allocation21_spill] sm:$0xff] %v5026_v10  ;;  %6254 = vst [vmem:[#allocation22_spill] sm:$0xff] %v5029_v52  ;;  %2220 = vadd.xlane.f32.xlu0 %v2219_v11  ;;  %v2202_v14 = vmul.f32 %v5026_v10, %v5026_v10  ;;  %v2203_v39 = vmul.f32 %v5029_v52, %v5029_v52 }
 0x4f4   : > { %1570 = vadd.xlane.f32.xlu1 %v1569_v63  ;;  %v1509_v51 = vpop.permute.xlu0 %1508 }
 0x4f5   : > { %v5036_v40 = vsub.f32 %v6255_v17, %v1509_v51  ;;  %v5039_v0 = vsub.f32 %v6256_v55, %v1509_v51  ;;  %v2225_v22 = vadd.f32 %v2203_v39, %v2202_v14 }
 0x4f7   : > { %v1544_v15 = vmul.f32 %v5036_v40, %v5036_v40  ;;  %v1545_v44 = vmul.f32 %v5039_v0, %v5039_v0 }
 0x4f8   : > { %2226 = vadd.xlane.f32.xlu1 %v2225_v22  ;;  %v2165_v50 = vpop.permute.xlu0 %2164 }
 0x4f9   : > { %v5046_v49 = vsub.f32 %v6257_v48, %v2165_v50  ;;  %v5049_v25 = vsub.f32 %v6259_v31, %v2165_v50  ;;  %v1566_v62 = vadd.f32 %v1545_v44, %v1544_v15 }
 0x4fb   : > { %6258 = vst [vmem:[#allocation15_spill] sm:$0xff] %v5046_v49  ;;  %6260 = vst [vmem:[#allocation16_spill] sm:$0xff] %v5049_v25  ;;  %v2200_v47 = vmul.f32 %v5046_v49, %v5046_v49  ;;  %v2201_v29 = vmul.f32 %v5049_v25, %v5049_v25 }
 0x4fc   : > { %1567 = vadd.xlane.f32.xlu1 %v1566_v62 }
 0x4fd   : > { %v2222_v3 = vadd.f32 %v2201_v29, %v2200_v47 }
 0x500   : > { %2223 = vadd.xlane.f32.xlu1 %v2222_v3 }
 0x509   : > { %1715 = vperm.xlu0 %3560, %v384_v45  }
 0x50d   : > { %1725 = vperm.xlu0 %3560, %v386_v18  }
 0x511   : > { %1710 = vperm.xlu1 %3559, %v383_v41   ;;  %1735 = vperm.xlu0 %3560, %v388_v61  }
 0x515   : > { %1720 = vperm.xlu1 %3559, %v385_v30  }
 0x519   : > { %1730 = vperm.xlu1 %3559, %v387_v37  }
 0x561   : > { %v5073_v38 = vpop.xlane.xlu0 %1552 }
 0x562   : > { %v1573_v39 = vrot.slane %v5073_v38, 7  ;;  %v1589_v62 = vrot.slane %v5073_v38, 1 }
 0x565   : > { %v5075_v11 = vpop.xlane.xlu1 %2208  ;;  %v1556_v34 = vpop.xlane.xlu0 %1555 }
 0x566   : > { %v1574_v14 = vrot.slane %v1556_v34, 7  ;;  %v1590_v17 = vrot.slane %v1556_v34, 1  ;;  %v2229_v61 = vrot.slane %v5075_v11, 7 }
 0x568   : > { %v1585_v44 = vsel %vm1322_vm5, %v1573_v39, %v1574_v14 }
 0x569   : > { %v2212_v36 = vpop.xlane.xlu0 %2211  ;;  %v5077_v63 = vpop.xlane.xlu1 %1561 }
 0x56a   : > { %v1592_v55 = vrot.slane %v5077_v63, 1  ;;  %v2230_v45 = vrot.slane %v2212_v36, 7  ;;  %v2246_v37 = vrot.slane %v2212_v36, 1  ;;  %v1576_v10 = vrot.slane %v5077_v63, 7 }
 0x56c   : > { %v2241_v52 = vsel %vm1322_vm5, %v2229_v61, %v2230_v45 }
 0x56d   : > { %v1559_v51 = vpop.xlane.xlu0 %1558 }
 0x56e   : > { %v1575_v22 = vrot.slane %v1559_v51, 7  ;;  %v1591_v15 = vrot.slane %v1559_v51, 1 }
 0x570   : > { %v1584_v50 = vsel %vm1322_vm5, %v1574_v14, %v1575_v22  ;;  %v1599_v48 = vsel %vm1339_vm7, %v1591_v15, %v1592_v55  ;;  %v1600_v31 = vsel %vm1339_vm7, %v1590_v17, %v1591_v15 }
 0x571   : > { %v1606_v47 = vsel %vm4684_vm8, %v1600_v31, %v1585_v44  ;;  %v1607_v3 = vsel %vm4748_vm10, %v1599_v48, %v1584_v50  ;;  %v2245_v50 = vrot.slane %v5075_v11, 1 }
 0x572   : > { %v1614_v18 = vadd.f32 %v1606_v47, %v1556_v34  ;;  %v1615_v41 = vadd.f32 %v1607_v3, %v1559_v51 }
 0x574   : > { %v2215_v30 = vpop.xlane.xlu0 %2214  ;;  %v1622_v14 = vmul.f32 0.001953125, %v1614_v18  ;;  %v1623_v25 = vmul.f32 0.001953125, %v1615_v41  ;;  %v2257_v18 = vsel %vm1339_vm7, %v2245_v50, %v2246_v37 }
 0x575   : > { %v2247_v49 = vrot.slane %v2215_v30, 1  ;;  %v2231_v31 = vrot.slane %v2215_v30, 7 }
 0x576   : > { %v1630_v15 = vadd.f32 1e-05, %v1622_v14  ;;  %v1631_v53 = vadd.f32 1e-05, %v1623_v25 }
 0x577   : > { %v2256_v44 = vsel %vm1339_vm7, %v2246_v37, %v2247_v49 }
 0x578   : > { %v2262_v34 = vsel %vm4684_vm8, %v2256_v44, %v2241_v52  ;;  %v5100_v51 = vpop.xlane.xlu0 %2205  ;;  %3641 = vrsqrt.f32 %v1630_v15 }
 0x579   : > { %v2270_v48 = vadd.f32 %v2262_v34, %v2212_v36  ;;  %v5103_v47 = vpop.xlane.xlu1 %2217  ;;  %v6170_v3 = vrot.slane %v5100_v51, 7  ;;  %3643 = vrsqrt.f32 %v1631_v53  ;;  %v2240_v36 = vsel %vm1322_vm5, %v2230_v45, %v2231_v31 }
 0x57a   : > { %v2248_v25 = vrot.slane %v5103_v47, 1  ;;  %v1583_v34 = vsel %vm1322_vm5, %v1575_v22, %v1576_v10 }
 0x57b   : > { %v2278_v41 = vmul.f32 0.001953125, %v2270_v48  ;;  %v2242_v52 = vsel %vm1322_vm5, %v6170_v3, %v2229_v61 }
 0x57c   : > { %v2255_v14 = vsel %vm1339_vm7, %v2247_v49, %v2248_v25  ;;  %v2261_v15 = vsel %vm4675_vm6, %v2257_v18, %v2242_v52  ;;  %v5120_v44 = vpop.xlane.xlu0 %1564  ;;  %v1601_v18 = vsel %vm1339_vm7, %v1589_v62, %v1590_v17 }
 0x57d   : > { %v2286_v37 = vadd.f32 1e-05, %v2278_v41  ;;  %v2263_v48 = vsel %vm4748_vm10, %v2255_v14, %v2240_v36  ;;  %v2269_v61 = vadd.f32 %v2261_v15, %v5075_v11  ;;  %v1550_v3 = vpop.xlane.xlu1 %1549  ;;  %v6173_v49 = vrot.slane %v5120_v44, 1 }
 0x57e   : > { %v2271_v45 = vadd.f32 %v2263_v48, %v2215_v30  ;;  %v1572_v7 = vrot.slane %v1550_v3, 7  ;;  %v1588_v41 = vrot.slane %v1550_v3, 1  ;;  %v6264_v14 = vrot.slane %v5103_v47, 7 }
 0x57f   : > { %3645 = vrsqrt.f32 %v2286_v37  ;;  %v2277_v52 = vmul.f32 0.001953125, %v2269_v61  ;;  %v1598_v30 = vsel %vm1339_vm7, %v1592_v55, %v6173_v49  ;;  %v2244_v15 = vrot.slane %v5100_v51, 1 }
 0x580   : > { %v2279_v29 = vmul.f32 0.001953125, %v2271_v45  ;;  %v1586_v11 = vsel %vm1322_vm5, %v1572_v7, %v1573_v39  ;;  %v5138_v36 = vpop.xlane.xlu0 %2220  ;;  %v2239_v17 = vsel %vm1322_vm5, %v2231_v31, %v6264_v14  ;;  %v1608_v39 = vsel %vm4738_vm9, %v1598_v30, %v1583_v34  ;;  %v377_v31 = vld [vmem:[%s6128_s5 + $0x10] sm:$0xff]  ;;  %v378_v30 = vld [vmem:[%s6128_s5 + $0x18] sm:$0xff] }
 0x581   : > { %v1605_v22 = vsel %vm4675_vm6, %v1601_v18, %v1586_v11  ;;  %v5149_v37 = vpop.xlane.xlu1 %1570  ;;  %v1616_v61 = vadd.f32 %v1608_v39, %v5077_v63  ;;  %v2285_v49 = vadd.f32 1e-05, %v2277_v52  ;;  %v1602_v53 = vsel %vm1339_vm7, %v1588_v41, %v1589_v62 }
 0x582   : > { %v2287_v48 = vadd.f32 1e-05, %v2279_v29  ;;  %v1613_v55 = vadd.f32 %v1605_v22, %v5073_v38  ;;  %v1579_v45 = vrot.slane %v5149_v37, 7  ;;  %v3642_v14 = vpop.eup %3641  ;;  %v1577_v34 = vrot.slane %v5120_v44, 7 }
 0x583   : > { %v6175_v18 = vrot.slane %v5138_v36, 1  ;;  %v3644_v29 = vpop.eup %3643  ;;  %v1624_v38 = vmul.f32 0.001953125, %v1616_v61  ;;  %v1595_v11 = vrot.slane %v5149_v37, 1 }
 0x584   : > { %3647 = vrsqrt.f32 %v2287_v48  ;;  %v1587_v63 = vsel %vm1322_vm5, %v1579_v45, %v1572_v7  ;;  %v1621_v52 = vmul.f32 0.001953125, %v1613_v55  ;;  %v1646_v48 = vmul.f32 %v3642_v14, %v377_v31 }
 0x585   : > { %v1604_v62 = vsel %vm4794_vm12, %v1602_v53, %v1587_v63  ;;  %v2254_v22 = vsel %vm1339_vm7, %v2248_v25, %v6175_v18  ;;  %v5173_v39 = vpop.xlane.xlu1 %2226  ;;  %v2258_v7 = vsel %vm1339_vm7, %v2244_v15, %v2245_v50  ;;  %v1632_v61 = vadd.f32 1e-05, %v1624_v38 }
 0x586   : > { %v1612_v13 = vadd.f32 %v1604_v62, %v1550_v3  ;;  %v2264_v55 = vsel %vm4738_vm9, %v2254_v22, %v2239_v17  ;;  %v1582_v53 = vsel %vm1322_vm5, %v1576_v10, %v1577_v34  ;;  %v2235_v25 = vrot.slane %v5173_v39, 7  ;;  %1664 = vperm.xlu1 %3559, %v1646_v48  }
 0x587   : > { %v2272_v63 = vadd.f32 %v2264_v55, %v5103_v47  ;;  %v1647_v18 = vmul.f32 %v3644_v29, %v378_v30  ;;  %3649 = vrsqrt.f32 %v2285_v49  ;;  %v1603_v14 = vsel %vm1339_vm7, %v1595_v11, %v1588_v41 }
 0x588   : > { %v1620_v43 = vmul.f32 0.001953125, %v1612_v13  ;;  %v2233_v50 = vrot.slane %v5138_v36, 7  ;;  %v1629_v38 = vadd.f32 1e-05, %v1621_v52  ;;  %3651 = vrsqrt.f32 %v1632_v61 }
 0x589   : > { %v3646_v3 = vpop.eup %3645  ;;  %v2280_v23 = vmul.f32 0.001953125, %v2272_v63  ;;  %v6265_v17 = vrot.slane %v5100_v51, 7  ;;  %1669 = vperm.xlu0 %3560, %v1647_v18   ;;  %v1568_v62 = vpop.xlane.xlu1 %1567  ;;  %v2251_v48 = vrot.slane %v5173_v39, 1 }
 0x58a   : > { %v1628_v22 = vadd.f32 1e-05, %v1620_v43  ;;  %v1578_v29 = vrot.slane %v1568_v62, 7  ;;  %v1594_v41 = vrot.slane %v1568_v62, 1  ;;  %v2302_v61 = vmul.f32 %v3646_v3, %v377_v31 }
 0x58b   : > { %v2243_v10 = vsel %vm1322_vm5, %v2235_v25, %v6265_v17  ;;  %v2288_v13 = vadd.f32 1e-05, %v2280_v23 }
 0x58c   : > { %v2260_v49 = vsel %vm4794_vm12, %v2258_v7, %v2243_v10  ;;  %3653 = vrsqrt.f32 %v1628_v22  ;;  %v1580_v55 = vsel %vm1322_vm5, %v1578_v29, %v1579_v45  ;;  %v1581_v18 = vsel %vm1322_vm5, %v1577_v34, %v1578_v29  ;;  %2320 = vperm.xlu1 %3559, %v2302_v61  }
 0x58d   : > { %v2268_v52 = vadd.f32 %v2260_v49, %v5100_v51  ;;  %v1596_v43 = vsel %vm1339_vm7, %v1594_v41, %v1595_v11  ;;  %3655 = vrsqrt.f32 %v2288_v13  ;;  %v6266_v7 = vrot.slane %v5120_v44, 1  ;;  %v2224_v3 = vpop.xlane.xlu1 %2223 }
 0x58e   : > { %v1610_v31 = vsel %vm4880_vm14, %v1596_v43, %v1581_v18  ;;  %v3648_v23 = vpop.eup %3647  ;;  %v1611_v34 = vsel %vm4815_vm13, %v1603_v14, %v1580_v55  ;;  %v2234_v17 = vrot.slane %v2224_v3, 7  ;;  %3657 = vrsqrt.f32 %v1629_v38 }
 0x58f   : > { %v2276_v54 = vmul.f32 0.001953125, %v2268_v52  ;;  %v1597_v63 = vsel %vm1339_vm7, %v6266_v7, %v1594_v41  ;;  %v1618_v11 = vadd.f32 %v1610_v31, %v1568_v62  ;;  %v2250_v49 = vrot.slane %v2224_v3, 1  ;;  %v379_v62 = vld [vmem:[%s6128_s5 + $0x20] sm:$0xff] }
 0x590   : > { %v1609_v45 = vsel %vm4790_vm11, %v1597_v63, %v1582_v53  ;;  %v6267_v29 = vrot.slane %v5103_v47, 7  ;;  %v2236_v13 = vsel %vm1322_vm5, %v2234_v17, %v2235_v25  ;;  %v2237_v53 = vsel %vm1322_vm5, %v2233_v50, %v2234_v17 }
 0x591   : > { %v2284_v10 = vadd.f32 1e-05, %v2276_v54  ;;  %v1617_v22 = vadd.f32 %v1609_v45, %v5120_v44  ;;  %v2303_v52 = vmul.f32 %v3648_v23, %v378_v30  ;;  %v2259_v14 = vsel %vm1339_vm7, %v2251_v48, %v2244_v15  ;;  %v3650_v25 = vpop.eup %3649 }
 0x592   : > { %v2238_v41 = vsel %vm1322_vm5, %v6267_v29, %v2233_v50  ;;  %v1619_v44 = vadd.f32 %v1611_v34, %v5149_v37  ;;  %v2252_v47 = vsel %vm1339_vm7, %v2250_v49, %v2251_v48  ;;  %v1626_v61 = vmul.f32 0.001953125, %v1618_v11  ;;  %v3652_v37 = vpop.eup %3651 }
 0x593   : > { %v1625_v38 = vmul.f32 0.001953125, %v1617_v22  ;;  %3659 = vrsqrt.f32 %v2284_v10  ;;  %v6268_v30 = vrot.slane %v5138_v36, 1  ;;  %v2266_v15 = vsel %vm4880_vm14, %v2252_v47, %v2237_v53  ;;  %2325 = vperm.xlu0 %3560, %v2303_v52   ;;  %v390_v10 = vld [vmem:[%s6129_s6 + $0x38] sm:$0xff]  ;;  %v376_v22 = vld [vmem:[%s6128_s5 + $0x8] sm:$0xff] }
 0x594   : > { %v2267_v55 = vsel %vm4815_vm13, %v2259_v14, %v2236_v13  ;;  %v2274_v18 = vadd.f32 %v2266_v15, %v2224_v3  ;;  %v1648_v54 = vmul.f32 %v3652_v37, %v379_v62  ;;  %v1627_v19 = vmul.f32 0.001953125, %v1619_v44  ;;  %v380_v14 = vld [vmem:[%s6128_s5 + $0x28] sm:$0xff]  ;;  %v382_v15 = vld [vmem:[%s6128_s5 + $0x38] sm:$0xff] }
 0x595   : > { %v2253_v51 = vsel %vm1339_vm7, %v6268_v30, %v2250_v49  ;;  %v1633_v50 = vadd.f32 1e-05, %v1625_v38  ;;  %v2275_v63 = vadd.f32 %v2267_v55, %v5173_v39  ;;  %v1634_v23 = vadd.f32 1e-05, %v1626_v61  ;;  %v389_v38 = vld [vmem:[%s6129_s6 + $0x30] sm:$0xff] }
 0x596   : > { %v2265_v48 = vsel %vm4790_vm11, %v2253_v51, %v2238_v41  ;;  %v3654_v7 = vpop.eup %3653  ;;  %1674 = vperm.xlu1 %3559, %v1648_v54   ;;  %v2282_v45 = vmul.f32 0.001953125, %v2274_v18  ;;  %v2301_v13 = vmul.f32 %v3650_v25, %v376_v22  ;;  %v381_v25 = vld [vmem:[%s6128_s5 + $0x30] sm:$0xff]  ;;  %v5266_v54 = vpop.permute.xlu0 %1715 }
 0x597   : > { %v2273_v43 = vadd.f32 %v2265_v48, %v5138_v36  ;;  %3661 = vrsqrt.f32 %v1633_v50  ;;  %v3656_v9 = vpop.eup %3655  ;;  %v1644_v59 = vmul.f32 %v3654_v7, %v375_v2  ;;  %v1635_v36 = vadd.f32 1e-05, %v1627_v19 }
 0x598   : > { %v2304_v3 = vmul.f32 %v3656_v9, %v379_v62  ;;  %v3658_v11 = vpop.eup %3657  ;;  %v2283_v17 = vmul.f32 0.001953125, %v2275_v63  ;;  %v2290_v39 = vadd.f32 1e-05, %v2282_v45 }
 0x599   : > { %v2281_v31 = vmul.f32 0.001953125, %v2273_v43  ;;  %1654 = vperm.xlu0 %3560, %v1644_v59   ;;  %v1645_v29 = vmul.f32 %v3658_v11, %v376_v22  ;;  %v5264_v43 = vpop.permute.xlu1 %1710 }
 0x59a   : > { %2330 = vperm.xlu1 %3559, %v2304_v3   ;;  %v2291_v41 = vadd.f32 1e-05, %v2283_v17  ;;  %v1726_v7 = vpop.permute.xlu0 %1725 }
 0x59b   : > { %v2289_v34 = vadd.f32 1e-05, %v2281_v31 }
 0x59d   : > { %3663 = vrsqrt.f32 %v2289_v34  ;;  %v3660_v49 = vpop.eup %3659  ;;  %1745 = vperm.xlu0 %3560, %v390_v10  }
 0x59e   : > { %3665 = vrsqrt.f32 %v1634_v23  ;;  %1659 = vperm.xlu1 %3559, %v1645_v29   ;;  %v2300_v52 = vmul.f32 %v3660_v49, %v375_v2  ;;  %v1721_v2 = vpop.permute.xlu1 %1720  ;;  %v5270_v63 = vpop.permute.xlu0 %1735 }
 0x59f   : > { %3667 = vrsqrt.f32 %v1635_v36 }
 0x5a0   : > { %3669 = vrsqrt.f32 %v2290_v39 }
 0x5a1   : > { %v3662_v53 = vpop.eup %3661  ;;  %2315 = vperm.xlu0 %3560, %v2301_v13   ;;  %3671 = vrsqrt.f32 %v2291_v41 }
 0x5a2   : > { %2310 = vperm.xlu1 %3559, %v2300_v52   ;;  %v1649_v44 = vmul.f32 %v3662_v53, %v380_v14  ;;  %v5268_v19 = vpop.permute.xlu1 %1730 }
 0x5a5   : > { %1679 = vperm.xlu0 %3560, %v1649_v44  }
 0x5a6   : > { %1740 = vperm.xlu1 %3559, %v389_v38  }
 0x5a7   : > { %v3664_v47 = vpop.eup %3663 }
 0x5a8   : > { %v3666_v62 = vpop.eup %3665  ;;  %v2305_v61 = vmul.f32 %v3664_v47, %v380_v14 }
 0x5a9   : > { %v3668_v30 = vpop.eup %3667  ;;  %v1650_v51 = vmul.f32 %v3666_v62, %v381_v25 }
 0x5aa   : > { %v3670_v37 = vpop.eup %3669  ;;  %2335 = vperm.xlu0 %3560, %v2305_v61   ;;  %v1651_v50 = vmul.f32 %v3668_v30, %v382_v15 }
 0x5ab   : > { %1684 = vperm.xlu1 %3559, %v1650_v51   ;;  %v3672_v48 = vpop.eup %3671  ;;  %v2306_v55 = vmul.f32 %v3670_v37, %v381_v25 }
 0x5ac   : > { %v2307_v18 = vmul.f32 %v3672_v48, %v382_v15 }
 0x5ae   : > { %1689 = vperm.xlu0 %3560, %v1651_v50  }
 0x5af   : > { %2340 = vperm.xlu1 %3559, %v2306_v55  }
 0x5b2   : > { %2345 = vperm.xlu0 %3560, %v2307_v18  }
 0x605   : > { %v1665_v31 = vpop.permute.xlu1 %1664 }
 0x606   : > { %v1696_v9 = vmul.f32 %v1665_v31, %v4906_v60  ;;  %v1697_v23 = vmul.f32 %v1665_v31, %v4909_v12 }
 0x608   : > { %v1670_v45 = vpop.permute.xlu0 %1669  ;;  %v5274_v59 = vadd.f32 %v1721_v2, %v1696_v9  ;;  %v5276_v34 = vadd.f32 %v1721_v2, %v1697_v23 }
 0x609   : > { %v1698_v3 = vmul.f32 %v1670_v45, %v4946_v46  ;;  %v1699_v11 = vmul.f32 %v1670_v45, %v4949_v27 }
 0x60a   : > { %v3272_v36 = vmul.f32 -1.442695, %v5274_v59  ;;  %v3273_v17 = vmul.f32 -1.442695, %v5276_v34 }
 0x60b   : > { %v5282_v10 = vadd.f32 %v1726_v7, %v1698_v3  ;;  %v5284_v39 = vadd.f32 %v1726_v7, %v1699_v11  ;;  %v2321_v60 = vpop.permute.xlu1 %2320 }
 0x60c   : > { %3673 = vpow2.f32 %v3272_v36  ;;  %v2352_v49 = vmul.f32 %v2321_v60, %v4926_v42  ;;  %v2353_v46 = vmul.f32 %v2321_v60, %v4929_v56 }
 0x60d   : > { %v3274_v12 = vmul.f32 -1.442695, %v5282_v10  ;;  %v3275_v22 = vmul.f32 -1.442695, %v5284_v39  ;;  %3675 = vpow2.f32 %v3273_v17 }
 0x60e   : > { %v5290_v27 = vadd.f32 %v2352_v49, %v1721_v2  ;;  %v5292_v29 = vadd.f32 %v2353_v46, %v1721_v2 }
 0x60f   : > { %3677 = vpow2.f32 %v3274_v12 }
 0x610   : > { %3679 = vpow2.f32 %v3275_v22  ;;  %v3288_v41 = vmul.f32 -1.442695, %v5290_v27  ;;  %v3289_v53 = vmul.f32 -1.442695, %v5292_v29 }
 0x612   : > { %v2326_v13 = vpop.permute.xlu0 %2325  ;;  %3681 = vpow2.f32 %v3288_v41 }
 0x613   : > { %v2354_v52 = vmul.f32 %v2326_v13, %v4956_v5  ;;  %v2355_v14 = vmul.f32 %v2326_v13, %v4959_v8  ;;  %3683 = vpow2.f32 %v3289_v53 }
 0x615   : > { %v5298_v42 = vadd.f32 %v2354_v52, %v1726_v7  ;;  %v5300_v56 = vadd.f32 %v2355_v14, %v1726_v7  ;;  %v1675_v44 = vpop.permute.xlu1 %1674 }
 0x616   : > { %v3674_v62 = vpop.eup %3673  ;;  %v1700_v25 = vmul.f32 %v1675_v44, %v4932_v33  ;;  %v1701_v48 = vmul.f32 %v1675_v44, %v4935_v20 }
 0x617   : > { %v3290_v38 = vmul.f32 -1.442695, %v5298_v42  ;;  %v3291_v47 = vmul.f32 -1.442695, %v5300_v56  ;;  %v3676_v61 = vpop.eup %3675  ;;  %v1816_v30 = vadd.f32 1.0, %v3674_v62 }
 0x618   : > { %v5305_v5 = vpop.permute.xlu0 %1654  ;;  %v1817_v51 = vadd.f32 1.0, %v3676_v61  ;;  %v5309_v18 = vadd.f32 %v5268_v19, %v1700_v25  ;;  %v5315_v45 = vadd.f32 %v5268_v19, %v1701_v48 }
 0x619   : > { %3685 = vpow2.f32 %v3290_v38  ;;  %v3678_v8 = vpop.eup %3677  ;;  %v2331_v15 = vpop.permute.xlu1 %2330 }
 0x61a   : > { %3687 = vpow2.f32 %v3291_v47  ;;  %v3680_v37 = vpop.eup %3679  ;;  %v1818_v50 = vadd.f32 1.0, %v3678_v8  ;;  %v2356_v33 = vmul.f32 %v2331_v15, %v4972_v4  ;;  %v3276_v20 = vmul.f32 -1.442695, %v5309_v18 }
 0x61b   : > { %3689 = vrcp.f32 %v1816_v30  ;;  %v1819_v55 = vadd.f32 1.0, %v3680_v37  ;;  %v3277_v12 = vmul.f32 -1.442695, %v5315_v45  ;;  %v2357_v52 = vmul.f32 %v2331_v15, %v4975_v35 }
 0x61c   : > { %3691 = vrcp.f32 %v1817_v51  ;;  %v5312_v2 = vpop.permute.xlu0 %1745  ;;  %v3682_v7 = vpop.eup %3681  ;;  %v5319_v11 = vadd.f32 %v2356_v33, %v5268_v19 }
 0x61d   : > { %3693 = vrcp.f32 %v1818_v50  ;;  %v1660_v31 = vpop.permute.xlu1 %1659  ;;  %v3684_v9 = vpop.eup %3683  ;;  %v2432_v23 = vadd.f32 1.0, %v3682_v7  ;;  %v5347_v30 = vadd.f32 %v2357_v52, %v5268_v19 }
 0x61e   : > { %3695 = vrcp.f32 %v1819_v55  ;;  %v2433_v3 = vadd.f32 1.0, %v3684_v9  ;;  %v1694_v36 = vmul.f32 %v1660_v31, %v4896_v1  ;;  %v1695_v22 = vmul.f32 %v1660_v31, %v4899_v58 }
 0x61f   : > { %3697 = vrcp.f32 %v2432_v23  ;;  %v3292_v1 = vmul.f32 -1.442695, %v5319_v11  ;;  %v3293_v50 = vmul.f32 -1.442695, %v5347_v30 }
 0x620   : > { %v2316_v4 = vpop.permute.xlu0 %2315  ;;  %v5327_v49 = vadd.f32 %v5266_v54, %v1694_v36  ;;  %3699 = vpow2.f32 %v3276_v20  ;;  %v5337_v25 = vadd.f32 %v5266_v54, %v1695_v22 }
 0x621   : > { %v5322_v17 = vpop.permute.xlu1 %2310  ;;  %3701 = vrcp.f32 %v2433_v3  ;;  %v2350_v38 = vmul.f32 %v2316_v4, %v4912_v57  ;;  %v2351_v37 = vmul.f32 %v2316_v4, %v4915_v21 }
 0x622   : > { %v3270_v58 = vmul.f32 -1.442695, %v5327_v49  ;;  %v3271_v15 = vmul.f32 -1.442695, %v5337_v25 }
 0x623   : > { %v3686_v60 = vpop.eup %3685  ;;  %v5354_v51 = vadd.f32 %v2350_v38, %v5266_v54 }
 0x624   : > { %v3688_v46 = vpop.eup %3687  ;;  %v2434_v41 = vadd.f32 1.0, %v3686_v60  ;;  %v1680_v47 = vpop.permute.xlu0 %1679 }
 0x625   : > { %v3690_v13 = vpop.eup %3689  ;;  %v2435_v53 = vadd.f32 1.0, %v3688_v46  ;;  %v5339_v61 = vpop.permute.xlu1 %1740  ;;  %v1702_v57 = vmul.f32 %v1680_v47, %v4986_v24  ;;  %v1703_v48 = vmul.f32 %v1680_v47, %v4989_v26  ;;  %v3286_v21 = vmul.f32 -1.442695, %v5354_v51 }
 0x626   : > { %v3692_v14 = vpop.eup %3691  ;;  %v5332_v44 = vmul.f32 %v3690_v13, %v5274_v59  ;;  %3703 = vrcp.f32 %v2434_v41 }
 0x627   : > { %v3694_v62 = vpop.eup %3693  ;;  %3705 = vpow2.f32 %v3277_v12  ;;  %v5351_v8 = vmul.f32 %v3692_v14, %v5276_v34  ;;  %v5367_v34 = vadd.f32 %v5270_v63, %v1702_v57  ;;  %v5387_v3 = vadd.f32 %v5270_v63, %v1703_v48 }
 0x628   : > { %v5342_v35 = vmul.f32 %v3694_v62, %v5282_v10  ;;  %3707 = vrcp.f32 %v2435_v53  ;;  %1880 = vrot.lane.b32.xlu1 %v5332_v44, %s3917_s26  ;;  %v3696_v59 = vpop.eup %3695 }
 0x629   : > { %3709 = vpow2.f32 %v3292_v1  ;;  %v3698_v10 = vpop.eup %3697  ;;  %v5361_v19 = vmul.f32 %v3696_v59, %v5284_v39  ;;  %v2336_v7 = vpop.permute.xlu0 %2335  ;;  %v3278_v9 = vmul.f32 -1.442695, %v5367_v34 }
 0x62a   : > { %3711 = vpow2.f32 %v3270_v58  ;;  %1882 = vrot.lane.b32.xlu0 %v5342_v35, %s3917_s26  ;;  %v5364_v24 = vmul.f32 %v3698_v10, %v5290_v27  ;;  %v1685_v55 = vpop.permute.xlu1 %1684  ;;  %v3700_v33 = vpop.eup %3699  ;;  %v5377_v27 = vadd.f32 %v2351_v37, %v5266_v54  ;;  %v6270_v10 = vld [vmem:[#allocation28_spill] sm:$0xff] }
 0x62b   : > { %v3702_v39 = vpop.eup %3701  ;;  %3713 = vpow2.f32 %v3271_v15  ;;  %v1704_v23 = vmul.f32 %v1685_v55, %v5036_v40  ;;  %v1705_v54 = vmul.f32 %v1685_v55, %v5039_v0  ;;  %v1820_v60 = vadd.f32 1.0, %v3700_v33 }
 0x62c   : > { %1896 = vrot.lane.b32.xlu1 %v5351_v8, %s3917_s26  ;;  %3715 = vpow2.f32 %v3293_v50  ;;  %v5391_v4 = vmul.f32 %v3702_v39, %v5292_v29  ;;  %v2358_v40 = vmul.f32 %v2336_v7, %v5006_v6  ;;  %v3287_v22 = vmul.f32 -1.442695, %v5377_v27 }
 0x62d   : > { %3717 = vpow2.f32 %v3286_v21  ;;  %v5399_v0 = vadd.f32 %v5339_v61, %v1704_v23  ;;  %v3279_v6 = vmul.f32 -1.442695, %v5387_v3  ;;  %v5408_v13 = vadd.f32 %v5339_v61, %v1705_v54 }
 0x62e   : > { %1898 = vrot.lane.b32.xlu0 %v5361_v19, %s3917_s26  ;;  %3719 = vpow2.f32 %v3278_v9  ;;  %v5411_v52 = vadd.f32 %v2358_v40, %v5270_v63  ;;  %v1692_v15 = vmul.f32 %v5305_v5, %v6270_v10  ;;  %v6273_v10 = vld [vmem:[#allocation21_spill] sm:$0xff] }
 0x62f   : > { %3721 = vrcp.f32 %v1820_v60  ;;  %v3281_v47 = vmul.f32 -1.442695, %v5408_v13 }
 0x630   : > { %v3704_v31 = vpop.eup %3703  ;;  %2496 = vrot.lane.b32.xlu1 %v5364_v24, %s3917_s26  ;;  %3723 = vpow2.f32 %v3287_v22  ;;  %v5449_v23 = vadd.f32 %v5264_v43, %v1692_v15 }
 0x631   : > { %v3706_v26 = vpop.eup %3705  ;;  %v5384_v20 = vmul.f32 %v3704_v31, %v5298_v42  ;;  %v2359_v42 = vmul.f32 %v2336_v7, %v5009_v32  ;;  %v1690_v32 = vpop.permute.xlu0 %1689  ;;  %v6271_v31 = vld [vmem:[#allocation29_spill] sm:$0xff] }
 0x632   : > { %v3708_v36 = vpop.eup %3707  ;;  %v1821_v41 = vadd.f32 1.0, %v3706_v26  ;;  %v1706_v58 = vmul.f32 %v1690_v32, %v5012_v28  ;;  %v1707_v62 = vmul.f32 %v1690_v32, %v5015_v16  ;;  %v1693_v9 = vmul.f32 %v5305_v5, %v6271_v31 }
 0x633   : > { %v3710_v12 = vpop.eup %3709  ;;  %2498 = vrot.lane.b32.xlu0 %v5384_v20, %s3917_s26  ;;  %v5404_v29 = vmul.f32 %v3708_v36, %v5300_v56  ;;  %v5414_v14 = vadd.f32 %v2359_v42, %v5270_v63  ;;  %v3280_v56 = vmul.f32 -1.442695, %v5399_v0  ;;  %v3294_v63 = vmul.f32 -1.442695, %v5411_v52  ;;  %v6272_v42 = vld [vmem:[#allocation26_spill] sm:$0xff] }
 0x634   : > { %v3712_v46 = vpop.eup %3711  ;;  %2512 = vrot.lane.b32.xlu1 %v5391_v4, %s3917_s26  ;;  %v2436_v53 = vadd.f32 1.0, %v3710_v12  ;;  %3725 = vrcp.f32 %v1821_v41  ;;  %v5435_v48 = vadd.f32 %v5312_v2, %v1706_v58  ;;  %v5442_v33 = vadd.f32 %v5312_v2, %v1707_v62 }
 0x635   : > { %v1814_v1 = vadd.f32 1.0, %v3712_v46  ;;  %v3714_v38 = vpop.eup %3713  ;;  %3727 = vpow2.f32 %v3279_v6  ;;  %v3295_v28 = vmul.f32 -1.442695, %v5414_v14  ;;  %v5458_v22 = vadd.f32 %v5264_v43, %v1693_v9 }
 0x636   : > { %3729 = vrcp.f32 %v2436_v53  ;;  %v3716_v57 = vpop.eup %3715  ;;  %v1815_v50 = vadd.f32 1.0, %v3714_v38  ;;  %v3282_v60 = vmul.f32 -1.442695, %v5435_v48  ;;  %v3283_v5 = vmul.f32 -1.442695, %v5442_v33 }
 0x637   : > { %2514 = vrot.lane.b32.xlu0 %v5404_v29, %s3917_s26  ;;  %3731 = vrcp.f32 %v1814_v1  ;;  %v3718_v16 = vpop.eup %3717  ;;  %v2437_v7 = vadd.f32 1.0, %v3716_v57  ;;  %v2348_v46 = vmul.f32 %v5322_v17, %v6272_v42  ;;  %v3268_v6 = vmul.f32 -1.442695, %v5449_v23 }
 0x638   : > { %1944 = vrot.lane.b32.xlu1 %v5332_v44, %s6269_s21  ;;  %3733 = vpow2.f32 %v3280_v56  ;;  %v3720_v39 = vpop.eup %3719  ;;  %v2430_v26 = vadd.f32 1.0, %v3718_v16  ;;  %v2346_v56 = vpop.permute.xlu0 %2345  ;;  %v3269_v62 = vmul.f32 -1.442695, %v5458_v22  ;;  %v6274_v16 = vld [vmem:[#allocation27_spill] sm:$0xff] }
 0x639   : > { %3735 = vpow2.f32 %v3281_v47  ;;  %v1822_v54 = vadd.f32 1.0, %v3720_v39  ;;  %v3722_v36 = vpop.eup %3721  ;;  %v2362_v15 = vmul.f32 %v2346_v56, %v6273_v10 }
 0x63a   : > { %3737 = vpow2.f32 %v3294_v63  ;;  %v3724_v40 = vpop.eup %3723  ;;  %v5468_v47 = vmul.f32 %v3722_v36, %v5309_v18  ;;  %v5472_v63 = vadd.f32 %v2348_v46, %v5264_v43 }
 0x63b   : > { %1946 = vrot.lane.b32.xlu0 %v5342_v35, %s6269_s21  ;;  %3739 = vpow2.f32 %v3295_v28  ;;  %v2431_v53 = vadd.f32 1.0, %v3724_v40 }
 0x63c   : > { %1960 = vrot.lane.b32.xlu1 %v5351_v8, %s6269_s21  ;;  %3741 = vrcp.f32 %v1815_v50  ;;  %v2349_v50 = vmul.f32 %v5322_v17, %v6274_v16  ;;  %v6275_v17 = vld [vmem:[#allocation22_spill] sm:$0xff] }
 0x63d   : > { %3743 = vrcp.f32 %v1822_v54  ;;  %v2363_v40 = vmul.f32 %v2346_v56, %v6275_v17 }
 0x63e   : > { %v3726_v12 = vpop.eup %3725  ;;  %3745 = vrcp.f32 %v2437_v7  ;;  %v5495_v42 = vadd.f32 %v2349_v50, %v5264_v43 }
 0x63f   : > { %1962 = vrot.lane.b32.xlu0 %v5361_v19, %s6269_s21  ;;  %v3728_v41 = vpop.eup %3727  ;;  %3747 = vrcp.f32 %v2430_v26  ;;  %v5485_v9 = vmul.f32 %v3726_v12, %v5315_v45  ;;  %v3284_v26 = vmul.f32 -1.442695, %v5472_v63  ;;  %v5511_v56 = vadd.f32 %v2363_v40, %v5312_v2 }
 0x640   : > { %2560 = vrot.lane.b32.xlu1 %v5364_v24, %s6269_s21  ;;  %v3730_v32 = vpop.eup %3729  ;;  %v1823_v1 = vadd.f32 1.0, %v3728_v41  ;;  %3749 = vpow2.f32 %v3282_v60 }
 0x641   : > { %v3732_v58 = vpop.eup %3731  ;;  %3751 = vpow2.f32 %v3283_v5  ;;  %v5490_v5 = vadd.f32 %v2362_v15, %v5312_v2 }
 0x642   : > { %v3734_v38 = vpop.eup %3733  ;;  %3753 = vrcp.f32 %v1823_v1  ;;  %v5482_v39 = vmul.f32 %v3732_v58, %v5327_v49 }
 0x643   : > { %2562 = vrot.lane.b32.xlu0 %v5384_v20, %s6269_s21  ;;  %v3736_v57 = vpop.eup %3735  ;;  %3755 = vpow2.f32 %v3268_v6  ;;  %v1824_v60 = vadd.f32 1.0, %v3734_v38  ;;  %v3298_v58 = vmul.f32 -1.442695, %v5490_v5  ;;  %v3285_v38 = vmul.f32 -1.442695, %v5495_v42 }
 0x644   : > { %2576 = vrot.lane.b32.xlu1 %v5391_v4, %s6269_s21  ;;  %v3738_v28 = vpop.eup %3737  ;;  %3757 = vrcp.f32 %v2431_v53  ;;  %v1825_v12 = vadd.f32 1.0, %v3736_v57  ;;  %v5506_v53 = vmul.f32 %v3730_v32, %v5319_v11  ;;  %v2341_v57 = vpop.permute.xlu1 %2340 }
 0x645   : > { %v3740_v18 = vpop.eup %3739  ;;  %v2438_v7 = vadd.f32 1.0, %v3738_v28  ;;  %3759 = vpow2.f32 %v3269_v62  ;;  %v3299_v28 = vmul.f32 -1.442695, %v5511_v56 }
 0x646   : > { %v3742_v31 = vpop.eup %3741  ;;  %v2439_v54 = vadd.f32 1.0, %v3740_v18  ;;  %6276 = vst [vmem:[#allocation19_spill] sm:$0xff] %v5506_v53 }
 0x647   : > { %2578 = vrot.lane.b32.xlu0 %v5404_v29, %s6269_s21  ;;  %v3744_v36 = vpop.eup %3743  ;;  %3761 = vrcp.f32 %v2438_v7  ;;  %v5503_v41 = vmul.f32 %v3742_v31, %v5337_v25 }
 0x648   : > { %1884 = vrot.lane.b32.xlu1 %v5468_v47, %s3917_s26  ;;  %v3746_v49 = vpop.eup %3745  ;;  %v5498_v45 = vmul.f32 %v3744_v36, %v5367_v34  ;;  %3763 = vrcp.f32 %v2439_v54  ;;  %v6279_v36 = vld [vmem:[#allocation16_spill] sm:$0xff] }
 0x649   : > { %v3748_v46 = vpop.eup %3747  ;;  %3765 = vpow2.f32 %v3284_v26  ;;  %v5526_v15 = vmul.f32 %v3746_v49, %v5347_v30 }
 0x64a   : > { %v3750_v6 = vpop.eup %3749  ;;  %3767 = vrcp.f32 %v1824_v60  ;;  %v5520_v62 = vmul.f32 %v3748_v46, %v5354_v51  ;;  %v2361_v60 = vmul.f32 %v2341_v57, %v6279_v36 }
 0x64b   : > { %1878 = vrot.lane.b32.xlu0 %v5482_v39, %s3917_s26  ;;  %v3752_v1 = vpop.eup %3751  ;;  %v1826_v34 = vadd.f32 1.0, %v3750_v6  ;;  %3769 = vrcp.f32 %v1825_v12 }
 0x64c   : > { %1900 = vrot.lane.b32.xlu1 %v5485_v9, %s3917_s26  ;;  %v3754_v25 = vpop.eup %3753  ;;  %v1827_v11 = vadd.f32 1.0, %v3752_v1  ;;  %v5558_v6 = vadd.f32 %v2361_v60, %v5339_v61 }
 0x64d   : > { %v3756_v32 = vpop.eup %3755  ;;  %v5523_v2 = vmul.f32 %v3754_v25, %v5387_v3  ;;  %3771 = vrcp.f32 %v1826_v34  ;;  %v6277_v3 = vld [vmem:[#allocation15_spill] sm:$0xff] }
 0x64e   : > { %v3758_v10 = vpop.eup %3757  ;;  %3773 = vrcp.f32 %v1827_v11  ;;  %v2360_v50 = vmul.f32 %v2341_v57, %v6277_v3  ;;  %v1812_v30 = vadd.f32 1.0, %v3756_v32 }
 0x64f   : > { %1894 = vrot.lane.b32.xlu0 %v5503_v41, %s3917_s26  ;;  %3775 = vpow2.f32 %v3298_v58  ;;  %v3760_v16 = vpop.eup %3759  ;;  %v5537_v7 = vmul.f32 %v3758_v10, %v5377_v27  ;;  %v3297_v10 = vmul.f32 -1.442695, %v5558_v6 }
 0x650   : > { %2500 = vrot.lane.b32.xlu1 %v5506_v53, %s3917_s26  ;;  %3777 = vpow2.f32 %v3285_v38  ;;  %v5549_v40 = vadd.f32 %v2360_v50, %v5339_v61  ;;  %v1813_v49 = vadd.f32 1.0, %v3760_v16 }
 0x651   : > { %v3762_v18 = vpop.eup %3761  ;;  %3779 = vpow2.f32 %v3299_v28 }
 0x652   : > { %v3764_v31 = vpop.eup %3763  ;;  %v5540_v26 = vmul.f32 %v3762_v18, %v5411_v52  ;;  %3781 = vrcp.f32 %v1812_v30  ;;  %v3296_v58 = vmul.f32 -1.442695, %v5549_v40 }
 0x653   : > { %2494 = vrot.lane.b32.xlu0 %v5520_v62, %s3917_s26  ;;  %v5543_v54 = vmul.f32 %v3764_v31, %v5414_v14  ;;  %v3766_v17 = vpop.eup %3765  ;;  %3783 = vrcp.f32 %v1813_v49  ;;  %v2802_v14 = vld [vmem:[%s6131_s8 + $0x30] sm:$0xff] }
 0x654   : > { %2516 = vrot.lane.b32.xlu1 %v5526_v15, %s3917_s26  ;;  %6278 = vst [vmem:[#allocation20_spill] sm:$0xff] %v5540_v26  ;;  %v3768_v52 = vpop.eup %3767  ;;  %v2428_v11 = vadd.f32 1.0, %v3766_v17  ;;  %3785 = vpow2.f32 %v3296_v58 }
 0x655   : > { %v3770_v12 = vpop.eup %3769  ;;  %v5563_v34 = vmul.f32 %v3768_v52, %v5399_v0 }
 0x656   : > { %v5572_v61 = vmul.f32 %v3770_v12, %v5408_v13  ;;  %3787 = vrcp.f32 %v2428_v11  ;;  %v2671_v11 = vld [vmem:[#allocation4 + $0x18] sm:$0xff] }
 0x657   : > { %2510 = vrot.lane.b32.xlu0 %v5537_v7, %s3917_s26  ;;  %v3772_v46 = vpop.eup %3771  ;;  %3789 = vpow2.f32 %v3297_v10 }
 0x658   : > { %1948 = vrot.lane.b32.xlu1 %v5468_v47, %s6269_s21  ;;  %v3774_v1 = vpop.eup %3773  ;;  %v5567_v25 = vmul.f32 %v3772_v46, %v5435_v48  ;;  %v2803_v48 = vld [vmem:[%s6131_s8 + $0x38] sm:$0xff] }
 0x659   : > { %v3776_v38 = vpop.eup %3775  ;;  %v5575_v32 = vmul.f32 %v3774_v1, %v5442_v33 }
 0x65a   : > { %v3778_v57 = vpop.eup %3777  ;;  %v2442_v28 = vadd.f32 1.0, %v3776_v38 }
 0x65b   : > { %1886 = vrot.lane.b32.xlu0 %v5498_v45, %s3917_s26  ;;  %v3780_v13 = vpop.eup %3779  ;;  %v2429_v33 = vadd.f32 1.0, %v3778_v57 }
 0x65c   : > { %1964 = vrot.lane.b32.xlu1 %v5485_v9, %s6269_s21  ;;  %v3782_v16 = vpop.eup %3781  ;;  %v2443_v3 = vadd.f32 1.0, %v3780_v13  ;;  %3791 = vrcp.f32 %v2442_v28  ;;  %v6285_v28 = vld [vmem:[#allocation11_spill] sm:$0xff] }
 0x65d   : > { %3793 = vrcp.f32 %v2429_v33  ;;  %v5591_v50 = vmul.f32 %v3782_v16, %v5449_v23  ;;  %v3784_v18 = vpop.eup %3783  ;;  %v2669_v16 = vld [vmem:[#allocation4 + $0x8] sm:$0xff] }
 0x65e   : > { %3795 = vrcp.f32 %v2443_v3  ;;  %v3786_v30 = vpop.eup %3785  ;;  %v5598_v31 = vmul.f32 %v3784_v18, %v5458_v22  ;;  %3300 = vmatprep.mubr.msk.f32.mxu0 %vm1030_vm4, %v2669_v16  ;;  %3308 = vmatprep.mubr.msk.f32.mxu1 %vm1030_vm4, %v2669_v16 }
 0x65f   : > { %1902 = vrot.lane.b32.xlu0 %v5523_v2, %s3917_s26  ;;  %v2440_v60 = vadd.f32 1.0, %v3786_v30 }
 0x660   : > { %2564 = vrot.lane.b32.xlu1 %v5506_v53, %s6269_s21  ;;  %v3788_v36 = vpop.eup %3787 }
 0x661   : > { %v3790_v23 = vpop.eup %3789  ;;  %v5605_v52 = vmul.f32 %v3788_v36, %v5472_v63  ;;  %3797 = vrcp.f32 %v2440_v60 }
 0x662   : > { %v2441_v22 = vadd.f32 1.0, %v3790_v23 }
 0x663   : > { %2502 = vrot.lane.b32.xlu0 %v5540_v26, %s3917_s26 }
 0x664   : > { %2580 = vrot.lane.b32.xlu1 %v5526_v15, %s6269_s21  ;;  %3799 = vrcp.f32 %v2441_v22 }
 0x666   : > { %v3792_v17 = vpop.eup %3791 }
 0x667   : > { %2518 = vrot.lane.b32.xlu0 %v5543_v54, %s3917_s26  ;;  %v3794_v49 = vpop.eup %3793  ;;  %v5612_v12 = vmul.f32 %v3792_v17, %v5490_v5 }
 0x668   : > { %1876 = vrot.lane.b32.xlu1 %v5591_v50, %s3917_s26  ;;  %v3796_v46 = vpop.eup %3795  ;;  %v5615_v1 = vmul.f32 %v3794_v49, %v5495_v42  ;;  %v2796_v49 = vld [vmem:[%s6131_s8] sm:$0xff] }
 0x669   : > { %6280 = vst [vmem:[#allocation13_spill] sm:$0xff] %v5612_v12  ;;  %v5622_v63 = vmul.f32 %v3796_v46, %v5511_v56 }
 0x66b   : > { %1890 = vrot.lane.b32.xlu0 %v5567_v25, %s3917_s26  ;;  %6281 = vst [vmem:[#allocation14_spill] sm:$0xff] %v5622_v63  ;;  %v3798_v5 = vpop.eup %3797 }
 0x66c   : > { %1892 = vrot.lane.b32.xlu1 %v5598_v31, %s3917_s26  ;;  %v5633_v42 = vmul.f32 %v3798_v5, %v5549_v40 }
 0x66e   : > { %6282 = vst [vmem:[#allocation17_spill] sm:$0xff] %v5633_v42  ;;  %v3800_v58 = vpop.eup %3799 }
 0x66f   : > { %1906 = vrot.lane.b32.xlu0 %v5575_v32, %s3917_s26  ;;  %v5640_v56 = vmul.f32 %v3800_v58, %v5558_v6  ;;  %v2797_v58 = vld [vmem:[%s6131_s8 + $0x8] sm:$0xff] }
 0x670   : > { %2492 = vrot.lane.b32.xlu1 %v5605_v52, %s3917_s26 }
 0x671   : > { %6283 = vst [vmem:[#allocation18_spill] sm:$0xff] %v5640_v56 }
 0x673   : > { %2506 = vrot.lane.b32.xlu0 %v5612_v12, %s3917_s26 }
 0x674   : > { %2508 = vrot.lane.b32.xlu1 %v5615_v1, %s3917_s26 }
 0x677   : > { %2522 = vrot.lane.b32.xlu0 %v5622_v63, %s3917_s26 }
 0x678   : > { %1888 = vrot.lane.b32.xlu1 %v5563_v34, %s3917_s26 }
 0x67b   : > { %1942 = vrot.lane.b32.xlu0 %v5482_v39, %s6269_s21 }
 0x67c   : > { %1904 = vrot.lane.b32.xlu1 %v5572_v61, %s3917_s26 }
 0x67f   : > { %1958 = vrot.lane.b32.xlu0 %v5503_v41, %s6269_s21 }
 0x680   : > { %2504 = vrot.lane.b32.xlu1 %v5633_v42, %s3917_s26 }
 0x683   : > { %2558 = vrot.lane.b32.xlu0 %v5520_v62, %s6269_s21 }
 0x684   : > { %2520 = vrot.lane.b32.xlu1 %v5640_v56, %s3917_s26  ;;  %s6074_s26 = scalar_lea.hbm %s6132_s9, %s3340_s29 }
 0x687   : > { %2574 = vrot.lane.b32.xlu0 %v5537_v7, %s6269_s21 }
 0x688   : > { %1940 = vrot.lane.b32.xlu1 %v5591_v50, %s6269_s21 }
 0x68b   : > { %1950 = vrot.lane.b32.xlu0 %v5498_v45, %s6269_s21 }
 0x68c   : > { %1956 = vrot.lane.b32.xlu1 %v5598_v31, %s6269_s21 }
 0x68f   : > { %1966 = vrot.lane.b32.xlu0 %v5523_v2, %s6269_s21 }
 0x690   : > { %2556 = vrot.lane.b32.xlu1 %v5605_v52, %s6269_s21 }
 0x693   : > { %2566 = vrot.lane.b32.xlu0 %v5540_v26, %s6269_s21 }
 0x694   : > { %2572 = vrot.lane.b32.xlu1 %v5615_v1, %s6269_s21 }
 0x697   : > { %2582 = vrot.lane.b32.xlu0 %v5543_v54, %s6269_s21 }
 0x698   : > { %1952 = vrot.lane.b32.xlu1 %v5563_v34, %s6269_s21 }
 0x69a   : > { %v1881_v40 = vpop.permute.xlu1 %1880 }
 0x69b   : > { %1954 = vrot.lane.b32.xlu0 %v5567_v25, %s6269_s21 }
 0x69c   : > { %v1883_v6 = vpop.permute.xlu0 %1882  ;;  %1968 = vrot.lane.b32.xlu1 %v5572_v61, %s6269_s21 }
 0x69e   : > { %v1897_v38 = vpop.permute.xlu1 %1896 }
 0x69f   : > { %v5672_v57 = vsel %vm587_vm0, %v1881_v40, %v1897_v38  ;;  %v1918_v10 = vsel %vm587_vm0, %v1897_v38, %v1881_v40  ;;  %1970 = vrot.lane.b32.xlu0 %v5575_v32, %s6269_s21 }
 0x6a0   : > { %v5679_v13 = vmul.f32 %v6285_v28, %v1918_v10  ;;  %v1899_v33 = vpop.permute.xlu0 %1898  ;;  %2568 = vrot.lane.b32.xlu1 %v5633_v42, %s6269_s21 }
 0x6a1   : > { %v5685_v3 = vsel %vm587_vm0, %v1883_v6, %v1899_v33  ;;  %v1919_v18 = vsel %vm587_vm0, %v1899_v33, %v1883_v6  ;;  %v2798_v6 = vld [vmem:[%s6131_s8 + $0x10] sm:$0xff] }
 0x6a2   : > { %v5692_v30 = vmul.f32 %v6285_v28, %v1919_v18  ;;  %v2497_v23 = vpop.permute.xlu1 %2496 }
 0x6a3   : > { %2570 = vrot.lane.b32.xlu0 %v5612_v12, %s6269_s21 }
 0x6a4   : > { %2584 = vrot.lane.b32.xlu1 %v5640_v56, %s6269_s21 }
 0x6a5   : > { %v2499_v17 = vpop.permute.xlu0 %2498 }
 0x6a6   : > { %v2513_v22 = vpop.permute.xlu1 %2512 }
 0x6a7   : > { %v5707_v46 = vsel %vm587_vm0, %v2497_v23, %v2513_v22  ;;  %v2534_v5 = vsel %vm587_vm0, %v2513_v22, %v2497_v23  ;;  %2586 = vrot.lane.b32.xlu0 %v5622_v63, %s6269_s21 }
 0x6a8   : > { %2806 = vperm.xlu1 %3559, %v2796_v49   ;;  %v5726_v16 = vmul.f32 %v6285_v28, %v2534_v5  ;;  %v2799_v49 = vld [vmem:[%s6131_s8 + $0x18] sm:$0xff] }
 0x6a9   : > { %v2515_v40 = vpop.permute.xlu0 %2514 }
 0x6aa   : > { %v1945_v38 = vpop.permute.xlu1 %1944  ;;  %v5721_v10 = vsel %vm587_vm0, %v2499_v17, %v2515_v40  ;;  %v2535_v33 = vsel %vm587_vm0, %v2515_v40, %v2499_v17  ;;  %v2800_v17 = vld [vmem:[%s6131_s8 + $0x20] sm:$0xff] }
 0x6ab   : > { %v5729_v18 = vmul.f32 %v6285_v28, %v2535_v33  ;;  %2811 = vperm.xlu0 %3560, %v2797_v58  }
 0x6ac   : > { %2816 = vperm.xlu1 %3559, %v2798_v6   ;;  %v2801_v6 = vld [vmem:[%s6131_s8 + $0x28] sm:$0xff] }
 0x6ad   : > { %v1947_v27 = vpop.permute.xlu0 %1946 }
 0x6ae   : > { %v1961_v5 = vpop.permute.xlu1 %1960 }
 0x6af   : > { %v5743_v40 = vsel %vm620_vm3, %v1945_v38, %v1961_v5  ;;  %v1982_v58 = vsel %vm620_vm3, %v1961_v5, %v1945_v38  ;;  %2821 = vperm.xlu0 %3560, %v2799_v49   ;;  %v6288_v38 = vld [vmem:[#allocation12_spill] sm:$0xff] }
 0x6b0   : > { %6286 = vst [vmem:[#allocation24_spill] sm:$0xff] %v5743_v40  ;;  %2826 = vperm.xlu1 %3559, %v2800_v17   ;;  %v5760_v49 = vmul.f32 %v6288_v38, %v1982_v58 }
 0x6b1   : > { %v1963_v33 = vpop.permute.xlu0 %1962 }
 0x6b2   : > { %v2561_v21 = vpop.permute.xlu1 %2560  ;;  %v5755_v0 = vsel %vm620_vm3, %v1947_v27, %v1963_v33  ;;  %v1983_v55 = vsel %vm620_vm3, %v1963_v33, %v1947_v27  ;;  %6289 = vst [vmem:[#allocation23_spill] sm:$0xff] %v5760_v49 }
 0x6b3   : > { %6287 = vst [vmem:[#allocation25_spill] sm:$0xff] %v5755_v0  ;;  %v5763_v17 = vmul.f32 %v6288_v38, %v1983_v55  ;;  %2831 = vperm.xlu0 %3560, %v2801_v6  }
 0x6b4   : > { %2836 = vperm.xlu1 %3559, %v2802_v14  }
 0x6b5   : > { %6290 = vst [vmem:[#allocation28_spill] sm:$0xff] %v5763_v17  ;;  %v2563_v43 = vpop.permute.xlu0 %2562 }
 0x6b6   : > { %v2577_v27 = vpop.permute.xlu1 %2576 }
 0x6b7   : > { %v5774_v58 = vsel %vm620_vm3, %v2561_v21, %v2577_v27  ;;  %v2598_v55 = vsel %vm620_vm3, %v2577_v27, %v2561_v21  ;;  %2841 = vperm.xlu0 %3560, %v2803_v48  }
 0x6b8   : > { %6291 = vst [vmem:[#allocation29_spill] sm:$0xff] %v5774_v58  ;;  %v5785_v51 = vmul.f32 %v6288_v38, %v2598_v55 }
 0x6b9   : > { %v2579_v33 = vpop.permute.xlu0 %2578 }
 0x6ba   : > { %v1885_v6 = vpop.permute.xlu1 %1884  ;;  %v5780_v14 = vsel %vm620_vm3, %v2563_v43, %v2579_v33  ;;  %v2599_v5 = vsel %vm620_vm3, %v2579_v33, %v2563_v43  ;;  %6293 = vst [vmem:[#allocation21_spill] sm:$0xff] %v5785_v51 }
 0x6bb   : > { %6292 = vst [vmem:[#allocation26_spill] sm:$0xff] %v5780_v14  ;;  %v5788_v37 = vmul.f32 %v6288_v38, %v2599_v5 }
 0x6bd   : > { %6294 = vst [vmem:[#allocation27_spill] sm:$0xff] %v5788_v37  ;;  %v1879_v21 = vpop.permute.xlu0 %1878 }
 0x6be   : > { %v1901_v27 = vpop.permute.xlu1 %1900 }
 0x6c1   : > { %v1895_v22 = vpop.permute.xlu0 %1894 }
 0x6c2   : > { %v2501_v23 = vpop.permute.xlu1 %2500  ;;  %v1917_v48 = vsel %vm587_vm0, %v1895_v22, %v1879_v21  ;;  %v1909_v42 = vsel %vm587_vm0, %v1879_v21, %v1895_v22  ;;  %v1920_v21 = vsel %vm587_vm0, %v1901_v27, %v1885_v6 }
 0x6c5   : > { %v2495_v60 = vpop.permute.xlu0 %2494 }
 0x6c6   : > { %v2517_v36 = vpop.permute.xlu1 %2516 }
 0x6c9   : > { %v2511_v40 = vpop.permute.xlu0 %2510 }
 0x6ca   : > { %v5794_v43 = vpop.permute.xlu1 %1948 }
 0x6cd   : > { %v1887_v55 = vpop.permute.xlu0 %1886 }
 0x6ce   : > { %v5796_v33 = vpop.permute.xlu1 %1964 }
 0x6cf   : > { %6295 = vst [vmem:[#allocation22_spill] sm:$0xff] %v5796_v33 }
 0x6d1   : > { %v1903_v5 = vpop.permute.xlu0 %1902 }
 0x6d2   : > { %v5798_v0 = vpop.permute.xlu1 %2564  ;;  %v1921_v33 = vsel %vm587_vm0, %v1903_v5, %v1887_v55  ;;  %v1913_v22 = vsel %vm587_vm0, %v1887_v55, %v1903_v5 }
 0x6d3   : > { %6296 = vst [vmem:[#allocation15_spill] sm:$0xff] %v5798_v0  ;;  %v1926_v0 = vmul.f32 %v6285_v28, %v1917_v48 }
 0x6d5   : > { %v2503_v12 = vpop.permute.xlu0 %2502 }
 0x6d6   : > { %v5800_v59 = vpop.permute.xlu1 %2580 }
 0x6d7   : > { %6297 = vst [vmem:[#allocation16_spill] sm:$0xff] %v5800_v59 }
 0x6d9   : > { %v2519_v58 = vpop.permute.xlu0 %2518 }
 0x6da   : > { %v1877_v14 = vpop.permute.xlu1 %1876 }
 0x6dd   : > { %v1891_v51 = vpop.permute.xlu0 %1890 }
 0x6de   : > { %v1893_v37 = vpop.permute.xlu1 %1892 }
 0x6df   : > { %v1908_v49 = vsel %vm587_vm0, %v1877_v14, %v1893_v37  ;;  %v1916_v17 = vsel %vm587_vm0, %v1893_v37, %v1877_v14  ;;  %v2533_v37 = vsel %vm587_vm0, %v2511_v40, %v2495_v60 }
 0x6e0   : > { %v1924_v59 = vmul.f32 %v6285_v28, %v1916_v17  ;;  %v3389_v53 = vpack.c.bf16 %v1909_v42, %v1908_v49  ;;  %v6298_v42 = vpack.c.bf16 %v5685_v3, %v5672_v57  ;;  %v1932_v57 = vmul.f32 %v6285_v28, %v1920_v21 }
 0x6e1   : > { %v1907_v26 = vpop.permute.xlu0 %1906  ;;  %v2542_v3 = vmul.f32 %v6285_v28, %v2533_v37  ;;  %v2536_v21 = vsel %vm587_vm0, %v2517_v36, %v2501_v23 }
 0x6e2   : > { %v3391_v63 = vpack.c.bf16 %v1926_v0, %v1924_v59  ;;  %v2493_v56 = vpop.permute.xlu1 %2492  ;;  %3390 = vmatprep.subr.bf16.mxu0 %v3389_v53  ;;  %v1912_v53 = vsel %vm587_vm0, %v1885_v6, %v1901_v27  ;;  %v1934_v0 = vmul.f32 %v6285_v28, %v1921_v33  ;;  %v6299_v27 = vpack.c.bf16 %v5692_v30, %v5679_v13 }
 0x6e3   : > { %v3397_v17 = vpack.c.bf16 %v1913_v22, %v1912_v53  ;;  %v2529_v22 = vsel %vm587_vm0, %v2503_v12, %v2519_v58  ;;  %v1923_v13 = vsel %vm587_vm0, %v1907_v26, %v1891_v51  ;;  %v6300_v30 = vpack.c.bf16 %v5721_v10, %v5707_v46 }
 0x6e4   : > { %3392 = vmatpush1.bf16.msra.mxu0 %v3391_v63  ;;  %v2525_v63 = vsel %vm587_vm0, %v2495_v60, %v2511_v40  ;;  %v3399_v40 = vpack.c.bf16 %v1934_v0, %v1932_v57  ;;  %v1915_v0 = vsel %vm587_vm0, %v1891_v51, %v1907_v26  ;;  %v2548_v46 = vmul.f32 %v6285_v28, %v2536_v21 }
 0x6e5   : > { %3394 = vmatprep.subr.bf16.mxu0 %v6298_v42  ;;  %v2507_v59 = vpop.permute.xlu0 %2506  ;;  %v2528_v42 = vsel %vm587_vm0, %v2501_v23, %v2517_v36  ;;  %v1938_v10 = vmul.f32 %v6285_v28, %v1923_v13  ;;  %v6301_v23 = vpack.c.bf16 %v5729_v18, %v5726_v16  ;;  %v3405_v57 = vpack.c.bf16 %v5503_v41, %v5598_v31 }
 0x6e6   : > { %v2509_v49 = vpop.permute.xlu1 %2508  ;;  %v3407_v16 = vpack.c.bf16 %v5482_v39, %v5591_v50  ;;  %v3463_v21 = vpack.c.bf16 %v5520_v62, %v5605_v52 }
 0x6e7   : > { %v2524_v14 = vsel %vm587_vm0, %v2493_v56, %v2509_v49  ;;  %v2532_v48 = vsel %vm587_vm0, %v2509_v49, %v2493_v56  ;;  %v2537_v56 = vsel %vm587_vm0, %v2519_v58, %v2503_v12  ;;  %v3453_v58 = vpack.c.bf16 %v2529_v22, %v2528_v42 }
 0x6e8   : > { %v2540_v55 = vmul.f32 %v6285_v28, %v2532_v48  ;;  %v3445_v6 = vpack.c.bf16 %v2525_v63, %v2524_v14  ;;  %3396 = vmatpush1.bf16.msra.mxu0 %v6299_v27  ;;  %v2550_v53 = vmul.f32 %v6285_v28, %v2537_v56 }
 0x6e9   : > { %3398 = vmatprep.subr.bf16.mxu0 %v3397_v17  ;;  %v2523_v60 = vpop.permute.xlu0 %2522 }
 0x6ea   : > { %v3447_v33 = vpack.c.bf16 %v2542_v3, %v2540_v55  ;;  %v1889_v5 = vpop.permute.xlu1 %1888  ;;  %3446 = vmatprep.subr.bf16.mxu1 %v3445_v6  ;;  %v3455_v51 = vpack.c.bf16 %v2550_v53, %v2548_v46  ;;  %v2539_v3 = vsel %vm587_vm0, %v2523_v60, %v2507_v59  ;;  %v2531_v18 = vsel %vm587_vm0, %v2507_v59, %v2523_v60 }
 0x6eb   : > { %v2554_v31 = vmul.f32 %v6285_v28, %v2539_v3  ;;  %v3461_v59 = vpack.c.bf16 %v5537_v7, %v5615_v1  ;;  %v6303_v60 = vpack.c.bf16 %v5342_v35, %v5332_v44  ;;  %v6305_v1 = vpack.c.bf16 %v5498_v45, %v5468_v47 }
 0x6ec   : > { %3400 = vmatpush1.bf16.msra.mxu0 %v3399_v40  ;;  %3448 = vmatpush1.bf16.msra.mxu1 %v3447_v33  ;;  %v6308_v47 = vpack.c.bf16 %v5567_v25, %v5563_v34  ;;  %v6309_v45 = vpack.c.bf16 %v5384_v20, %v5364_v24  ;;  %v6311_v34 = vld [vmem:[#allocation22_spill] sm:$0xff] }
 0x6ed   : > { %3450 = vmatprep.subr.bf16.mxu1 %v6300_v30  ;;  %v5849_v37 = vpop.permute.xlu0 %1942  ;;  %v1984_v24 = vsel %vm620_vm3, %v6311_v34, %v5794_v43 }
 0x6ee   : > { %v1905_v12 = vpop.permute.xlu1 %1904 }
 0x6ef   : > { %v1914_v49 = vsel %vm587_vm0, %v1889_v5, %v1905_v12  ;;  %v1922_v63 = vsel %vm587_vm0, %v1905_v12, %v1889_v5  ;;  %v6302_v5 = vpack.c.bf16 %v5361_v19, %v5351_v8  ;;  %v6304_v8 = vpack.c.bf16 %v5523_v2, %v5485_v9  ;;  %v6312_v12 = vld [vmem:[#allocation18_spill] sm:$0xff] }
 0x6f0   : > { %v1936_v17 = vmul.f32 %v6285_v28, %v1922_v63  ;;  %v3401_v36 = vpack.c.bf16 %v1915_v0, %v1914_v49  ;;  %3452 = vmatpush1.bf16.msra.mxu1 %v6301_v23  ;;  %v6306_v9 = vpack.c.bf16 %v5575_v32, %v5572_v61  ;;  %v6307_v2 = vpack.c.bf16 %v5404_v29, %v5391_v4  ;;  %v6315_v63 = vld [vmem:[#allocation19_spill] sm:$0xff] }
 0x6f1   : > { %3454 = vmatprep.subr.bf16.mxu1 %v3453_v58  ;;  %v1959_v14 = vpop.permute.xlu0 %1958  ;;  %v6310_v61 = vpack.c.bf16 %v5543_v54, %v5526_v15  ;;  %v6313_v58 = vld [vmem:[#allocation14_spill] sm:$0xff]  ;;  %v6314_v54 = vld [vmem:[#allocation20_spill] sm:$0xff] }
 0x6f2   : > { %v3403_v26 = vpack.c.bf16 %v1938_v10, %v1936_v17  ;;  %v2505_v48 = vpop.permute.xlu1 %2504  ;;  %3402 = vmatprep.subr.bf16.mxu0 %v3401_v36  ;;  %v1973_v4 = vsel %vm620_vm3, %v5849_v37, %v1959_v14  ;;  %v3473_v0 = vpack.c.bf16 %v6313_v58, %v6312_v12  ;;  %v6316_v46 = vpack.c.bf16 %v6314_v54, %v6315_v63  ;;  %v6317_v17 = vld [vmem:[#allocation28_spill] sm:$0xff]  ;;  %v6318_v36 = vld [vmem:[#allocation23_spill] sm:$0xff]  ;;  %v3806_v54 = vld [vmem:[%s4060_s16 + $0x38] sm:$0xff] }
 0x6f3   : > { %v1997_v10 = vmul.f32 %v6288_v38, %v1984_v24  ;;  %v6319_v23 = vpack.c.bf16 %v6317_v17, %v6318_v36  ;;  %v3804_v12 = vld [vmem:[%s4060_s16 + $0x10] sm:$0xff] }
 0x6f4   : > { %3404 = vmatpush1.bf16.msra.mxu0 %v3403_v26  ;;  %3456 = vmatpush1.bf16.msra.mxu1 %v3455_v51  ;;  %v6320_v26 = vld [vmem:[#allocation17_spill] sm:$0xff] }
 0x6f5   : > { %3406 = vmatprep.subr.bf16.mxu0 %v3405_v57  ;;  %v5870_v55 = vpop.permute.xlu0 %2558 }
 0x6f6   : > { %v2521_v6 = vpop.permute.xlu1 %2520 }
 0x6f7   : > { %v2530_v27 = vsel %vm587_vm0, %v2505_v48, %v2521_v6  ;;  %v2538_v41 = vsel %vm587_vm0, %v2521_v6, %v2505_v48  ;;  %v6321_v48 = vld [vmem:[#allocation13_spill] sm:$0xff] }
 0x6f8   : > { %v2552_v40 = vmul.f32 %v6285_v28, %v2538_v41  ;;  %v3457_v33 = vpack.c.bf16 %v2531_v18, %v2530_v27  ;;  %3408 = vmatpush1.bf16.msra.mxu0 %v3407_v16  ;;  %v1981_v28 = vsel %vm620_vm3, %v1959_v14, %v5849_v37  ;;  %v3475_v57 = vpack.c.bf16 %v6321_v48, %v6320_v26  ;;  %v6322_v41 = vld [vmem:[#allocation25_spill] sm:$0xff] }
 0x6f9   : > { %3410 = vmatprep.subr.bf16.mxu0 %v6302_v5  ;;  %v2575_v39 = vpop.permute.xlu0 %2574  ;;  %v1991_v44 = vmul.f32 %v6288_v38, %v1981_v28 }
 0x6fa   : > { %v3459_v50 = vpack.c.bf16 %v2554_v31, %v2552_v40  ;;  %v1941_v56 = vpop.permute.xlu1 %1940  ;;  %3458 = vmatprep.subr.bf16.mxu1 %v3457_v33  ;;  %v2597_v29 = vsel %vm620_vm3, %v2575_v39, %v5870_v55  ;;  %v6323_v31 = vld [vmem:[#allocation24_spill] sm:$0xff]  ;;  %v1976_v33 = vsel %vm620_vm3, %v5794_v43, %v6311_v34  ;;  %v2589_v5 = vsel %vm620_vm3, %v5870_v55, %v2575_v39  ;;  %v6327_v39 = vld [vmem:[#allocation27_spill] sm:$0xff]  ;;  %v3802_v34 = vld [vmem:[%s4060_s16 + $0x18] sm:$0xff] }
 0x6fb   : > { %v2607_v49 = vmul.f32 %v6288_v38, %v2597_v29  ;;  %v6324_v40 = vpack.c.bf16 %v6322_v41, %v6323_v31  ;;  %v2668_v41 = vld [vmem:[#allocation4] sm:$0xff]  ;;  %v3813_v31 = vld [vmem:[%s4060_s16 + $0x68] sm:$0xff] }
 0x6fc   : > { %3412 = vmatpush1.bf16.msra.mxu0 %v6303_v60  ;;  %3460 = vmatpush1.bf16.msra.mxu1 %v3459_v50 }
 0x6fd   : > { %3414 = vmatprep.subr.bf16.mxu0 %v6304_v8  ;;  %3462 = vmatprep.subr.bf16.mxu1 %v3461_v59  ;;  %v1951_v19 = vpop.permute.xlu0 %1950  ;;  %v6326_v59 = vld [vmem:[#allocation16_spill] sm:$0xff] }
 0x6fe   : > { %v1957_v22 = vpop.permute.xlu1 %1956 }
 0x6ff   : > { %v1980_v7 = vsel %vm620_vm3, %v1957_v22, %v1941_v56  ;;  %v1972_v30 = vsel %vm620_vm3, %v1941_v56, %v1957_v22  ;;  %v6325_v56 = vld [vmem:[#allocation15_spill] sm:$0xff] }
 0x700   : > { %v1989_v35 = vmul.f32 %v6288_v38, %v1980_v7  ;;  %3416 = vmatpush1.bf16.msra.mxu0 %v6305_v1  ;;  %3464 = vmatpush1.bf16.msra.mxu1 %v3463_v21  ;;  %v3423_v20 = vpack.c.bf16 %v1973_v4, %v1972_v30  ;;  %v2600_v60 = vsel %vm620_vm3, %v6326_v59, %v6325_v56  ;;  %v6328_v21 = vld [vmem:[#allocation21_spill] sm:$0xff]  ;;  %v6330_v30 = vld [vmem:[#allocation26_spill] sm:$0xff] }
 0x701   : > { %3418 = vmatprep.subr.bf16.mxu0 %v6306_v9  ;;  %3466 = vmatprep.subr.bf16.mxu1 %v6307_v2  ;;  %v1967_v62 = vpop.permute.xlu0 %1966  ;;  %v2613_v55 = vmul.f32 %v6288_v38, %v2600_v60  ;;  %v6329_v7 = vpack.c.bf16 %v6327_v39, %v6328_v21  ;;  %v2673_v60 = vld [vmem:[#allocation4 + $0x28] sm:$0xff]  ;;  %v2678_v39 = vld [vmem:[#allocation4 + $0x50] sm:$0xff] }
 0x702   : > { %v2557_v52 = vpop.permute.xlu1 %2556  ;;  %v3421_v13 = vpack.c.bf16 %v1991_v44, %v1989_v35  ;;  %v1985_v42 = vsel %vm620_vm3, %v1967_v62, %v1951_v19  ;;  %v1977_v6 = vsel %vm620_vm3, %v1951_v19, %v1967_v62  ;;  %v2681_v21 = vld [vmem:[#allocation4 + $0x68] sm:$0xff] }
 0x703   : > { %v1999_v53 = vmul.f32 %v6288_v38, %v1985_v42  ;;  %v3431_v28 = vpack.c.bf16 %v1977_v6, %v1976_v33  ;;  %v6331_v42 = vld [vmem:[#allocation29_spill] sm:$0xff] }
 0x704   : > { %3420 = vmatpush1.bf16.msra.mxu0 %v6308_v47  ;;  %3468 = vmatpush1.bf16.msra.mxu1 %v6309_v45  ;;  %v6332_v47 = vpack.c.bf16 %v6330_v30, %v6331_v42  ;;  %v2592_v45 = vsel %vm620_vm3, %v6325_v56, %v6326_v59  ;;  %v2670_v59 = vld [vmem:[#allocation4 + $0x10] sm:$0xff] }
 0x705   : > { %3422 = vmatprep.subr.bf16.mxu0 %v3421_v13  ;;  %3470 = vmatprep.subr.bf16.mxu1 %v6310_v61  ;;  %v2567_v32 = vpop.permute.xlu0 %2566  ;;  %v3429_v18 = vpack.c.bf16 %v1999_v53, %v1997_v10 }
 0x706   : > { %v2573_v25 = vpop.permute.xlu1 %2572 }
 0x707   : > { %v2596_v37 = vsel %vm620_vm3, %v2573_v25, %v2557_v52  ;;  %v2588_v16 = vsel %vm620_vm3, %v2557_v52, %v2573_v25 }
 0x708   : > { %v2605_v15 = vmul.f32 %v6288_v38, %v2596_v37  ;;  %3424 = vmatpush1.bf16.msra.mxu0 %v3423_v20  ;;  %3472 = vmatpush1.bf16.msra.mxu1 %v6316_v46  ;;  %v3479_v8 = vpack.c.bf16 %v2589_v5, %v2588_v16  ;;  %v3803_v37 = vld [vmem:[%s4060_s16] sm:$0xff] }
 0x709   : > { %3426 = vmatprep.subr.bf16.mxu0 %v6319_v23  ;;  %3474 = vmatprep.subr.bf16.mxu1 %v3473_v0  ;;  %v2583_v14 = vpop.permute.xlu0 %2582  ;;  %v3439_v58 = vpack.c.bf16 %v3804_v12, %v3803_v37  ;;  %v3807_v23 = vld [vmem:[%s4060_s16 + $0x20] sm:$0xff] }
 0x70a   : > { %v1953_v51 = vpop.permute.xlu1 %1952  ;;  %v3477_v3 = vpack.c.bf16 %v2607_v49, %v2605_v15  ;;  %v2601_v27 = vsel %vm620_vm3, %v2583_v14, %v2567_v32  ;;  %v2593_v35 = vsel %vm620_vm3, %v2567_v32, %v2583_v14  ;;  %v3801_v32 = vld [vmem:[%s4060_s16 + $0x8] sm:$0xff]  ;;  %v3808_v14 = vld [vmem:[%s4060_s16 + $0x30] sm:$0xff]  ;;  %v3815_v5 = vld [vmem:[%s4060_s16 + $0x60] sm:$0xff] }
 0x70b   : > { %v2615_v22 = vmul.f32 %v6288_v38, %v2601_v27  ;;  %v3437_v24 = vpack.c.bf16 %v3802_v34, %v3801_v32  ;;  %v3487_v20 = vpack.c.bf16 %v2593_v35, %v2592_v45  ;;  %v3805_v15 = vld [vmem:[%s4060_s16 + $0x28] sm:$0xff]  ;;  %v2682_v35 = vld [vmem:[#allocation4 + $0x70] sm:$0xff] }
 0x70c   : > { %3428 = vmatpush1.bf16.msra.mxu0 %v6324_v40  ;;  %3476 = vmatpush1.bf16.msra.mxu1 %v3475_v57  ;;  %v3441_v63 = vpack.c.bf16 %v3806_v54, %v3805_v15  ;;  %v3809_v57 = vld [vmem:[%s4060_s16 + $0x48] sm:$0xff]  ;;  %v3814_v40 = vld [vmem:[%s4060_s16 + $0x78] sm:$0xff] }
 0x70d   : > { %3430 = vmatprep.subr.bf16.mxu0 %v3429_v18  ;;  %3478 = vmatprep.subr.bf16.mxu1 %v3477_v3  ;;  %v1955_v50 = vpop.permute.xlu0 %1954  ;;  %v3485_v13 = vpack.c.bf16 %v2615_v22, %v2613_v55  ;;  %v3810_v3 = vld [vmem:[%s4060_s16 + $0x58] sm:$0xff]  ;;  %v3811_v18 = vld [vmem:[%s4060_s16 + $0x40] sm:$0xff]  ;;  %v3497_v33 = vpack.c.bf16 %v3814_v40, %v3813_v31  ;;  %v2677_v22 = vld [vmem:[#allocation4 + $0x48] sm:$0xff] }
 0x70e   : > { %v1969_v19 = vpop.permute.xlu1 %1968  ;;  %v3493_v6 = vpack.c.bf16 %v3810_v3, %v3809_v57  ;;  %v2679_v55 = vld [vmem:[#allocation4 + $0x58] sm:$0xff] }
 0x70f   : > { %v1986_v43 = vsel %vm620_vm3, %v1969_v19, %v1953_v51  ;;  %v1978_v4 = vsel %vm620_vm3, %v1953_v51, %v1969_v19  ;;  %v3443_v51 = vpack.c.bf16 %v3808_v14, %v3807_v23  ;;  %v2674_v19 = vld [vmem:[#allocation4 + $0x30] sm:$0xff] }
 0x710   : > { %3432 = vmatpush1.bf16.msra.mxu0 %v3431_v28  ;;  %3480 = vmatpush1.bf16.msra.mxu1 %v3479_v8  ;;  %v2001_v2 = vmul.f32 %v6288_v38, %v1986_v43  ;;  %v2672_v28 = vld [vmem:[#allocation4 + $0x20] sm:$0xff]  ;;  %v2675_v8 = vld [vmem:[#allocation4 + $0x38] sm:$0xff] }
 0x711   : > { %3482 = vmatprep.subr.bf16.mxu1 %v6329_v7  ;;  %v1971_v44 = vpop.permute.xlu0 %1970  ;;  %v2676_v43 = vld [vmem:[#allocation4 + $0x40] sm:$0xff] }
 0x712   : > { %v2569_v1 = vpop.permute.xlu1 %2568  ;;  %v1987_v9 = vsel %vm620_vm3, %v1971_v44, %v1955_v50  ;;  %v1979_v62 = vsel %vm620_vm3, %v1955_v50, %v1971_v44  ;;  %v3816_v50 = vld [vmem:[%s4060_s16 + $0x70] sm:$0xff]  ;;  %v2680_v7 = vld [vmem:[#allocation4 + $0x60] sm:$0xff]  ;;  %v2683_v44 = vld [vmem:[#allocation4 + $0x78] sm:$0xff] }
 0x713   : > { %v2003_v52 = vmul.f32 %v6288_v38, %v1987_v9  ;;  %v3435_v25 = vpack.c.bf16 %v1979_v62, %v1978_v4  ;;  %v3499_v56 = vpack.c.bf16 %v3816_v50, %v3815_v5 }
 0x714   : > { %3484 = vmatpush1.bf16.msra.mxu1 %v6332_v47 }
 0x715   : > { %3486 = vmatprep.subr.bf16.mxu1 %v3485_v13  ;;  %v2571_v29 = vpop.permute.xlu0 %2570  ;;  %v3433_v61 = vpack.c.bf16 %v2003_v52, %v2001_v2 }
 0x716   : > { %v2585_v53 = vpop.permute.xlu1 %2584 }
 0x717   : > { %3434 = vmatprep.subr.bf16.mxu0 %v3433_v61  ;;  %v2602_v0 = vsel %vm620_vm3, %v2585_v53, %v2569_v1  ;;  %v2594_v26 = vsel %vm620_vm3, %v2569_v1, %v2585_v53 }
 0x718   : > { %3488 = vmatpush1.bf16.msra.mxu1 %v3487_v20  ;;  %3436 = vmatpush1.bf16.msra.mxu0 %v3435_v25  ;;  %v2617_v10 = vmul.f32 %v6288_v38, %v2602_v0 }
 0x719   : > { %v2587_v49 = vpop.permute.xlu0 %2586  ;;  %3438 = vmatprep.subr.bf16.mxu0 %v3437_v24 }
 0x71a   : > { %v2603_v46 = vsel %vm620_vm3, %v2587_v49, %v2571_v29  ;;  %v2595_v17 = vsel %vm620_vm3, %v2571_v29, %v2587_v49 }
 0x71b   : > { %v2619_v36 = vmul.f32 %v6288_v38, %v2603_v46  ;;  %v3491_v16 = vpack.c.bf16 %v2595_v17, %v2594_v26  ;;  %v3812_v38 = vld [vmem:[%s4060_s16 + $0x50] sm:$0xff]  ;;  %s341_s16 = sand.u32 1, %s3903_s10  }
 0x71c   : > { %3440 = vmatpush1.bf16.msra.mxu0 %v3439_v58  ;;  %v3495_v27 = vpack.c.bf16 %v3812_v38, %v3811_v18  ;;  %s3222_s25 = sshll.u32 %s341_s16, 8  ;;  %s6082_s13 = scalar_lea.sflag [#allocation6], %s341_s16 }
 0x71d   : > { %3442 = vmatprep.subr.bf16.mxu0 %v3441_v63  ;;  %v3489_v48 = vpack.c.bf16 %v2619_v36, %v2617_v10  ;;  %s6037_s27 = scalar_lea.vmem [#allocation7], %s3222_s25 }
 0x71e   : > { %s3142_s14 = sshll.u32 %s6037_s27, 4  ;;  %s6076_s14 = int_to_ptr.vmem [resolvable:$true] %s3142_s14 }
 0x71f   : > { %3490 = vmatprep.subr.bf16.mxu1 %v3489_v48  ;;  %s3845_s23 = scalar_lea.vmem %s6076_s14, 4096  ;;  %p3852_p2 = scmp.lt.s32.totalorder %s6076_s14, %s3850_s17 }
 0x720   : > { %3444 = vmatpush1.bf16.msra.mxu0 %v3443_v51  ;;  %3492 = vmatpush1.bf16.msra.mxu1 %v3491_v16  ;;  %p3846_p6 = scmp.ne.s32.totalorder %s6076_s14, %s3845_s23  ;;  %p3853_p3 = scmp.lt.s32.totalorder %s3851_s22, %s3845_s23 }
 0x721   : > { %3494 = vmatprep.subr.bf16.mxu1 %v3493_v6 }
 0x722   : > { %p3847_p10 = pnand %p3846_p6, %p6333_p9  ;;  %p3854_p4 = por %p3853_p3, %p3852_p2 }
 0x723   : > { %2933 = vmatmul.mubr.f32.vlgmr.msra.gmra.mrb[16].mxu0 %v2668_v41 }
 0x724   : > { %3496 = vmatpush1.bf16.msra.mxu1 %v3495_v27  ;;  %3301 = vmatprep.mubr.msk.f32.mxu0 %vm1030_vm4, %v2671_v11  ;;  %p3848_p12 = pneg %p3847_p10 }
 0x725   : > { %3498 = vmatprep.subr.bf16.mxu1 %v3497_v33 }
 0x726   : > { %p3855_p7 = pnand %p3854_p4, %p3848_p12 }
 0x727   : > { %2939 = vmatmul.mubr.f32.gmra.mrb[18].mxu0 %v2670_v59  ;;  %v2807_v1 = vpop.permute.xlu1 %2806 }
 0x728   : > { %3500 = vmatpush1.bf16.msra.mxu1 %v3499_v56  ;;  %3302 = vmatprep.mubr.msk.f32.mxu0 %vm1030_vm4, %v2673_v60 }
 0x72a   : > { %v2812_v13 = vpop.permute.xlu0 %2811 }
 0x72b   : > { %2945 = vmatmul.mubr.f32.gmra.mrb[20].mxu0 %v2672_v28  ;;  %3046 = vmatmul.mubr.f32.vlgmr.msra.gmra.mrb[16].mxu1 %v2668_v41  ;;  %v2817_v4 = vpop.permute.xlu1 %2816 }
 0x72c   : > { %3303 = vmatprep.mubr.msk.f32.mxu0 %vm1030_vm4, %v2675_v8  ;;  %3309 = vmatprep.mubr.msk.f32.mxu1 %vm1030_vm4, %v2671_v11 }
 0x72e   : > { %v2822_v37 = vpop.permute.xlu0 %2821 }
 0x72f   : > { %2951 = vmatmul.mubr.f32.gmra.mrb[22].mxu0 %v2674_v19  ;;  %3052 = vmatmul.mubr.f32.gmra.mrb[18].mxu1 %v2670_v59  ;;  %v2827_v10 = vpop.permute.xlu1 %2826 }
 0x730   : > { %3304 = vmatprep.mubr.msk.f32.mxu0 %vm1030_vm4, %v2677_v22  ;;  %3310 = vmatprep.mubr.msk.f32.mxu1 %vm1030_vm4, %v2673_v60 }
 0x732   : > { %v2832_v3 = vpop.permute.xlu0 %2831 }
 0x733   : > { %2957 = vmatmul.mubr.f32.gmra.mrb[24].mxu0 %v2676_v43  ;;  %3058 = vmatmul.mubr.f32.gmra.mrb[20].mxu1 %v2672_v28  ;;  %v2837_v40 = vpop.permute.xlu1 %2836 }
 0x734   : > { %3305 = vmatprep.mubr.msk.f32.mxu0 %vm1030_vm4, %v2679_v55  ;;  %3311 = vmatprep.mubr.msk.f32.mxu1 %vm1030_vm4, %v2675_v8 }
 0x737   : > { %2963 = vmatmul.mubr.f32.gmra.mrb[26].mxu0 %v2678_v39  ;;  %3064 = vmatmul.mubr.f32.gmra.mrb[22].mxu1 %v2674_v19  ;;  %v2842_v19 = vpop.permute.xlu0 %2841 }
 0x738   : > { %3306 = vmatprep.mubr.msk.f32.mxu0 %vm1030_vm4, %v2681_v21  ;;  %3312 = vmatprep.mubr.msk.f32.mxu1 %vm1030_vm4, %v2677_v22 }
 0x73b   : > { %2969 = vmatmul.mubr.f32.gmra.mrb[28].mxu0 %v2680_v7  ;;  %3070 = vmatmul.mubr.f32.gmra.mrb[24].mxu1 %v2676_v43 }
 0x73c   : > { %3307 = vmatprep.mubr.msk.f32.mxu0 %vm1030_vm4, %v2683_v44  ;;  %3313 = vmatprep.mubr.msk.f32.mxu1 %vm1030_vm4, %v2679_v55 }
 0x73f   : > { %2975 = vmatmul.mubr.f32.gmra.mrb[30].mxu0 %v2682_v35  ;;  %3076 = vmatmul.mubr.f32.gmra.mrb[26].mxu1 %v2678_v39 }
 0x740   : > { %3314 = vmatprep.mubr.msk.f32.mxu1 %vm1030_vm4, %v2681_v21 }
 0x743   : > { %3082 = vmatmul.mubr.f32.gmra.mrb[28].mxu1 %v2680_v7 }
 0x744   : > { %3315 = vmatprep.mubr.msk.f32.mxu1 %vm1030_vm4, %v2683_v44 }
 0x747   : > { %3088 = vmatmul.mubr.f32.gmra.mrb[30].mxu1 %v2682_v35 }
 0x7f6   : > { %v2934_v9 = vpop.f32.mrb[16].mxu0 }
 0x7f7   : > { %v2935_v2 = vadd.f32 %v2934_v9, %v2807_v1  ;;  %v2936_v62 = vpop.f32.mrb[17].mxu0 }
 0x7f8   : > { %v2937_v52 = vadd.f32 %v2936_v62, %v2807_v1 }
 0x7f9   : > { %3094 = vst [vmem:[%s6037_s27] sm:$0xff] %v2935_v2 }
 0x7fa   : > { %3095 = vst [vmem:[%s6037_s27 + $0x8] sm:$0xff] %v2937_v52  ;;  %v2940_v30 = vpop.f32.mrb[18].mxu0 }
 0x7fb   : > { %v2941_v42 = vadd.f32 %v2940_v30, %v2812_v13  ;;  %v2942_v47 = vpop.f32.mrb[19].mxu0 }
 0x7fc   : > { %v2943_v45 = vadd.f32 %v2942_v47, %v2812_v13 }
 0x7fd   : > { %3096 = vst [vmem:[%s6037_s27 + $0x10] sm:$0xff] %v2941_v42 }
 0x7fe   : > { %3097 = vst [vmem:[%s6037_s27 + $0x18] sm:$0xff] %v2943_v45  ;;  %v2946_v29 = vpop.f32.mrb[20].mxu0  ;;  %v3047_v61 = vpop.f32.mrb[16].mxu1 }
 0x7ff   : > { %v2947_v32 = vadd.f32 %v2946_v29, %v2817_v4  ;;  %v3048_v34 = vadd.f32 %v3047_v61, %v2807_v1  ;;  %v2948_v24 = vpop.f32.mrb[21].mxu0  ;;  %v3049_v20 = vpop.f32.mrb[17].mxu1 }
 0x800   : > { %v2949_v25 = vadd.f32 %v2948_v24, %v2817_v4  ;;  %v3050_v53 = vadd.f32 %v3049_v20, %v2807_v1 }
 0x801   : > { %3098 = vst [vmem:[%s6037_s27 + $0x20] sm:$0xff] %v2947_v32  ;;  %3316 = vst [vmem:[%s6037_s27 + $0x80] sm:$0xff] %v3048_v34 }
 0x802   : > { %3099 = vst [vmem:[%s6037_s27 + $0x28] sm:$0xff] %v2949_v25  ;;  %3317 = vst [vmem:[%s6037_s27 + $0x88] sm:$0xff] %v3050_v53  ;;  %v2952_v12 = vpop.f32.mrb[22].mxu0  ;;  %v3053_v58 = vpop.f32.mrb[18].mxu1 }
 0x803   : > { %v2953_v0 = vadd.f32 %v2952_v12, %v2822_v37  ;;  %v3054_v49 = vadd.f32 %v3053_v58, %v2812_v13  ;;  %v2954_v15 = vpop.f32.mrb[23].mxu0  ;;  %v3055_v54 = vpop.f32.mrb[19].mxu1 }
 0x804   : > { %v2955_v63 = vadd.f32 %v2954_v15, %v2822_v37  ;;  %v3056_v46 = vadd.f32 %v3055_v54, %v2812_v13 }
 0x805   : > { %3100 = vst [vmem:[%s6037_s27 + $0x30] sm:$0xff] %v2953_v0  ;;  %3318 = vst [vmem:[%s6037_s27 + $0x90] sm:$0xff] %v3054_v49 }
 0x806   : > { %3101 = vst [vmem:[%s6037_s27 + $0x38] sm:$0xff] %v2955_v63  ;;  %3319 = vst [vmem:[%s6037_s27 + $0x98] sm:$0xff] %v3056_v46  ;;  %v2958_v17 = vpop.f32.mrb[24].mxu0  ;;  %v3059_v36 = vpop.f32.mrb[20].mxu1 }
 0x807   : > { %v2959_v23 = vadd.f32 %v2958_v17, %v2827_v10  ;;  %v3060_v14 = vadd.f32 %v3059_v36, %v2817_v4  ;;  %v2960_v51 = vpop.f32.mrb[25].mxu0  ;;  %v3061_v26 = vpop.f32.mrb[21].mxu1 }
 0x808   : > { %v2961_v48 = vadd.f32 %v2960_v51, %v2827_v10  ;;  %v3062_v57 = vadd.f32 %v3061_v26, %v2817_v4 }
 0x809   : > { %3102 = vst [vmem:[%s6037_s27 + $0x40] sm:$0xff] %v2959_v23  ;;  %3320 = vst [vmem:[%s6037_s27 + $0xa0] sm:$0xff] %v3060_v14 }
 0x80a   : > { %3103 = vst [vmem:[%s6037_s27 + $0x48] sm:$0xff] %v2961_v48  ;;  %3321 = vst [vmem:[%s6037_s27 + $0xa8] sm:$0xff] %v3062_v57  ;;  %v2964_v6 = vpop.f32.mrb[26].mxu0  ;;  %v3065_v16 = vpop.f32.mrb[22].mxu1 }
 0x80b   : > { %v2965_v18 = vadd.f32 %v2964_v6, %v2832_v3  ;;  %v3066_v38 = vadd.f32 %v3065_v16, %v2822_v37  ;;  %v2966_v27 = vpop.f32.mrb[27].mxu0  ;;  %v3067_v41 = vpop.f32.mrb[23].mxu1 }
 0x80c   : > { %v2967_v11 = vadd.f32 %v2966_v27, %v2832_v3  ;;  %v3068_v31 = vadd.f32 %v3067_v41, %v2822_v37 }
 0x80d   : > { %3104 = vst [vmem:[%s6037_s27 + $0x50] sm:$0xff] %v2965_v18  ;;  %3322 = vst [vmem:[%s6037_s27 + $0xb0] sm:$0xff] %v3066_v38 }
 0x80e   : > { %3105 = vst [vmem:[%s6037_s27 + $0x58] sm:$0xff] %v2967_v11  ;;  %3323 = vst [vmem:[%s6037_s27 + $0xb8] sm:$0xff] %v3068_v31  ;;  %v2970_v33 = vpop.f32.mrb[28].mxu0  ;;  %v3071_v5 = vpop.f32.mrb[24].mxu1 }
 0x80f   : > { %v2971_v50 = vadd.f32 %v2970_v33, %v2837_v40  ;;  %v3072_v56 = vadd.f32 %v3071_v5, %v2827_v10  ;;  %v2972_v59 = vpop.f32.mrb[29].mxu0  ;;  %v3073_v60 = vpop.f32.mrb[25].mxu1 }
 0x810   : > { %v2973_v28 = vadd.f32 %v2972_v59, %v2837_v40  ;;  %v3074_v8 = vadd.f32 %v3073_v60, %v2827_v10 }
 0x811   : > { %3106 = vst [vmem:[%s6037_s27 + $0x60] sm:$0xff] %v2971_v50  ;;  %3324 = vst [vmem:[%s6037_s27 + $0xc0] sm:$0xff] %v3072_v56 }
 0x812   : > { %3107 = vst [vmem:[%s6037_s27 + $0x68] sm:$0xff] %v2973_v28  ;;  %3325 = vst [vmem:[%s6037_s27 + $0xc8] sm:$0xff] %v3074_v8  ;;  %v2976_v22 = vpop.f32.mrb[30].mxu0  ;;  %v3077_v43 = vpop.f32.mrb[26].mxu1 }
 0x813   : > { %v2977_v55 = vadd.f32 %v2976_v22, %v2842_v19  ;;  %v3078_v39 = vadd.f32 %v3077_v43, %v2832_v3  ;;  %v2978_v21 = vpop.f32.mrb[31].mxu0  ;;  %v3079_v7 = vpop.f32.mrb[27].mxu1 }
 0x814   : > { %v2979_v44 = vadd.f32 %v2978_v21, %v2842_v19  ;;  %v3080_v35 = vadd.f32 %v3079_v7, %v2832_v3 }
 0x815   : > { %3108 = vst [vmem:[%s6037_s27 + $0x70] sm:$0xff] %v2977_v55  ;;  %3326 = vst [vmem:[%s6037_s27 + $0xd0] sm:$0xff] %v3078_v39 }
 0x816   : > { %3109 = vst [vmem:[%s6037_s27 + $0x78] sm:$0xff] %v2979_v44  ;;  %3327 = vst [vmem:[%s6037_s27 + $0xd8] sm:$0xff] %v3080_v35  ;;  %v3083_v1 = vpop.f32.mrb[28].mxu1 }
 0x817   : > { %v3084_v9 = vadd.f32 %v3083_v1, %v2837_v40  ;;  %v3085_v2 = vpop.f32.mrb[29].mxu1 }
 0x818   : > { %v3086_v62 = vadd.f32 %v3085_v2, %v2837_v40 }
 0x819   : > { %3328 = vst [vmem:[%s6037_s27 + $0xe0] sm:$0xff] %v3084_v9 }
 0x81a   : > { %3329 = vst [vmem:[%s6037_s27 + $0xe8] sm:$0xff] %v3086_v62  ;;  %v3089_v52 = vpop.f32.mrb[30].mxu1 }
 0x81b   : > { %v3090_v13 = vadd.f32 %v3089_v52, %v2842_v19  ;;  %v3091_v30 = vpop.f32.mrb[31].mxu1 }
 0x81c   : > { %v3092_v42 = vadd.f32 %v3091_v30, %v2842_v19 }
 0x81d   : > { %3330 = vst [vmem:[%s6037_s27 + $0xf0] sm:$0xff] %v3090_v13 }
 0x81e   : > { %3331 = vst [vmem:[%s6037_s27 + $0xf8] sm:$0xff] %v3092_v42 }
 0x81f   : > { %3858 = shalt.err (!%p3855_p7)
}
 0x820   : > { %s3859_s16 = scalar_lea.hbm %s6074_s26, 4096  ;;  %s3863_s29 = scalar_lea.hbm %s6132_s9, 8192 }
 0x821   : > { %p3860_p8 = scmp.ne.s32.totalorder %s6074_s26, %s3859_s16  ;;  %p3864_p1 = scmp.lt.u32.totalorder %s6074_s26, %s6132_s9 }
 0x822   : > { %p3865_p0 = scmp.lt.u32.totalorder %s3863_s29, %s3859_s16  ;;  %p3867_p6 = scmp.lt.u32.totalorder %s3859_s16, %s6074_s26 }
 0x823   : > { %p3861_p11 = pnand %p3860_p8, %p6333_p9 }
 0x824   : > { %p3866_p5 = por %p3865_p0, %p3864_p1 }
 0x825   : > { %p3862_p13 = pneg %p3861_p11 }
 0x826   : > { %p3868_p10 = por %p3867_p6, %p3866_p5 }
 0x828   : > { %p3869_p12 = pnand %p3868_p10, %p3862_p13 }
 0x82a   : > { %3872 = shalt.err (!%p3869_p12)
}
 0x82b   : > { %s3921_s23 = smov 256   ;;  %s3922_s28 = smov 16  }
 0x82c   : > { %3505 = dma.vmem_to_hbm [thread:$0]  (%p6333_p9), %s6076_s14, 4096, %s6074_s26, %s6082_s13, %s3921_s23, %s3921_s23, %s3922_s28  }
 0x82d PF: > { %p3517_p2 = scmp.ge.s32.totalorder %s3911_s12, 2  ;;  %s3157_s17 = sand.u32 1, %s3899_s30  }
 0x82e   : > { %p6334_p3 = scmp.ne.s32.totalorder %s6195_s20, 0  ;;  %s3158_s22 = scalar_lea.sflag [#allocation6], %s3157_s17 }
 0x830   : > { %p3512_p4 = pnand %p3517_p2, %p6334_p3 }
 0x832   : > { %3894 = dma.done.wait (!%p3512_p4), %s3158_s22, 4096  }
 0x833   : > { %3896 = vsyncadd (!%p3512_p4), %s3158_s22, 4294963200  ;;  %p20_p7 = scmp.ge.s32.totalorder %s3998_s15, 4   ;;  %s6335_s30 = smov %s3903_s10 }
 0x834   : > { %s6336_s10 = smov %s3907_s11  ;;  %s6337_s11 = smov %s4009_s18 }
 0x835   : > { %s6338_s12 = smov %s3998_s15  ;;  %22 = sbr.rel (!%p20_p7) target bundleno = 4 (0x4), region = 98 }
 0x83c   :  { %3163 = vsyncpa [#allocation5], 1 }
 0x83d   :  { %3165 = vsyncpa [#allocation5 + $0x1], 1 }
 0x83e   :  { %3166 = vsyncpa [#allocation6], 1 }
 0x83f   :  { %3168 = vsyncpa [#allocation6 + $0x1], 1 }

</bundles_post_ra>
